<compile_context>
chip_gen: v5e
topology: v5e:2x2
jax: 0.10.0
libtpu: 0.0.40
codegen_flags: <defaults>
</compile_context>

<pallas_src>
import functools

import jax
import jax.numpy as jnp
import numpy as np
from jax import lax
from jax.experimental import pallas as pl
from jax.experimental.pallas import tpu as pltpu


# ----------------------------------------------------------------------------
# Kernel
# ----------------------------------------------------------------------------
def _fill_patch_matrix(pad_ref, patch_ref, H, W):
    """im2col for a 3x3 stride-1 'same' conv.

    pad_ref:   (H+2, W+2, C) zero-halo padded activations (VMEM scratch)
    patch_ref: (H*W, 9*C)    patch matrix scratch; column block t = (ky*3+kx)
                             holds pad[ky:ky+H, kx:kx+W, :] flattened to (H*W, C).
    """
    C = pad_ref.shape[-1]
    xp = pad_ref[...]                                   # (H+2, W+2, C)
    t = 0
    for ky in range(3):                                 # static unroll (9 taps)
        for kx in range(3):
            patch_ref[:, t * C:(t + 1) * C] = (
                xp[ky:ky + H, kx:kx + W, :].reshape(H * W, C))
            t += 1


def adaptive_net_fused_kernel(x_ref, bw_ref, bb_ref, ew_ref, eb_ref,
                              hw_ref, hb_ref,
                              logits_ref, aux_ref, feat_ref, base_ref,
                              xpad_ref, bpad_ref, p1_ref, p2_ref):
    """Entire AdaptiveNet forward for one batch element.

    x_ref:   (1, H, W, Cin)        input image (NHWC)
    bw_ref:  (9*Cin, C1)           base conv weights, im2col layout
    bb_ref:  (1, C1)               base conv bias
    ew_ref:  (9*C1, C2)            both extractors' conv weights fused on Cout
    eb_ref:  (1, C2)               fused extractor bias
    hw_ref:  (C2, nb_cls+aux_cls)  packed fc + (zero-padded) aux_fc weights
    hb_ref:  (1, nb_cls+aux_cls)   packed fc + aux_fc bias
    outputs: logits (1,1,nb_cls), aux (1,1,aux_cls), feat (1,1,C2),
             base (1,H,W,C1)
    """
    H, W = x_ref.shape[1], x_ref.shape[2]
    C1 = bw_ref.shape[1]
    nb_classes = logits_ref.shape[2]

    # ---- halo-pad the input inside VMEM (zero border) ----
    xpad_ref[...] = jnp.zeros_like(xpad_ref)
    xpad_ref[1:H + 1, 1:W + 1, :] = x_ref[0]

    # ---- TaskAgnosticExtractor: 3x3 'same' conv as ONE im2col matmul + ReLU ----
    _fill_patch_matrix(xpad_ref, p1_ref, H, W)
    base = jnp.dot(p1_ref[...], bw_ref[...],
                   preferred_element_type=jnp.float32)          # (H*W, C1)
    base = jnp.maximum(base + bb_ref[...], 0.0)
    base_hwc = base.reshape(H, W, C1)

    base_ref[0] = base_hwc                                      # base feature map

    # ---- halo-pad the base map in VMEM for the extractor conv ----
    bpad_ref[...] = jnp.zeros_like(bpad_ref)
    bpad_ref[1:H + 1, 1:W + 1, :] = base_hwc

    # ---- both AdaptiveExtractors fused on Cout: ONE matmul + ReLU + GAP ----
    _fill_patch_matrix(bpad_ref, p2_ref, H, W)
    y = jnp.dot(p2_ref[...], ew_ref[...],
                preferred_element_type=jnp.float32)             # (H*W, C2)
    y = jnp.maximum(y + eb_ref[...], 0.0)
    feat = jnp.sum(y, axis=0, keepdims=True) * (1.0 / (H * W))  # (1, C2) == features row
    feat_ref[0] = feat

    # ---- heads fused into ONE matmul: [fc | zero-padded aux_fc] ----
    head = (jnp.dot(feat, hw_ref[...], preferred_element_type=jnp.float32)
            + hb_ref[...])                                      # (1, nb_cls+aux_cls)
    logits_ref[0] = head[:, :nb_classes]
    aux_ref[0] = head[:, nb_classes:]


# ----------------------------------------------------------------------------
# Pallas wrapper (single fused call)
# ----------------------------------------------------------------------------
def adaptive_net_forward(x_nhwc, bw, bb, ew, eb, hw, hb, nb_classes):
    B, H, W, Cin = x_nhwc.shape
    C1 = bw.shape[1]
    C2 = ew.shape[1]
    n_head = hw.shape[1]
    aux_classes = n_head - nb_classes

    # Advisory cost model for XLA's scheduler around the custom call.
    flops = 2 * B * (H * W * 9 * Cin * C1 + H * W * 9 * C1 * C2 + C2 * n_head)
    bytes_accessed = 4 * (x_nhwc.size + bw.size + bb.size + ew.size + eb.size
                          + hw.size + hb.size
                          + B * (H * W * C1 + C2 + n_head))

    logits, aux, feat, base = pl.pallas_call(
        adaptive_net_fused_kernel,
        out_shape=(
            jax.ShapeDtypeStruct((B, 1, nb_classes), jnp.float32),
            jax.ShapeDtypeStruct((B, 1, aux_classes), jnp.float32),
            jax.ShapeDtypeStruct((B, 1, C2), jnp.float32),
            jax.ShapeDtypeStruct((B, H, W, C1), jnp.float32),
        ),
        grid=(B,),
        in_specs=[
            pl.BlockSpec((1, H, W, Cin), lambda b: (b, 0, 0, 0)),
            # Weight/bias BlockSpecs use constant index_maps -> fetched once,
            # not re-DMA'd per batch grid step.
            pl.BlockSpec((9 * Cin, C1), lambda b: (0, 0)),
            pl.BlockSpec((1, C1), lambda b: (0, 0)),
            pl.BlockSpec((9 * C1, C2), lambda b: (0, 0)),
            pl.BlockSpec((1, C2), lambda b: (0, 0)),
            pl.BlockSpec((C2, n_head), lambda b: (0, 0)),
            pl.BlockSpec((1, n_head), lambda b: (0, 0)),
        ],
        out_specs=(
            pl.BlockSpec((1, 1, nb_classes), lambda b: (b, 0, 0)),
            pl.BlockSpec((1, 1, aux_classes), lambda b: (b, 0, 0)),
            pl.BlockSpec((1, 1, C2), lambda b: (b, 0, 0)),
            pl.BlockSpec((1, H, W, C1), lambda b: (b, 0, 0, 0)),
        ),
        scratch_shapes=[
            pltpu.VMEM((H + 2, W + 2, Cin), jnp.float32),   # padded input
            pltpu.VMEM((H + 2, W + 2, C1), jnp.float32),    # padded base map
            pltpu.VMEM((H * W, 9 * Cin), jnp.float32),      # im2col patches (base)
            pltpu.VMEM((H * W, 9 * C1), jnp.float32),       # im2col patches (extractors)
        ],
        compiler_params=pltpu.CompilerParams(
            dimension_semantics=("parallel",)),             # batch split across TCs (v7x)
        cost_estimate=pl.CostEstimate(flops=flops, transcendentals=0,
                                      bytes_accessed=bytes_accessed),
    )(x_nhwc, bw, bb, ew, eb, hw, hb)

    return (logits.reshape(B, nb_classes),
            aux.reshape(B, aux_classes),
            feat.reshape(B, C2),
            base)


# ----------------------------------------------------------------------------
# AdaptiveNet forward (parameter setup / packing in plain JAX)
# ----------------------------------------------------------------------------
class AdaptiveNetPallas:
    def __init__(self, key, *, in_ch=4, base_ch=16, out_dim=32,
                 n_extractors=2, nb_classes=10, last_task_size=5):
        ks = jax.random.split(key, 6 + 2 * n_extractors)
        self.out_dim = out_dim
        self.nb_classes = nb_classes
        # TaskAgnosticExtractor: conv3x3(in_ch -> base_ch) + ReLU
        self.base_w = 0.1 * jax.random.normal(ks[0], (3, 3, in_ch, base_ch), jnp.float32)
        self.base_b = 0.01 * jax.random.normal(ks[1], (base_ch,), jnp.float32)
        # AdaptiveExtractors: conv3x3(base_ch -> out_dim) + ReLU + global avg pool
        self.adapt = []
        for i in range(n_extractors):
            w = 0.1 * jax.random.normal(ks[2 + 2 * i], (3, 3, base_ch, out_dim), jnp.float32)
            b = 0.01 * jax.random.normal(ks[3 + 2 * i], (out_dim,), jnp.float32)
            self.adapt.append((w, b))
        feature_dim = out_dim * n_extractors
        # SimpleLinear weights stored pre-transposed as (in_dim, out_dim)
        self.fc_w = 0.1 * jax.random.normal(ks[-4], (feature_dim, nb_classes), jnp.float32)
        self.fc_b = 0.01 * jax.random.normal(ks[-3], (nb_classes,), jnp.float32)
        self.aux_w = 0.1 * jax.random.normal(ks[-2], (out_dim, last_task_size + 1), jnp.float32)
        self.aux_b = 0.01 * jax.random.normal(ks[-1], (last_task_size + 1,), jnp.float32)

        # ---- pre-pack weights into the kernel's im2col / fused layouts (once) ----
        self.base_w_mat = self.base_w.reshape(9 * in_ch, base_ch)            # (36, 16)
        self.base_b_row = self.base_b.reshape(1, base_ch)
        ext_w = jnp.concatenate([w for (w, _) in self.adapt], axis=-1)       # (3,3,C1,2*out_dim)
        self.ext_w_mat = ext_w.reshape(9 * base_ch, feature_dim)             # (144, 64)
        self.ext_b_row = jnp.concatenate([b for (_, b) in self.adapt]).reshape(1, feature_dim)
        # Packed heads: [fc_w | aux_w zero-padded onto the last out_dim rows].
        aux_w_full = jnp.zeros((feature_dim, last_task_size + 1), jnp.float32)
        aux_w_full = aux_w_full.at[feature_dim - out_dim:, :].set(self.aux_w)
        self.head_w = jnp.concatenate([self.fc_w, aux_w_full], axis=1)       # (64, 16)
        self.head_b = jnp.concatenate([self.fc_b, self.aux_b]).reshape(1, -1)

    @functools.partial(jax.jit, static_argnums=0)
    def __call__(self, x_nchw):
        # layout: convert NCHW (torch) -> NHWC so channels sit on the lane axis.
        x = jnp.transpose(x_nchw, (0, 2, 3, 1)).astype(jnp.float32)
        logits, aux_logits, features, base_nhwc = adaptive_net_forward(
            x, self.base_w_mat, self.base_b_row, self.ext_w_mat, self.ext_b_row,
            self.head_w, self.head_b, self.nb_classes)
        return {
            "logits": logits,
            "aux_logits": aux_logits,
            "features": features,
            "base_features": jnp.transpose(base_nhwc, (0, 3, 1, 2)),   # back to NCHW
        }

    # Pure-JAX reference (no Pallas) for correctness checking.
    def reference(self, x_nchw):
        x = jnp.transpose(x_nchw, (0, 2, 3, 1)).astype(jnp.float32)
        dn = ("NHWC", "HWIO", "NHWC")
        base = jax.nn.relu(
            lax.conv_general_dilated(x, self.base_w, (1, 1), "SAME",
                                     dimension_numbers=dn) + self.base_b)
        feats = []
        for w, b in self.adapt:
            y = jax.nn.relu(
                lax.conv_general_dilated(base, w, (1, 1), "SAME",
                                         dimension_numbers=dn) + b)
            feats.append(jnp.mean(y, axis=(1, 2)))
        features = jnp.concatenate(feats, axis=1)
        logits = features @ self.fc_w + self.fc_b
        aux_logits = feats[-1] @ self.aux_w + self.aux_b
        return {
            "logits": logits,
            "aux_logits": aux_logits,
            "features": features,
            "base_features": jnp.transpose(base, (0, 3, 1, 2)),
        }

# TODO(synk): update_fc / weight_align / copy / load_checkpoint are training-time
# state management (no forward compute) and are not implemented as kernels.


if __name__ == "__main__":
    key = jax.random.PRNGKey(0)
    pkey, xkey = jax.random.split(key)
    net = AdaptiveNetPallas(pkey)          # 2 adaptive extractors, 10 classes
    x = jax.random.normal(xkey, (2, 4, 16, 16), jnp.float32)   # NCHW, like torch

    out = net(x)
    jax.block_until_ready(out)

    ref = net.reference(x)
    for k in ("logits", "aux_logits", "features", "base_features"):
        np.testing.assert_allclose(np.asarray(out[k]), np.asarray(ref[k]),
                                   rtol=1e-4, atol=1e-4)

    assert out["logits"].shape == (2, 10)
    assert out["aux_logits"].shape == (2, 6)
    assert out["features"].shape == (2, 64)
    assert out["base_features"].shape == (2, 16, 16, 16)
    print("KERNEL_OK")
</pallas_src>

<mosaic_0001>
module attributes {stable_mosaic.version = 11 : i64} {
  func.func @adaptive_net_fused_kernel(%arg0: i32, %arg1: memref<1x16x16x4xf32, #tpu.memory_space<vmem>>, %arg2: memref<36x16xf32, #tpu.memory_space<vmem>>, %arg3: memref<1x16xf32, #tpu.memory_space<vmem>>, %arg4: memref<144x64xf32, #tpu.memory_space<vmem>>, %arg5: memref<1x64xf32, #tpu.memory_space<vmem>>, %arg6: memref<64x16xf32, #tpu.memory_space<vmem>>, %arg7: memref<1x16xf32, #tpu.memory_space<vmem>>, %arg8: memref<1x1x10xf32, #tpu.memory_space<vmem>>, %arg9: memref<1x1x6xf32, #tpu.memory_space<vmem>>, %arg10: memref<1x1x64xf32, #tpu.memory_space<vmem>>, %arg11: memref<1x16x16x16xf32, #tpu.memory_space<vmem>>, %arg12: memref<18x18x4xf32, #tpu.memory_space<vmem>>, %arg13: memref<18x18x16xf32, #tpu.memory_space<vmem>>, %arg14: memref<256x36xf32, #tpu.memory_space<vmem>>, %arg15: memref<256x144xf32, #tpu.memory_space<vmem>>) attributes {dimension_semantics = [#tpu.dimension_semantics<parallel>], iteration_bounds = array<i64: 2>, scalar_prefetch = 0 : i64, scratch_operands = 4 : i64, tpu.core_type = #tpu.core_type<tc>, window_params = [{transform_indices = @transform_0, window_bounds = array<i64: 1, 16, 16, 4>}, {pipeline_mode = #tpu.pipeline_mode<synchronous>, transform_indices = @transform_1, window_bounds = array<i64: 36, 16>}, {pipeline_mode = #tpu.pipeline_mode<synchronous>, transform_indices = @transform_2, window_bounds = array<i64: 1, 16>}, {pipeline_mode = #tpu.pipeline_mode<synchronous>, transform_indices = @transform_3, window_bounds = array<i64: 144, 64>}, {pipeline_mode = #tpu.pipeline_mode<synchronous>, transform_indices = @transform_4, window_bounds = array<i64: 1, 64>}, {pipeline_mode = #tpu.pipeline_mode<synchronous>, transform_indices = @transform_5, window_bounds = array<i64: 64, 16>}, {pipeline_mode = #tpu.pipeline_mode<synchronous>, transform_indices = @transform_6, window_bounds = array<i64: 1, 16>}, {transform_indices = @transform_7, window_bounds = array<i64: 1, 1, 10>}, {transform_indices = @transform_8, window_bounds = array<i64: 1, 1, 6>}, {transform_indices = @transform_9, window_bounds = array<i64: 1, 1, 64>}, {transform_indices = @transform_10, window_bounds = array<i64: 1, 16, 16, 16>}]} {
    %cst = arith.constant 0.000000e+00 : f32
    %0 = vector.broadcast %cst : f32 to vector<18x18x4xf32>
    %c0 = arith.constant 0 : index
    %c0_0 = arith.constant 0 : index
    %c0_1 = arith.constant 0 : index
    %1 = vector.load %arg12[%c0, %c0_0, %c0_1] : memref<18x18x4xf32, #tpu.memory_space<vmem>>, vector<18x18x4xf32>
    tpu.vector_store %arg12[%c0, %c0_0, %c0_1], %0 {strides = array<i32>} : memref<18x18x4xf32, #tpu.memory_space<vmem>>, vector<18x18x4xf32>,
    %c0_2 = arith.constant 0 : index
    %c0_3 = arith.constant 0 : index
    %c0_4 = arith.constant 0 : index
    %c0_5 = arith.constant 0 : index
    %2 = vector.load %arg1[%c0_2, %c0_3, %c0_4, %c0_5] : memref<1x16x16x4xf32, #tpu.memory_space<vmem>>, vector<1x16x16x4xf32>
    %3 = vector.shape_cast %2 : vector<1x16x16x4xf32> to vector<16x16x4xf32>
    %c1 = arith.constant 1 : index
    %c1_6 = arith.constant 1 : index
    %c0_7 = arith.constant 0 : index
    %4 = vector.load %arg12[%c1, %c1_6, %c0_7] : memref<18x18x4xf32, #tpu.memory_space<vmem>>, vector<16x16x4xf32>
    tpu.vector_store %arg12[%c1, %c1_6, %c0_7], %3 {strides = array<i32>} : memref<18x18x4xf32, #tpu.memory_space<vmem>>, vector<16x16x4xf32>,
    %c0_8 = arith.constant 0 : index
    %c0_9 = arith.constant 0 : index
    %c0_10 = arith.constant 0 : index
    %5 = vector.load %arg12[%c0_8, %c0_9, %c0_10] : memref<18x18x4xf32, #tpu.memory_space<vmem>>, vector<18x18x4xf32>
    %6 = vector.extract_strided_slice %5 {offsets = [0, 0, 0], sizes = [16, 16, 4], strides = [1, 1, 1]} : vector<18x18x4xf32> to vector<16x16x4xf32>
    %7 = vector.shape_cast %6 : vector<16x16x4xf32> to vector<256x4xf32>
    %c0_11 = arith.constant 0 : index
    %c0_12 = arith.constant 0 : index
    %8 = vector.load %arg14[%c0_11, %c0_12] : memref<256x36xf32, #tpu.memory_space<vmem>>, vector<256x4xf32>
    tpu.vector_store %arg14[%c0_11, %c0_12], %7 {strides = array<i32>} : memref<256x36xf32, #tpu.memory_space<vmem>>, vector<256x4xf32>,
    %9 = vector.extract_strided_slice %5 {offsets = [0, 1, 0], sizes = [16, 16, 4], strides = [1, 1, 1]} : vector<18x18x4xf32> to vector<16x16x4xf32>
    %10 = vector.shape_cast %9 : vector<16x16x4xf32> to vector<256x4xf32>
    %c0_13 = arith.constant 0 : index
    %c4 = arith.constant 4 : index
    %11 = vector.load %arg14[%c0_13, %c4] : memref<256x36xf32, #tpu.memory_space<vmem>>, vector<256x4xf32>
    tpu.vector_store %arg14[%c0_13, %c4], %10 {strides = array<i32>} : memref<256x36xf32, #tpu.memory_space<vmem>>, vector<256x4xf32>,
    %12 = vector.extract_strided_slice %5 {offsets = [0, 2, 0], sizes = [16, 16, 4], strides = [1, 1, 1]} : vector<18x18x4xf32> to vector<16x16x4xf32>
    %13 = vector.shape_cast %12 : vector<16x16x4xf32> to vector<256x4xf32>
    %c0_14 = arith.constant 0 : index
    %c8 = arith.constant 8 : index
    %14 = vector.load %arg14[%c0_14, %c8] : memref<256x36xf32, #tpu.memory_space<vmem>>, vector<256x4xf32>
    tpu.vector_store %arg14[%c0_14, %c8], %13 {strides = array<i32>} : memref<256x36xf32, #tpu.memory_space<vmem>>, vector<256x4xf32>,
    %15 = vector.extract_strided_slice %5 {offsets = [1, 0, 0], sizes = [16, 16, 4], strides = [1, 1, 1]} : vector<18x18x4xf32> to vector<16x16x4xf32>
    %16 = vector.shape_cast %15 : vector<16x16x4xf32> to vector<256x4xf32>
    %c0_15 = arith.constant 0 : index
    %c12 = arith.constant 12 : index
    %17 = vector.load %arg14[%c0_15, %c12] : memref<256x36xf32, #tpu.memory_space<vmem>>, vector<256x4xf32>
    tpu.vector_store %arg14[%c0_15, %c12], %16 {strides = array<i32>} : memref<256x36xf32, #tpu.memory_space<vmem>>, vector<256x4xf32>,
    %18 = vector.extract_strided_slice %5 {offsets = [1, 1, 0], sizes = [16, 16, 4], strides = [1, 1, 1]} : vector<18x18x4xf32> to vector<16x16x4xf32>
    %19 = vector.shape_cast %18 : vector<16x16x4xf32> to vector<256x4xf32>
    %c0_16 = arith.constant 0 : index
    %c16 = arith.constant 16 : index
    %20 = vector.load %arg14[%c0_16, %c16] : memref<256x36xf32, #tpu.memory_space<vmem>>, vector<256x4xf32>
    tpu.vector_store %arg14[%c0_16, %c16], %19 {strides = array<i32>} : memref<256x36xf32, #tpu.memory_space<vmem>>, vector<256x4xf32>,
    %21 = vector.extract_strided_slice %5 {offsets = [1, 2, 0], sizes = [16, 16, 4], strides = [1, 1, 1]} : vector<18x18x4xf32> to vector<16x16x4xf32>
    %22 = vector.shape_cast %21 : vector<16x16x4xf32> to vector<256x4xf32>
    %c0_17 = arith.constant 0 : index
    %c20 = arith.constant 20 : index
    %23 = vector.load %arg14[%c0_17, %c20] : memref<256x36xf32, #tpu.memory_space<vmem>>, vector<256x4xf32>
    tpu.vector_store %arg14[%c0_17, %c20], %22 {strides = array<i32>} : memref<256x36xf32, #tpu.memory_space<vmem>>, vector<256x4xf32>,
    %24 = vector.extract_strided_slice %5 {offsets = [2, 0, 0], sizes = [16, 16, 4], strides = [1, 1, 1]} : vector<18x18x4xf32> to vector<16x16x4xf32>
    %25 = vector.shape_cast %24 : vector<16x16x4xf32> to vector<256x4xf32>
    %c0_18 = arith.constant 0 : index
    %c24 = arith.constant 24 : index
    %26 = vector.load %arg14[%c0_18, %c24] : memref<256x36xf32, #tpu.memory_space<vmem>>, vector<256x4xf32>
    tpu.vector_store %arg14[%c0_18, %c24], %25 {strides = array<i32>} : memref<256x36xf32, #tpu.memory_space<vmem>>, vector<256x4xf32>,
    %27 = vector.extract_strided_slice %5 {offsets = [2, 1, 0], sizes = [16, 16, 4], strides = [1, 1, 1]} : vector<18x18x4xf32> to vector<16x16x4xf32>
    %28 = vector.shape_cast %27 : vector<16x16x4xf32> to vector<256x4xf32>
    %c0_19 = arith.constant 0 : index
    %c28 = arith.constant 28 : index
    %29 = vector.load %arg14[%c0_19, %c28] : memref<256x36xf32, #tpu.memory_space<vmem>>, vector<256x4xf32>
    tpu.vector_store %arg14[%c0_19, %c28], %28 {strides = array<i32>} : memref<256x36xf32, #tpu.memory_space<vmem>>, vector<256x4xf32>,
    %30 = vector.extract_strided_slice %5 {offsets = [2, 2, 0], sizes = [16, 16, 4], strides = [1, 1, 1]} : vector<18x18x4xf32> to vector<16x16x4xf32>
    %31 = vector.shape_cast %30 : vector<16x16x4xf32> to vector<256x4xf32>
    %c0_20 = arith.constant 0 : index
    %c32 = arith.constant 32 : index
    %32 = vector.load %arg14[%c0_20, %c32] : memref<256x36xf32, #tpu.memory_space<vmem>>, vector<256x4xf32>
    tpu.vector_store %arg14[%c0_20, %c32], %31 {strides = array<i32>} : memref<256x36xf32, #tpu.memory_space<vmem>>, vector<256x4xf32>,
    %c0_21 = arith.constant 0 : index
    %c0_22 = arith.constant 0 : index
    %33 = vector.load %arg14[%c0_21, %c0_22] : memref<256x36xf32, #tpu.memory_space<vmem>>, vector<256x36xf32>
    %c0_23 = arith.constant 0 : index
    %c0_24 = arith.constant 0 : index
    %34 = vector.load %arg2[%c0_23, %c0_24] : memref<36x16xf32, #tpu.memory_space<vmem>>, vector<36x16xf32>
    %cst_25 = arith.constant dense<0.000000e+00> : vector<256x16xf32>
    %35 = tpu.matmul %33, %34, %cst_25 {dimension_numbers = #tpu.dot_dimension_numbers<[1], [0], [0], [1], [0, 0, 1, 1], [], []>} : vector<256x36xf32>, vector<36x16xf32>, vector<256x16xf32> -> vector<256x16xf32>
    %c0_26 = arith.constant 0 : index
    %c0_27 = arith.constant 0 : index
    %36 = vector.load %arg3[%c0_26, %c0_27] : memref<1x16xf32, #tpu.memory_space<vmem>>, vector<1x16xf32>
    %37 = vector.broadcast %36 : vector<1x16xf32> to vector<256x16xf32>
    %38 = arith.addf %35, %37 : vector<256x16xf32>
    %cst_28 = arith.constant 0.000000e+00 : f32
    %39 = vector.broadcast %cst_28 : f32 to vector<256x16xf32>
    %40 = arith.maximumf %38, %39 : vector<256x16xf32>
    %41 = vector.shape_cast %40 : vector<256x16xf32> to vector<16x16x16xf32>
    %c0_29 = arith.constant 0 : index
    %c0_30 = arith.constant 0 : index
    %c0_31 = arith.constant 0 : index
    %c0_32 = arith.constant 0 : index
    %42 = vector.load %arg11[%c0_29, %c0_30, %c0_31, %c0_32] : memref<1x16x16x16xf32, #tpu.memory_space<vmem>>, vector<1x16x16x16xf32>
    %43 = vector.shape_cast %42 : vector<1x16x16x16xf32> to vector<16x16x16xf32>
    %44 = vector.shape_cast %41 : vector<16x16x16xf32> to vector<1x16x16x16xf32>
    tpu.vector_store %arg11[%c0_29, %c0_30, %c0_31, %c0_32], %44 {strides = array<i32>} : memref<1x16x16x16xf32, #tpu.memory_space<vmem>>, vector<1x16x16x16xf32>,
    %cst_33 = arith.constant 0.000000e+00 : f32
    %45 = vector.broadcast %cst_33 : f32 to vector<18x18x16xf32>
    %c0_34 = arith.constant 0 : index
    %c0_35 = arith.constant 0 : index
    %c0_36 = arith.constant 0 : index
    %46 = vector.load %arg13[%c0_34, %c0_35, %c0_36] : memref<18x18x16xf32, #tpu.memory_space<vmem>>, vector<18x18x16xf32>
    tpu.vector_store %arg13[%c0_34, %c0_35, %c0_36], %45 {strides = array<i32>} : memref<18x18x16xf32, #tpu.memory_space<vmem>>, vector<18x18x16xf32>,
    %c1_37 = arith.constant 1 : index
    %c1_38 = arith.constant 1 : index
    %c0_39 = arith.constant 0 : index
    %47 = vector.load %arg13[%c1_37, %c1_38, %c0_39] : memref<18x18x16xf32, #tpu.memory_space<vmem>>, vector<16x16x16xf32>
    tpu.vector_store %arg13[%c1_37, %c1_38, %c0_39], %41 {strides = array<i32>} : memref<18x18x16xf32, #tpu.memory_space<vmem>>, vector<16x16x16xf32>,
    %c0_40 = arith.constant 0 : index
    %c0_41 = arith.constant 0 : index
    %c0_42 = arith.constant 0 : index
    %48 = vector.load %arg13[%c0_40, %c0_41, %c0_42] : memref<18x18x16xf32, #tpu.memory_space<vmem>>, vector<18x18x16xf32>
    %49 = vector.extract_strided_slice %48 {offsets = [0, 0, 0], sizes = [16, 16, 16], strides = [1, 1, 1]} : vector<18x18x16xf32> to vector<16x16x16xf32>
    %50 = vector.shape_cast %49 : vector<16x16x16xf32> to vector<256x16xf32>
    %c0_43 = arith.constant 0 : index
    %c0_44 = arith.constant 0 : index
    %51 = vector.load %arg15[%c0_43, %c0_44] : memref<256x144xf32, #tpu.memory_space<vmem>>, vector<256x16xf32>
    tpu.vector_store %arg15[%c0_43, %c0_44], %50 {strides = array<i32>} : memref<256x144xf32, #tpu.memory_space<vmem>>, vector<256x16xf32>,
    %52 = vector.extract_strided_slice %48 {offsets = [0, 1, 0], sizes = [16, 16, 16], strides = [1, 1, 1]} : vector<18x18x16xf32> to vector<16x16x16xf32>
    %53 = vector.shape_cast %52 : vector<16x16x16xf32> to vector<256x16xf32>
    %c0_45 = arith.constant 0 : index
    %c16_46 = arith.constant 16 : index
    %54 = vector.load %arg15[%c0_45, %c16_46] : memref<256x144xf32, #tpu.memory_space<vmem>>, vector<256x16xf32>
    tpu.vector_store %arg15[%c0_45, %c16_46], %53 {strides = array<i32>} : memref<256x144xf32, #tpu.memory_space<vmem>>, vector<256x16xf32>,
    %55 = vector.extract_strided_slice %48 {offsets = [0, 2, 0], sizes = [16, 16, 16], strides = [1, 1, 1]} : vector<18x18x16xf32> to vector<16x16x16xf32>
    %56 = vector.shape_cast %55 : vector<16x16x16xf32> to vector<256x16xf32>
    %c0_47 = arith.constant 0 : index
    %c32_48 = arith.constant 32 : index
    %57 = vector.load %arg15[%c0_47, %c32_48] : memref<256x144xf32, #tpu.memory_space<vmem>>, vector<256x16xf32>
    tpu.vector_store %arg15[%c0_47, %c32_48], %56 {strides = array<i32>} : memref<256x144xf32, #tpu.memory_space<vmem>>, vector<256x16xf32>,
    %58 = vector.extract_strided_slice %48 {offsets = [1, 0, 0], sizes = [16, 16, 16], strides = [1, 1, 1]} : vector<18x18x16xf32> to vector<16x16x16xf32>
    %59 = vector.shape_cast %58 : vector<16x16x16xf32> to vector<256x16xf32>
    %c0_49 = arith.constant 0 : index
    %c48 = arith.constant 48 : index
    %60 = vector.load %arg15[%c0_49, %c48] : memref<256x144xf32, #tpu.memory_space<vmem>>, vector<256x16xf32>
    tpu.vector_store %arg15[%c0_49, %c48], %59 {strides = array<i32>} : memref<256x144xf32, #tpu.memory_space<vmem>>, vector<256x16xf32>,
    %61 = vector.extract_strided_slice %48 {offsets = [1, 1, 0], sizes = [16, 16, 16], strides = [1, 1, 1]} : vector<18x18x16xf32> to vector<16x16x16xf32>
    %62 = vector.shape_cast %61 : vector<16x16x16xf32> to vector<256x16xf32>
    %c0_50 = arith.constant 0 : index
    %c64 = arith.constant 64 : index
    %63 = vector.load %arg15[%c0_50, %c64] : memref<256x144xf32, #tpu.memory_space<vmem>>, vector<256x16xf32>
    tpu.vector_store %arg15[%c0_50, %c64], %62 {strides = array<i32>} : memref<256x144xf32, #tpu.memory_space<vmem>>, vector<256x16xf32>,
    %64 = vector.extract_strided_slice %48 {offsets = [1, 2, 0], sizes = [16, 16, 16], strides = [1, 1, 1]} : vector<18x18x16xf32> to vector<16x16x16xf32>
    %65 = vector.shape_cast %64 : vector<16x16x16xf32> to vector<256x16xf32>
    %c0_51 = arith.constant 0 : index
    %c80 = arith.constant 80 : index
    %66 = vector.load %arg15[%c0_51, %c80] : memref<256x144xf32, #tpu.memory_space<vmem>>, vector<256x16xf32>
    tpu.vector_store %arg15[%c0_51, %c80], %65 {strides = array<i32>} : memref<256x144xf32, #tpu.memory_space<vmem>>, vector<256x16xf32>,
    %67 = vector.extract_strided_slice %48 {offsets = [2, 0, 0], sizes = [16, 16, 16], strides = [1, 1, 1]} : vector<18x18x16xf32> to vector<16x16x16xf32>
    %68 = vector.shape_cast %67 : vector<16x16x16xf32> to vector<256x16xf32>
    %c0_52 = arith.constant 0 : index
    %c96 = arith.constant 96 : index
    %69 = vector.load %arg15[%c0_52, %c96] : memref<256x144xf32, #tpu.memory_space<vmem>>, vector<256x16xf32>
    tpu.vector_store %arg15[%c0_52, %c96], %68 {strides = array<i32>} : memref<256x144xf32, #tpu.memory_space<vmem>>, vector<256x16xf32>,
    %70 = vector.extract_strided_slice %48 {offsets = [2, 1, 0], sizes = [16, 16, 16], strides = [1, 1, 1]} : vector<18x18x16xf32> to vector<16x16x16xf32>
    %71 = vector.shape_cast %70 : vector<16x16x16xf32> to vector<256x16xf32>
    %c0_53 = arith.constant 0 : index
    %c112 = arith.constant 112 : index
    %72 = vector.load %arg15[%c0_53, %c112] : memref<256x144xf32, #tpu.memory_space<vmem>>, vector<256x16xf32>
    tpu.vector_store %arg15[%c0_53, %c112], %71 {strides = array<i32>} : memref<256x144xf32, #tpu.memory_space<vmem>>, vector<256x16xf32>,
    %73 = vector.extract_strided_slice %48 {offsets = [2, 2, 0], sizes = [16, 16, 16], strides = [1, 1, 1]} : vector<18x18x16xf32> to vector<16x16x16xf32>
    %74 = vector.shape_cast %73 : vector<16x16x16xf32> to vector<256x16xf32>
    %c0_54 = arith.constant 0 : index
    %c128 = arith.constant 128 : index
    %75 = vector.load %arg15[%c0_54, %c128] : memref<256x144xf32, #tpu.memory_space<vmem>>, vector<256x16xf32>
    tpu.vector_store %arg15[%c0_54, %c128], %74 {strides = array<i32>} : memref<256x144xf32, #tpu.memory_space<vmem>>, vector<256x16xf32>,
    %c0_55 = arith.constant 0 : index
    %c0_56 = arith.constant 0 : index
    %76 = vector.load %arg15[%c0_55, %c0_56] : memref<256x144xf32, #tpu.memory_space<vmem>>, vector<256x144xf32>
    %c0_57 = arith.constant 0 : index
    %c0_58 = arith.constant 0 : index
    %77 = vector.load %arg4[%c0_57, %c0_58] : memref<144x64xf32, #tpu.memory_space<vmem>>, vector<144x64xf32>
    %cst_59 = arith.constant dense<0.000000e+00> : vector<256x64xf32>
    %78 = tpu.matmul %76, %77, %cst_59 {dimension_numbers = #tpu.dot_dimension_numbers<[1], [0], [0], [1], [0, 0, 1, 1], [], []>} : vector<256x144xf32>, vector<144x64xf32>, vector<256x64xf32> -> vector<256x64xf32>
    %c0_60 = arith.constant 0 : index
    %c0_61 = arith.constant 0 : index
    %79 = vector.load %arg5[%c0_60, %c0_61] : memref<1x64xf32, #tpu.memory_space<vmem>>, vector<1x64xf32>
    %80 = vector.broadcast %79 : vector<1x64xf32> to vector<256x64xf32>
    %81 = arith.addf %78, %80 : vector<256x64xf32>
    %cst_62 = arith.constant 0.000000e+00 : f32
    %82 = vector.broadcast %cst_62 : f32 to vector<256x64xf32>
    %83 = arith.maximumf %81, %82 : vector<256x64xf32>
    %cst_63 = arith.constant dense<0.000000e+00> : vector<64xf32>
    %84 = vector.multi_reduction <add>, %83, %cst_63 [0] : vector<256x64xf32> to vector<64xf32>
    %85 = vector.shape_cast %84 : vector<64xf32> to vector<1x64xf32>
    %cst_64 = arith.constant 3.906250e-03 : f32
    %86 = vector.broadcast %cst_64 : f32 to vector<1x64xf32>
    %87 = arith.mulf %85, %86 : vector<1x64xf32>
    %c0_65 = arith.constant 0 : index
    %c0_66 = arith.constant 0 : index
    %c0_67 = arith.constant 0 : index
    %88 = vector.load %arg10[%c0_65, %c0_66, %c0_67] : memref<1x1x64xf32, #tpu.memory_space<vmem>>, vector<1x1x64xf32>
    %89 = vector.shape_cast %88 : vector<1x1x64xf32> to vector<1x64xf32>
    %90 = vector.shape_cast %87 : vector<1x64xf32> to vector<1x1x64xf32>
    tpu.vector_store %arg10[%c0_65, %c0_66, %c0_67], %90 {strides = array<i32>} : memref<1x1x64xf32, #tpu.memory_space<vmem>>, vector<1x1x64xf32>,
    %c0_68 = arith.constant 0 : index
    %c0_69 = arith.constant 0 : index
    %91 = vector.load %arg6[%c0_68, %c0_69] : memref<64x16xf32, #tpu.memory_space<vmem>>, vector<64x16xf32>
    %cst_70 = arith.constant dense<0.000000e+00> : vector<1x16xf32>
    %92 = tpu.matmul %87, %91, %cst_70 {dimension_numbers = #tpu.dot_dimension_numbers<[1], [0], [0], [1], [0, 0, 1, 1], [], []>} : vector<1x64xf32>, vector<64x16xf32>, vector<1x16xf32> -> vector<1x16xf32>
    %c0_71 = arith.constant 0 : index
    %c0_72 = arith.constant 0 : index
    %93 = vector.load %arg7[%c0_71, %c0_72] : memref<1x16xf32, #tpu.memory_space<vmem>>, vector<1x16xf32>
    %94 = arith.addf %92, %93 : vector<1x16xf32>
    %95 = vector.extract_strided_slice %94 {offsets = [0, 0], sizes = [1, 10], strides = [1, 1]} : vector<1x16xf32> to vector<1x10xf32>
    %c0_73 = arith.constant 0 : index
    %c0_74 = arith.constant 0 : index
    %c0_75 = arith.constant 0 : index
    %96 = vector.load %arg8[%c0_73, %c0_74, %c0_75] : memref<1x1x10xf32, #tpu.memory_space<vmem>>, vector<1x1x10xf32>
    %97 = vector.shape_cast %96 : vector<1x1x10xf32> to vector<1x10xf32>
    %98 = vector.shape_cast %95 : vector<1x10xf32> to vector<1x1x10xf32>
    tpu.vector_store %arg8[%c0_73, %c0_74, %c0_75], %98 {strides = array<i32>} : memref<1x1x10xf32, #tpu.memory_space<vmem>>, vector<1x1x10xf32>,
    %99 = vector.extract_strided_slice %94 {offsets = [0, 10], sizes = [1, 6], strides = [1, 1]} : vector<1x16xf32> to vector<1x6xf32>
    %c0_76 = arith.constant 0 : index
    %c0_77 = arith.constant 0 : index
    %c0_78 = arith.constant 0 : index
    %100 = vector.load %arg9[%c0_76, %c0_77, %c0_78] : memref<1x1x6xf32, #tpu.memory_space<vmem>>, vector<1x1x6xf32>
    %101 = vector.shape_cast %100 : vector<1x1x6xf32> to vector<1x6xf32>
    %102 = vector.shape_cast %99 : vector<1x6xf32> to vector<1x1x6xf32>
    tpu.vector_store %arg9[%c0_76, %c0_77, %c0_78], %102 {strides = array<i32>} : memref<1x1x6xf32, #tpu.memory_space<vmem>>, vector<1x1x6xf32>,
    return
  }
  func.func @transform_0(%arg0: i32) -> (i32, i32, i32, i32) {
    %c0_i32 = arith.constant 0 : i32
    %c0_i32_0 = arith.constant 0 : i32
    %c0_i32_1 = arith.constant 0 : i32
    %c0_i32_2 = arith.constant 0 : i32
    return %arg0, %c0_i32, %c0_i32_0, %c0_i32_1 : i32, i32, i32, i32
  }
  func.func @transform_1(%arg0: i32) -> (i32, i32) {
    %c0_i32 = arith.constant 0 : i32
    %c0_i32_0 = arith.constant 0 : i32
    %c0_i32_1 = arith.constant 0 : i32
    return %c0_i32, %c0_i32_0 : i32, i32
  }
  func.func @transform_2(%arg0: i32) -> (i32, i32) {
    %c0_i32 = arith.constant 0 : i32
    %c0_i32_0 = arith.constant 0 : i32
    %c0_i32_1 = arith.constant 0 : i32
    return %c0_i32, %c0_i32_0 : i32, i32
  }
  func.func @transform_3(%arg0: i32) -> (i32, i32) {
    %c0_i32 = arith.constant 0 : i32
    %c0_i32_0 = arith.constant 0 : i32
    %c0_i32_1 = arith.constant 0 : i32
    return %c0_i32, %c0_i32_0 : i32, i32
  }
  func.func @transform_4(%arg0: i32) -> (i32, i32) {
    %c0_i32 = arith.constant 0 : i32
    %c0_i32_0 = arith.constant 0 : i32
    %c0_i32_1 = arith.constant 0 : i32
    return %c0_i32, %c0_i32_0 : i32, i32
  }
  func.func @transform_5(%arg0: i32) -> (i32, i32) {
    %c0_i32 = arith.constant 0 : i32
    %c0_i32_0 = arith.constant 0 : i32
    %c0_i32_1 = arith.constant 0 : i32
    return %c0_i32, %c0_i32_0 : i32, i32
  }
  func.func @transform_6(%arg0: i32) -> (i32, i32) {
    %c0_i32 = arith.constant 0 : i32
    %c0_i32_0 = arith.constant 0 : i32
    %c0_i32_1 = arith.constant 0 : i32
    return %c0_i32, %c0_i32_0 : i32, i32
  }
  func.func @transform_7(%arg0: i32) -> (i32, i32, i32) {
    %c0_i32 = arith.constant 0 : i32
    %c0_i32_0 = arith.constant 0 : i32
    %c0_i32_1 = arith.constant 0 : i32
    return %arg0, %c0_i32, %c0_i32_0 : i32, i32, i32
  }
  func.func @transform_8(%arg0: i32) -> (i32, i32, i32) {
    %c0_i32 = arith.constant 0 : i32
    %c0_i32_0 = arith.constant 0 : i32
    %c0_i32_1 = arith.constant 0 : i32
    return %arg0, %c0_i32, %c0_i32_0 : i32, i32, i32
  }
  func.func @transform_9(%arg0: i32) -> (i32, i32, i32) {
    %c0_i32 = arith.constant 0 : i32
    %c0_i32_0 = arith.constant 0 : i32
    %c0_i32_1 = arith.constant 0 : i32
    return %arg0, %c0_i32, %c0_i32_0 : i32, i32, i32
  }
  func.func @transform_10(%arg0: i32) -> (i32, i32, i32, i32) {
    %c0_i32 = arith.constant 0 : i32
    %c0_i32_0 = arith.constant 0 : i32
    %c0_i32_1 = arith.constant 0 : i32
    %c0_i32_2 = arith.constant 0 : i32
    return %arg0, %c0_i32, %c0_i32_0, %c0_i32_1 : i32, i32, i32, i32
  }
}

</mosaic_0001>

<bundles_post_ra>
// kernel: a_call__.1
= control target key start
LH: loop header
LB: loop body
LE: loop exit
PB: predicated region body
PF: predicated region fallthrough
CT: control target
= control target key end

     0   :  { %s7931_s0 = inlined_call_operand.vmem [shape: f32[2,16,16,4], index: 0, kind: input, shape index: {}]   ;;  %s7932_s1 = inlined_call_operand.vmem [shape: f32[36,16], index: 1, kind: input, shape index: {}]   ;;  %s7933_s2 = inlined_call_operand.vmem [shape: f32[1,16], index: 2, kind: input, shape index: {}]   ;;  %s7934_s3 = inlined_call_operand.vmem [shape: f32[144,64], index: 3, kind: input, shape index: {}]   ;;  %s7935_s4 = inlined_call_operand.vmem [shape: f32[1,64], index: 4, kind: input, shape index: {}]   ;;  %s7936_s5 = inlined_call_operand.vmem [shape: f32[64,16], index: 5, kind: input, shape index: {}]   ;;  %s7937_s6 = inlined_call_operand.vmem [shape: f32[1,16], index: 6, kind: input, shape index: {}]   ;;  %s7938_s7 = inlined_call_operand.hbm [shape: f32[2,1,10], index: 7, kind: output, shape index: {0}]   ;;  %s7939_s8 = inlined_call_operand.hbm [shape: f32[2,1,6], index: 8, kind: output, shape index: {1}]   ;;  %s7940_s9 = inlined_call_operand.hbm [shape: f32[2,1,64], index: 9, kind: output, shape index: {2}]   ;;  %s7941_s10 = inlined_call_operand.vmem [shape: f32[2,16,16,16], index: 10, kind: output, shape index: {3}]  }
   0x1   :  { %8116 = sst [smem:[#allocation56_spill]] %s7931_s0 }
   0x2   :  { %8117 = sst [smem:[#allocation57_spill]] %s7932_s1 }
   0x3   :  { %8118 = sst [smem:[#allocation58_spill]] %s7933_s2 }
   0x4   :  { %8119 = sst [smem:[#allocation59_spill]] %s7934_s3 }
   0x5   :  { %8120 = sst [smem:[#allocation60_spill]] %s7935_s4 }
   0x6   :  { %8121 = sst [smem:[#allocation61_spill]] %s7936_s5 }
   0x7   :  { %16 = vsyncpa [#allocation7], 0 }
   0x8   :  { %18 = vsyncpa [#allocation7 + $0x1], 0 }
   0x9   :  { %19 = vsyncpa [#allocation9], 0 }
   0xa   :  { %21 = vsyncpa [#allocation9 + $0x1], 0  ;;  %s4663_s13 = smov 0   ;;  %s4665_s14 = smov 0  }
   0xb   :  { %s4667_s15 = smov 0   ;;  %s4669_s16 = smov 0  }
   0xc LB: > { %s4684_s17 = sadd.s32 4294967295, %s4591_s16   ;;  %s8028_s18 = sadd.s32 4294967294, %s4591_s16   ;;  %s4591_s16 = sphi %s4669_s16, %s8332_s16   ;;  %s4587_s15 = sphi %s4667_s15, %s8331_s15   ;;  %s4583_s14 = sphi %s4665_s14, %s8330_s14   ;;  %s4579_s13 = sphi %s4663_s13, %s8329_s13  }
   0xd   : > { %s4688_s19 = sadd.s32 1, %s4591_s16   ;;  %s186_s20 = sadd.s32 1, %s4587_s15 }
   0xe   : > { %s183_s21 = ssub.s32 %s4591_s16, %s4688_s19  ;;  %p196_p0 = scmp.ne.s32.totalorder %s4587_s15, %s4583_s14 }
   0xf   : > { %p184_p1 = scmp.eq.s32.totalorder %s183_s21, 0  ;;  %p197_p2 = scmp.eq.s32.totalorder %s4684_s17, 1 }
  0x10   : > { %p202_p3 = scmp.ne.s32.totalorder %s4583_s14, %s4579_s13  ;;  %p203_p4 = scmp.eq.s32.totalorder %s8028_s18, 1 }
  0x11   : > { %s4701_s22 = scalar_select %p184_p1, %s4587_s15, %s186_s20  }
  0x12   : > { %p4703_p5 = por %p197_p2, %p196_p0  ;;  %p4707_p6 = por %p203_p4, %p202_p3 }
  0x13   : > { %p4299_p7 = scmp.ge.s32.totalorder %s4591_s16, 1  ;;  %p325_p8 = scmp.lt.s32.totalorder %s4591_s16, 3 }
  0x15   : > { %p326_p9 = pnand %p4299_p7, %p325_p8 }
  0x17   : > { %329 = sbr.rel (%p326_p9) target bundleno = 2151 (0x867), region = 48 }
  0x1c   : > { %vm385_vm0 = vcmask 31744   ;;  %v7942_v0 = vmov 0.0   ;;  %vm640_vm1 = vcmask 1046528   ;;  %s4594_s25 = smov 4   ;;  %p375_p10 = scmp.lt.s32.totalorder %s4684_s17, 1  ;;  %vm388_vm2 = vcmask 25600  }
  0x1d   : > { %386 = vst.msk [vmem:[#allocation2] sm:$0xff] %vm385_vm0, %v7942_v0  ;;  %s8124_s0 = sld [smem:[#allocation56_spill]]  ;;  %vm817_vm3 = vcmask 64544   ;;  %vm850_vm4 = vcmask 1045504   ;;  %s4595_s11 = smov 8   ;;  %vm1027_vm5 = vcmask 97344  }
  0x1e   : > { %387 = vst.msk [vmem:[#allocation2 + $0x8] sm:$0xff] %vm385_vm0, %v7942_v0  ;;  %s4779_s26 = scalar_select %p375_p10, %s4684_s17, 1  ;;  %vm1158_vm6 = vcmask 130144   ;;  %vm1293_vm7 = vcmask 162944   ;;  %vm1427_vm8 = vcmask 195744   ;;  %vm1558_vm9 = vcmask 228544  }
  0x1f   : > { %390 = vst.msk [vmem:[#allocation2 + $0x18] sm:$0xff] %vm385_vm0, %v7942_v0  ;;  %s4596_s12 = smov 12   ;;  %s4597_s20 = smov 16   ;;  %vm1998_vm10 = vcmask 1043456   ;;  %vm1693_vm11 = vcmask 261344   ;;  %vm1827_vm12 = vcmask 294144  }
  0x20   : > { %391 = vst.msk [vmem:[#allocation2 + $0x20] sm:$0xff] %vm385_vm0, %v7942_v0  ;;  %s4372_s27 = sshll.u32 %s4779_s26, 8  ;;  %s4598_s21 = smov 20   ;;  %vm1901_vm13 = vcmask 293888   ;;  %vm2147_vm14 = vcmask 130048   ;;  %vm2182_vm15 = vcmask 123904  }
  0x21   : > { %393 = vst.msk [vmem:[#allocation2 + $0x30] sm:$0xff] %vm385_vm0, %v7942_v0  ;;  %s4600_s28 = smov 28   ;;  %s8107_s29 = smov 32  }
  0x22   : > { %394 = vst.msk [vmem:[#allocation2 + $0x38] sm:$0xff] %vm385_vm0, %v7942_v0  ;;  %s8219_s1 = sld [smem:[#allocation57_spill]]  ;;  %s8113_s26 = smov 96  }
  0x23   : > { %396 = vst.msk [vmem:[#allocation2 + $0x48] sm:$0xff] %vm385_vm0, %v7942_v0  ;;  %s4801_s30 = scalar_lea.vmem %s8124_s0, %s4372_s27  ;;  %s8243_s2 = sld [smem:[#allocation58_spill]] }
  0x24   : > { %v4727_v1 = vld [vmem:[#allocation2] sm:$0xff]  ;;  %397 = vst.msk [vmem:[#allocation2 + $0x50] sm:$0xff] %vm385_vm0, %v7942_v0  ;;  %v442_v7 = vld [vmem:[%s4801_s30 + $0x8] sm:$0xff]  ;;  %v447_v21 = vld [vmem:[%s4801_s30 + $0x30] sm:$0xff]  ;;  %s8244_s3 = sld [smem:[#allocation59_spill]]  ;;  %s8287_s18 = smov 112  }
  0x25   : > { %v4731_v2 = vld [vmem:[#allocation2 + $0x8] sm:$0xff]  ;;  %v641_v3 = vrot.slane %v4727_v1, 1  ;;  %399 = vst.msk [vmem:[#allocation2 + $0x60] sm:$0xff] %vm385_vm0, %v7942_v0  ;;  %v441_v6 = vld [vmem:[%s4801_s30] sm:$0xff]  ;;  %v448_v22 = vld [vmem:[%s4801_s30 + $0x38] sm:$0xff]  ;;  %s8300_s4 = sld [smem:[#allocation60_spill]] }
  0x26   : > { %v642_v4 = vrot.slane %v4731_v2, 1  ;;  %400 = vst.msk [vmem:[#allocation2 + $0x68] sm:$0xff] %vm385_vm0, %v7942_v0  ;;  %v445_v19 = vld [vmem:[%s4801_s30 + $0x20] sm:$0xff]  ;;  %v446_v20 = vld [vmem:[%s4801_s30 + $0x28] sm:$0xff]  ;;  %v451_v25 = vld [vmem:[%s4801_s30 + $0x50] sm:$0xff]  ;;  %s8326_s5 = sld [smem:[#allocation61_spill]] }
  0x27   : > { %402 = vst.msk [vmem:[#allocation2 + $0x78] sm:$0xff] %vm385_vm0, %v7942_v0  ;;  %v449_v23 = vld [vmem:[%s4801_s30 + $0x40] sm:$0xff]  ;;  %v450_v24 = vld [vmem:[%s4801_s30 + $0x48] sm:$0xff]  ;;  %v452_v26 = vld [vmem:[%s4801_s30 + $0x58] sm:$0xff] }
  0x28   : > { %v643_v5 = vsel %vm640_vm1, %v641_v3, %v642_v4  ;;  %403 = vst.msk [vmem:[#allocation2 + $0x80] sm:$0xff] %vm385_vm0, %v7942_v0  ;;  %v443_v28 = vld [vmem:[%s4801_s30 + $0x10] sm:$0xff]  ;;  %v444_v40 = vld [vmem:[%s4801_s30 + $0x18] sm:$0xff]  ;;  %v453_v47 = vld [vmem:[%s4801_s30 + $0x60] sm:$0xff] }
  0x29   : > { %721 = vrot.lane.b32.xlu0 %v643_v5, %s4594_s25  ;;  %405 = vst.msk [vmem:[#allocation2 + $0x90] sm:$0xff] %vm385_vm0, %v7942_v0  ;;  %v454_v48 = vld [vmem:[%s4801_s30 + $0x68] sm:$0xff]  ;;  %v455_v52 = vld [vmem:[%s4801_s30 + $0x70] sm:$0xff]  ;;  %v456_v54 = vld [vmem:[%s4801_s30 + $0x78] sm:$0xff] }
  0x2a   : > { %406 = vst.msk [vmem:[#allocation2 + $0x98] sm:$0xff] %vm385_vm0, %v7942_v0  ;;  %v457_v55 = vld [vmem:[%s4801_s30 + $0x80] sm:$0xff]  ;;  %v458_v56 = vld [vmem:[%s4801_s30 + $0x88] sm:$0xff]  ;;  %v459_v62 = vld [vmem:[%s4801_s30 + $0x90] sm:$0xff] }
  0x2b   : > { %408 = vst.msk [vmem:[#allocation2 + $0xa8] sm:$0xff] %vm385_vm0, %v7942_v0 }
  0x2c   : > { %409 = vst.msk [vmem:[#allocation2 + $0xb0] sm:$0xff] %vm385_vm0, %v7942_v0 }
  0x2d   : > { %411 = vst.msk [vmem:[#allocation2 + $0xc0] sm:$0xff] %vm385_vm0, %v7942_v0 }
  0x2e   : > { %412 = vst.msk [vmem:[#allocation2 + $0xc8] sm:$0xff] %vm385_vm0, %v7942_v0 }
  0x2f   : > { %414 = vst.msk [vmem:[#allocation2 + $0xd8] sm:$0xff] %vm385_vm0, %v7942_v0 }
  0x30   : > { %415 = vst.msk [vmem:[#allocation2 + $0xe0] sm:$0xff] %vm385_vm0, %v7942_v0 }
  0x31   : > { %417 = vst.msk [vmem:[#allocation2 + $0xf0] sm:$0xff] %vm385_vm0, %v7942_v0 }
  0x32   : > { %418 = vst.msk [vmem:[#allocation2 + $0xf8] sm:$0xff] %vm385_vm0, %v7942_v0 }
  0x33   : > { %420 = vst.msk [vmem:[#allocation2 + $0x108] sm:$0xff] %vm385_vm0, %v7942_v0 }
  0x34   : > { %421 = vst.msk [vmem:[#allocation2 + $0x110] sm:$0xff] %vm385_vm0, %v7942_v0 }
  0x35   : > { %423 = vst.msk [vmem:[#allocation2 + $0x120] sm:$0xff] %vm385_vm0, %v7942_v0 }
  0x36   : > { %424 = vst.msk [vmem:[#allocation2 + $0x128] sm:$0xff] %vm385_vm0, %v7942_v0 }
  0x37   : > { %426 = vst.msk [vmem:[#allocation2 + $0x138] sm:$0xff] %vm385_vm0, %v7942_v0 }
  0x38   : > { %427 = vst.msk [vmem:[#allocation2 + $0x140] sm:$0xff] %vm385_vm0, %v7942_v0 }
  0x39   : > { %429 = vst.msk [vmem:[#allocation2 + $0x150] sm:$0xff] %vm385_vm0, %v7942_v0 }
  0x3a   : > { %430 = vst.msk [vmem:[#allocation2 + $0x158] sm:$0xff] %vm385_vm0, %v7942_v0 }
  0x3b   : > { %432 = vst.msk [vmem:[#allocation2 + $0x168] sm:$0xff] %vm385_vm0, %v7942_v0 }
  0x3c   : > { %433 = vst.msk [vmem:[#allocation2 + $0x170] sm:$0xff] %vm385_vm0, %v7942_v0 }
  0x3d   : > { %435 = vst.msk [vmem:[#allocation2 + $0x180] sm:$0xff] %vm385_vm0, %v7942_v0 }
  0x3e   : > { %436 = vst.msk [vmem:[#allocation2 + $0x188] sm:$0xff] %vm385_vm0, %v7942_v0 }
  0x3f   : > { %438 = vst.msk [vmem:[#allocation2 + $0x198] sm:$0xff] %vm385_vm0, %v7942_v0 }
  0x40   : > { %439 = vst.msk [vmem:[#allocation2 + $0x1a0] sm:$0xff] %vm385_vm0, %v7942_v0 }
  0x41   : > { %560 = vst.msk [vmem:[#allocation4] sm:$0xff] %vm385_vm0, %v4727_v1 }
  0x42   : > { %561 = vst.msk [vmem:[#allocation4 + $0x8] sm:$0xff] %vm385_vm0, %v4731_v2 }
  0x43   : > { %392 = vst.msk [vmem:[#allocation2 + $0x28] sm:$0x3] %vm388_vm2, %v7942_v0 }
  0x44   : > { %474 = vst.msk [vmem:[#allocation2 + $0x19] sm:$0xff] %vm385_vm0, %v441_v6 }
  0x45   : > { %475 = vst.msk [vmem:[#allocation2 + $0x21] sm:$0xff] %vm385_vm0, %v442_v7 }
  0x46   : > { %389 = vst.msk [vmem:[#allocation2 + $0x10] sm:$0x3] %vm388_vm2, %v7942_v0 }
  0x47   : > { %395 = vst.msk [vmem:[#allocation2 + $0x40] sm:$0x3] %vm388_vm2, %v7942_v0 }
  0x48   : > { %398 = vst.msk [vmem:[#allocation2 + $0x58] sm:$0x3] %vm388_vm2, %v7942_v0 }
  0x49   : > { %401 = vst.msk [vmem:[#allocation2 + $0x70] sm:$0x3] %vm388_vm2, %v7942_v0 }
  0x4a   : > { %404 = vst.msk [vmem:[#allocation2 + $0x88] sm:$0x3] %vm388_vm2, %v7942_v0 }
  0x4b   : > { %v4827_v8 = vld [vmem:[#allocation2 + $0x18] sm:$0xff]  ;;  %407 = vst.msk [vmem:[#allocation2 + $0xa0] sm:$0x3] %vm388_vm2, %v7942_v0 }
  0x4c   : > { %v4831_v9 = vld [vmem:[#allocation2 + $0x20] sm:$0xff]  ;;  %v646_v10 = vrot.slane %v4827_v8, 1  ;;  %410 = vst.msk [vmem:[#allocation2 + $0xb8] sm:$0x3] %vm388_vm2, %v7942_v0  ;;  %v4844_v14 = vld [vmem:[#allocation2 + $0x28] sm:$0x3] }
  0x4d   : > { %v647_v11 = vrot.slane %v4831_v9, 1  ;;  %413 = vst.msk [vmem:[#allocation2 + $0xd0] sm:$0x3] %vm388_vm2, %v7942_v0  ;;  %v4839_v12 = vld [vmem:[#allocation2 + $0x10] sm:$0x3]  ;;  %v649_v17 = vrot.slane %v4844_v14, 1 }
  0x4e   : > { %416 = vst.msk [vmem:[#allocation2 + $0xe8] sm:$0x3] %vm388_vm2, %v7942_v0  ;;  %v644_v13 = vrot.slane %v4839_v12, 1 }
  0x4f   : > { %v4847_v15 = vsel %vm640_vm1, %v646_v10, %v647_v11  ;;  %419 = vst.msk [vmem:[#allocation2 + $0x100] sm:$0x3] %vm388_vm2, %v7942_v0  ;;  %v4871_v18 = vsel %vm640_vm1, %v647_v11, %v649_v17 }
  0x50   : > { %725 = vrot.lane.b32.xlu1 %v4847_v15, %s4594_s25  ;;  %422 = vst.msk [vmem:[#allocation2 + $0x118] sm:$0x3] %vm388_vm2, %v7942_v0  ;;  %v645_v16 = vsel %vm640_vm1, %v642_v4, %v644_v13 }
  0x51   : > { %425 = vst.msk [vmem:[#allocation2 + $0x130] sm:$0x3] %vm388_vm2, %v7942_v0  ;;  %723 = vrot.lane.b32.xlu0 %v645_v16, %s4594_s25 }
  0x52   : > { %428 = vst.msk [vmem:[#allocation2 + $0x148] sm:$0x3] %vm388_vm2, %v7942_v0 }
  0x53   : > { %431 = vst.msk [vmem:[#allocation2 + $0x160] sm:$0x3] %vm388_vm2, %v7942_v0 }
  0x54   : > { %434 = vst.msk [vmem:[#allocation2 + $0x178] sm:$0x3] %vm388_vm2, %v7942_v0 }
  0x55   : > { %437 = vst.msk [vmem:[#allocation2 + $0x190] sm:$0x3] %vm388_vm2, %v7942_v0 }
  0x56   : > { %440 = vst.msk [vmem:[#allocation2 + $0x1a8] sm:$0x3] %vm388_vm2, %v7942_v0  ;;  %vm2787_vm2 = vcmask 392448  }
  0x57   : > { %562 = vst.msk [vmem:[#allocation4 + $0x10] sm:$0xff] %vm385_vm0, %v4827_v8 }
  0x58   : > { %563 = vst.msk [vmem:[#allocation4 + $0x18] sm:$0xff] %vm385_vm0, %v4831_v9  ;;  %727 = vrot.lane.b32.xlu1 %v4871_v18, %s4594_s25 }
  0x59   : > { %478 = vst.msk [vmem:[#allocation2 + $0x49] sm:$0xff] %vm385_vm0, %v445_v19  ;;  %v460_v19 = vld [vmem:[%s4801_s30 + $0x98] sm:$0xff] }
  0x5a   : > { %479 = vst.msk [vmem:[#allocation2 + $0x51] sm:$0xff] %vm385_vm0, %v446_v20 }
  0x5b   : > { %480 = vst.msk [vmem:[#allocation2 + $0x61] sm:$0xff] %vm385_vm0, %v447_v21 }
  0x5c   : > { %481 = vst.msk [vmem:[#allocation2 + $0x69] sm:$0xff] %vm385_vm0, %v448_v22 }
  0x5d   : > { %482 = vst.msk [vmem:[#allocation2 + $0x79] sm:$0xff] %vm385_vm0, %v449_v23 }
  0x5e   : > { %483 = vst.msk [vmem:[#allocation2 + $0x81] sm:$0xff] %vm385_vm0, %v450_v24 }
  0x5f   : > { %484 = vst.msk [vmem:[#allocation2 + $0x91] sm:$0xff] %vm385_vm0, %v451_v25 }
  0x60   : > { %v4896_v27 = vld [vmem:[#allocation2 + $0x48] sm:$0xff]  ;;  %485 = vst.msk [vmem:[#allocation2 + $0x99] sm:$0xff] %vm385_vm0, %v452_v26  ;;  %v461_v26 = vld [vmem:[%s4801_s30 + $0xa0] sm:$0xff] }
  0x61   : > { %v4900_v29 = vld [vmem:[#allocation2 + $0x50] sm:$0xff]  ;;  %v656_v30 = vrot.slane %v4896_v27, 1  ;;  %566 = vst.msk [vmem:[#allocation4 + $0x30] sm:$0xff] %vm385_vm0, %v4896_v27  ;;  %v4905_v31 = vld [vmem:[#allocation2 + $0x58] sm:$0x3] }
  0x62   : > { %v657_v32 = vrot.slane %v4900_v29, 1  ;;  %567 = vst.msk [vmem:[#allocation4 + $0x38] sm:$0xff] %vm385_vm0, %v4900_v29  ;;  %v659_v33 = vrot.slane %v4905_v31, 1  ;;  %v4992_v3 = vld [vmem:[#allocation2 + $0x60] sm:$0xff] }
  0x63   : > { %v4911_v34 = vld [vmem:[#allocation2 + $0x68] sm:$0xff]  ;;  %v4913_v35 = vld [vmem:[#allocation2 + $0x70] sm:$0x3]  ;;  %476 = vst.msk [vmem:[#allocation2 + $0x31] sm:$0xff] %vm385_vm0, %v443_v28 }
  0x64   : > { %v4917_v36 = vsel %vm640_vm1, %v656_v30, %v657_v32  ;;  %v4920_v37 = vsel %vm640_vm1, %v657_v32, %v659_v33  ;;  %569 = vst.msk [vmem:[#allocation4 + $0x48] sm:$0xff] %vm385_vm0, %v4911_v34  ;;  %v4924_v38 = vld [vmem:[#allocation2 + $0x78] sm:$0xff]  ;;  %v662_v41 = vrot.slane %v4911_v34, 1  ;;  %v664_v42 = vrot.slane %v4913_v35, 1  ;;  %v462_v28 = vld [vmem:[%s4801_s30 + $0xa8] sm:$0xff]  ;;  %v463_v32 = vld [vmem:[%s4801_s30 + $0xb0] sm:$0xff] }
  0x65   : > { %8125 = vst [vmem:[#allocation13_spill] sm:$0xff] %v4920_v37  ;;  %733 = vrot.lane.b32.xlu0 %v4917_v36, %s4594_s25  ;;  %735 = vrot.lane.b32.xlu1 %v4920_v37, %s4594_s25  ;;  %v4930_v39 = vld [vmem:[#allocation2 + $0x80] sm:$0xff]  ;;  %v666_v43 = vrot.slane %v4924_v38, 1 }
  0x66   : > { %570 = vst.msk [vmem:[#allocation4 + $0x50] sm:$0xff] %vm385_vm0, %v4924_v38  ;;  %v667_v44 = vrot.slane %v4930_v39, 1  ;;  %v4941_v45 = vld [vmem:[#allocation2 + $0x90] sm:$0xff]  ;;  %v4955_v49 = vsel %vm640_vm1, %v662_v41, %v664_v42  ;;  %v464_v42 = vld [vmem:[%s4801_s30 + $0xb8] sm:$0xff] }
  0x67   : > { %571 = vst.msk [vmem:[#allocation4 + $0x58] sm:$0xff] %vm385_vm0, %v4930_v39  ;;  %v4943_v46 = vld [vmem:[#allocation2 + $0x98] sm:$0xff]  ;;  %v4968_v53 = vld [vmem:[#allocation2 + $0xa0] sm:$0x3]  ;;  %v671_v57 = vrot.slane %v4941_v45, 1 }
  0x68   : > { %572 = vst.msk [vmem:[#allocation4 + $0x60] sm:$0xff] %vm385_vm0, %v4941_v45  ;;  %v4960_v50 = vsel %vm640_vm1, %v666_v43, %v667_v44  ;;  %v672_v58 = vrot.slane %v4943_v46, 1  ;;  %v674_v59 = vrot.slane %v4968_v53, 1 }
  0x69   : > { %573 = vst.msk [vmem:[#allocation4 + $0x68] sm:$0xff] %vm385_vm0, %v4943_v46 }
  0x6a   : > { %477 = vst.msk [vmem:[#allocation2 + $0x39] sm:$0xff] %vm385_vm0, %v444_v40  ;;  %v4962_v51 = vld [vmem:[#allocation2 + $0x30] sm:$0xff]  ;;  %v4995_v4 = vsel %vm640_vm1, %v671_v57, %v672_v58  ;;  %v4998_v5 = vsel %vm640_vm1, %v672_v58, %v674_v59 }
  0x6b   : > { %8126 = vst [vmem:[#allocation14_spill] sm:$0xff] %v4955_v49  ;;  %v651_v60 = vrot.slane %v4962_v51, 1 }
  0x6c   : > { %8127 = vst [vmem:[#allocation15_spill] sm:$0xff] %v4960_v50 }
  0x6d   : > { %486 = vst.msk [vmem:[#allocation2 + $0xa9] sm:$0xff] %vm385_vm0, %v453_v47  ;;  %739 = vrot.lane.b32.xlu0 %v4955_v49, %s4594_s25  ;;  %741 = vrot.lane.b32.xlu1 %v4960_v50, %s4594_s25  ;;  %v465_v47 = vld [vmem:[%s4801_s30 + $0xc0] sm:$0xff] }
  0x6e   : > { %564 = vst.msk [vmem:[#allocation4 + $0x20] sm:$0xff] %vm385_vm0, %v4962_v51 }
  0x6f   : > { %487 = vst.msk [vmem:[#allocation2 + $0xb1] sm:$0xff] %vm385_vm0, %v454_v48  ;;  %v661_v48 = vrot.slane %v4992_v3, 1 }
  0x70   : > { %488 = vst.msk [vmem:[#allocation2 + $0xc1] sm:$0xff] %vm385_vm0, %v455_v52 }
  0x71   : > { %489 = vst.msk [vmem:[#allocation2 + $0xc9] sm:$0xff] %vm385_vm0, %v456_v54  ;;  %v4985_v61 = vld [vmem:[#allocation2 + $0x38] sm:$0xff]  ;;  %v5000_v6 = vld [vmem:[#allocation2 + $0x40] sm:$0x3]  ;;  %v466_v54 = vld [vmem:[%s4801_s30 + $0xc8] sm:$0xff]  ;;  %v5089_v59 = vsel %vm640_vm1, %v661_v48, %v662_v41 }
  0x72   : > { %490 = vst.msk [vmem:[#allocation2 + $0xd9] sm:$0xff] %vm385_vm0, %v457_v55  ;;  %v652_v63 = vrot.slane %v4985_v61, 1  ;;  %v654_v16 = vrot.slane %v5000_v6, 1 }
  0x73   : > { %491 = vst.msk [vmem:[#allocation2 + $0xe1] sm:$0xff] %vm385_vm0, %v458_v56 }
  0x74   : > { %565 = vst.msk [vmem:[#allocation4 + $0x28] sm:$0xff] %vm385_vm0, %v4985_v61  ;;  %v5005_v7 = vsel %vm640_vm1, %v651_v60, %v652_v63  ;;  %v5045_v30 = vsel %vm640_vm1, %v652_v63, %v654_v16  ;;  %v5074_v52 = vld [vmem:[#allocation2 + $0xa8] sm:$0xff] }
  0x75   : > { %8128 = vst [vmem:[#allocation16_spill] sm:$0xff] %v4995_v4  ;;  %729 = vrot.lane.b32.xlu2 %v5005_v7, %s4594_s25  ;;  %745 = vrot.lane.b32.xlu0 %v4995_v4, %s4594_s25  ;;  %v5101_v16 = vld [vmem:[#allocation2 + $0x88] sm:$0x3] }
  0x76   : > { %8129 = vst [vmem:[#allocation17_spill] sm:$0xff] %v4998_v5  ;;  %v5007_v10 = vld [vmem:[#allocation2 + $0xb0] sm:$0xff]  ;;  %v5009_v11 = vld [vmem:[#allocation2 + $0xb8] sm:$0x3]  ;;  %747 = vrot.lane.b32.xlu1 %v4998_v5, %s4594_s25 }
  0x77   : > { %568 = vst.msk [vmem:[#allocation4 + $0x40] sm:$0xff] %vm385_vm0, %v4992_v3  ;;  %v5016_v13 = vld [vmem:[#allocation2 + $0xc0] sm:$0xff]  ;;  %v7945_v20 = vrot.slane %v5007_v10, 1  ;;  %v679_v21 = vrot.slane %v5009_v11, 1 }
  0x78   : > { %8130 = vst [vmem:[#allocation18_spill] sm:$0xff] %v5005_v7  ;;  %v5023_v17 = vld [vmem:[#allocation2 + $0xc8] sm:$0xff]  ;;  %v681_v22 = vrot.slane %v5016_v13, 1  ;;  %v5196_v50 = vld [vmem:[#allocation2 + $0xd0] sm:$0x3] }
  0x79   : > { %492 = vst.msk [vmem:[#allocation2 + $0xf1] sm:$0xff] %vm385_vm0, %v459_v62  ;;  %v7944_v23 = vrot.slane %v5023_v17, 1  ;;  %v5034_v24 = vld [vmem:[#allocation2 + $0xd8] sm:$0xff]  ;;  %v5052_v33 = vsel %vm640_vm1, %v7945_v20, %v679_v21 }
  0x7a   : > { %575 = vst.msk [vmem:[#allocation4 + $0x78] sm:$0xff] %vm385_vm0, %v5007_v10  ;;  %v5036_v25 = vld [vmem:[#allocation2 + $0xe0] sm:$0xff]  ;;  %v5061_v43 = vld [vmem:[#allocation2 + $0xe8] sm:$0x3]  ;;  %v686_v55 = vrot.slane %v5034_v24, 1 }
  0x7b   : > { %576 = vst.msk [vmem:[#allocation4 + $0x80] sm:$0xff] %vm385_vm0, %v5016_v13  ;;  %v5057_v40 = vsel %vm640_vm1, %v681_v22, %v7944_v23  ;;  %v687_v56 = vrot.slane %v5036_v25, 1  ;;  %v689_v57 = vrot.slane %v5061_v43, 1  ;;  %v467_v22 = vld [vmem:[%s4801_s30 + $0xd0] sm:$0xff] }
  0x7c   : > { %577 = vst.msk [vmem:[#allocation4 + $0x88] sm:$0xff] %vm385_vm0, %v5023_v17 }
  0x7d   : > { %578 = vst.msk [vmem:[#allocation4 + $0x90] sm:$0xff] %vm385_vm0, %v5034_v24  ;;  %731 = vrot.lane.b32.xlu2 %v5045_v30, %s4594_s25  ;;  %751 = vrot.lane.b32.xlu0 %v5052_v33, %s4594_s25  ;;  %v5096_v62 = vsel %vm640_vm1, %v686_v55, %v687_v56  ;;  %v5099_v63 = vsel %vm640_vm1, %v687_v56, %v689_v57  ;;  %v469_v55 = vld [vmem:[%s4801_s30 + $0xe0] sm:$0xff]  ;;  %v470_v57 = vld [vmem:[%s4801_s30 + $0xe8] sm:$0xff] }
  0x7e   : > { %579 = vst.msk [vmem:[#allocation4 + $0x98] sm:$0xff] %vm385_vm0, %v5036_v25  ;;  %753 = vrot.lane.b32.xlu1 %v5057_v40, %s4594_s25 }
  0x7f   : > { %493 = vst.msk [vmem:[#allocation2 + $0xf9] sm:$0xff] %vm385_vm0, %v460_v19 }
  0x80   : > { %8131 = vst [vmem:[#allocation19_spill] sm:$0xff] %v5052_v33 }
  0x81   : > { %8132 = vst [vmem:[#allocation20_spill] sm:$0xff] %v5057_v40 }
  0x82   : > { %494 = vst.msk [vmem:[#allocation2 + $0x109] sm:$0xff] %vm385_vm0, %v461_v26 }
  0x83   : > { %495 = vst.msk [vmem:[#allocation2 + $0x111] sm:$0xff] %vm385_vm0, %v462_v28  ;;  %v468_v28 = vld [vmem:[%s4801_s30 + $0xd8] sm:$0xff] }
  0x84   : > { %496 = vst.msk [vmem:[#allocation2 + $0x121] sm:$0xff] %vm385_vm0, %v463_v32  ;;  %v669_v32 = vrot.slane %v5101_v16, 1 }
  0x85   : > { %497 = vst.msk [vmem:[#allocation2 + $0x129] sm:$0xff] %vm385_vm0, %v464_v42  ;;  %737 = vrot.lane.b32.xlu2 %v5089_v59, %s4594_s25  ;;  %757 = vrot.lane.b32.xlu0 %v5096_v62, %s4594_s25 }
  0x86   : > { %574 = vst.msk [vmem:[#allocation4 + $0x70] sm:$0xff] %vm385_vm0, %v5074_v52  ;;  %v5083_v58 = vld [vmem:[#allocation2 + $0xf8] sm:$0xff]  ;;  %v5107_v41 = vld [vmem:[#allocation2 + $0x100] sm:$0x3]  ;;  %759 = vrot.lane.b32.xlu1 %v5099_v63, %s4594_s25  ;;  %v5143_v0 = vsel %vm640_vm1, %v667_v44, %v669_v32  ;;  %v676_v44 = vrot.slane %v5074_v52, 1 }
  0x87   : > { %498 = vst.msk [vmem:[#allocation2 + $0x139] sm:$0xff] %vm385_vm0, %v465_v47  ;;  %v692_v42 = vrot.slane %v5083_v58, 1  ;;  %v694_v47 = vrot.slane %v5107_v41, 1 }
  0x88   : > { %499 = vst.msk [vmem:[#allocation2 + $0x141] sm:$0xff] %vm385_vm0, %v466_v54 }
  0x89   : > { %8133 = vst [vmem:[#allocation21_spill] sm:$0xff] %v5089_v59  ;;  %v5093_v60 = vld [vmem:[#allocation2 + $0x108] sm:$0xff]  ;;  %v5147_v23 = vsel %vm640_vm1, %v692_v42, %v694_v47 }
  0x8a   : > { %581 = vst.msk [vmem:[#allocation4 + $0xa8] sm:$0xff] %vm385_vm0, %v5083_v58  ;;  %v5103_v19 = vld [vmem:[#allocation2 + $0x110] sm:$0xff]  ;;  %v696_v48 = vrot.slane %v5093_v60, 1 }
  0x8b   : > { %8134 = vst [vmem:[#allocation22_spill] sm:$0xff] %v5096_v62  ;;  %v5111_v21 = vld [vmem:[#allocation2 + $0x120] sm:$0xff]  ;;  %v7946_v54 = vrot.slane %v5103_v19, 1 }
  0x8c   : > { %8135 = vst [vmem:[#allocation23_spill] sm:$0xff] %v5099_v63  ;;  %v5116_v26 = vld [vmem:[#allocation2 + $0x128] sm:$0xff]  ;;  %v5157_v20 = vld [vmem:[#allocation2 + $0x130] sm:$0x3]  ;;  %v701_v47 = vrot.slane %v5111_v21, 1 }
  0x8d   : > { %582 = vst.msk [vmem:[#allocation4 + $0xb0] sm:$0xff] %vm385_vm0, %v5093_v60  ;;  %743 = vrot.lane.b32.xlu2 %v5143_v0, %s4594_s25  ;;  %763 = vrot.lane.b32.xlu0 %v5147_v23, %s4594_s25 }
  0x8e   : > { %583 = vst.msk [vmem:[#allocation4 + $0xb8] sm:$0xff] %vm385_vm0, %v5103_v19 }
  0x8f   : > { %584 = vst.msk [vmem:[#allocation4 + $0xc0] sm:$0xff] %vm385_vm0, %v5111_v21  ;;  %v5134_v56 = vld [vmem:[#allocation2 + $0x140] sm:$0xff]  ;;  %v5200_v62 = vld [vmem:[#allocation2 + $0x148] sm:$0x3] }
  0x90   : > { %585 = vst.msk [vmem:[#allocation4 + $0xc8] sm:$0xff] %vm385_vm0, %v5116_v26 }
  0x91   : > { %500 = vst.msk [vmem:[#allocation2 + $0x151] sm:$0xff] %vm385_vm0, %v467_v22  ;;  %v5152_v22 = vsel %vm640_vm1, %v696_v48, %v7946_v54  ;;  %v702_v48 = vrot.slane %v5116_v26, 1 }
  0x92   : > { %501 = vst.msk [vmem:[#allocation2 + $0x159] sm:$0xff] %vm385_vm0, %v468_v28  ;;  %v5155_v28 = vld [vmem:[#allocation2 + $0xf0] sm:$0xff]  ;;  %765 = vrot.lane.b32.xlu1 %v5152_v22, %s4594_s25 }
  0x93   : > { %587 = vst.msk [vmem:[#allocation4 + $0xd8] sm:$0xff] %vm385_vm0, %v5134_v56  ;;  %v5191_v5 = vsel %vm640_vm1, %v701_v47, %v702_v48  ;;  %v707_v47 = vrot.slane %v5134_v56, 1 }
  0x94   : > { %8136 = vst [vmem:[#allocation24_spill] sm:$0xff] %v5143_v0 }
  0x95   : > { %502 = vst.msk [vmem:[#allocation2 + $0x169] sm:$0xff] %vm385_vm0, %v469_v55  ;;  %v704_v55 = vrot.slane %v5157_v20, 1  ;;  %769 = vrot.lane.b32.xlu0 %v5191_v5, %s4594_s25 }
  0x96   : > { %8137 = vst [vmem:[#allocation25_spill] sm:$0xff] %v5147_v23 }
  0x97   : > { %8138 = vst [vmem:[#allocation26_spill] sm:$0xff] %v5152_v22  ;;  %v8139_v22 = vrot.slane %v5007_v10, 1  ;;  %v5194_v23 = vsel %vm640_vm1, %v702_v48, %v704_v55  ;;  %v709_v48 = vrot.slane %v5200_v62, 1 }
  0x98   : > { %503 = vst.msk [vmem:[#allocation2 + $0x171] sm:$0xff] %vm385_vm0, %v470_v57  ;;  %v5168_v32 = vld [vmem:[#allocation2 + $0x150] sm:$0xff] }
  0x99   : > { %580 = vst.msk [vmem:[#allocation4 + $0xa0] sm:$0xff] %vm385_vm0, %v5155_v28  ;;  %v5173_v57 = vld [vmem:[#allocation2 + $0x158] sm:$0xff]  ;;  %v5184_v63 = vsel %vm640_vm1, %v676_v44, %v8139_v22  ;;  %v684_v22 = vrot.slane %v5196_v50, 1  ;;  %v711_v55 = vrot.slane %v5168_v32, 1 }
  0x9a   : > { %588 = vst.msk [vmem:[#allocation4 + $0xe0] sm:$0xff] %vm385_vm0, %v5168_v32  ;;  %749 = vrot.lane.b32.xlu2 %v5184_v63, %s4594_s25  ;;  %771 = vrot.lane.b32.xlu1 %v5194_v23, %s4594_s25  ;;  %v5209_v44 = vld [vmem:[#allocation2 + $0x138] sm:$0xff]  ;;  %v712_v37 = vrot.slane %v5173_v57, 1 }
  0x9b   : > { %589 = vst.msk [vmem:[#allocation4 + $0xe8] sm:$0xff] %vm385_vm0, %v5173_v57 }
  0x9c   : > { %v5179_v54 = vld [vmem:[#allocation2 + $0x168] sm:$0xff]  ;;  %8140 = vst [vmem:[#allocation27_spill] sm:$0xff] %v5184_v63  ;;  %v5226_v63 = vsel %vm640_vm1, %v711_v55, %v712_v37 }
  0x9d   : > { %590 = vst.msk [vmem:[#allocation4 + $0xf0] sm:$0xff] %vm385_vm0, %v5179_v54 }
  0x9e   : > { %8141 = vst [vmem:[#allocation28_spill] sm:$0xff] %v5191_v5  ;;  %v8143_v5 = vrot.slane %v5023_v17, 1 }
  0x9f   : > { %v5186_v40 = vld [vmem:[#allocation2 + $0x170] sm:$0xff]  ;;  %8142 = vst [vmem:[#allocation29_spill] sm:$0xff] %v5194_v23  ;;  %v5223_v23 = vsel %vm640_vm1, %v707_v47, %v709_v48  ;;  %v5228_v7 = vld [vmem:[#allocation2 + $0x178] sm:$0x3] }
  0xa0   : > { %591 = vst.msk [vmem:[#allocation4 + $0xf8] sm:$0xff] %vm385_vm0, %v5186_v40  ;;  %v5220_v33 = vsel %vm640_vm1, %v8143_v5, %v684_v22  ;;  %775 = vrot.lane.b32.xlu0 %v5223_v23, %s4594_s25  ;;  %v691_v5 = vrot.slane %v5155_v28, 1  ;;  %v716_v22 = vrot.slane %v5179_v54, 1  ;;  %v717_v48 = vrot.slane %v5186_v40, 1 }
  0xa1   : > { %586 = vst.msk [vmem:[#allocation4 + $0xd0] sm:$0xff] %vm385_vm0, %v5209_v44  ;;  %v719_v55 = vrot.slane %v5228_v7, 1 }
  0xa2   : > { %8144 = vst [vmem:[#allocation30_spill] sm:$0xff] %v5220_v33  ;;  %755 = vrot.lane.b32.xlu2 %v5220_v33, %s4594_s25  ;;  %777 = vrot.lane.b32.xlu1 %v5226_v63, %s4594_s25  ;;  %v5241_v4 = vsel %vm640_vm1, %v691_v5, %v692_v42  ;;  %v5244_v0 = vsel %vm640_vm1, %v716_v22, %v717_v48  ;;  %v722_v5 = vpop.permute.xlu0 %721  ;;  %v852_v22 = vrot.slane %v4731_v2, 2  ;;  %v706_v2 = vrot.slane %v5209_v44, 1 }
  0xa3   : > { %8145 = vst [vmem:[#allocation31_spill] sm:$0xff] %v5223_v23  ;;  %v5247_v33 = vsel %vm640_vm1, %v717_v48, %v719_v55  ;;  %v5249_v23 = vld [vmem:[#allocation2 + $0x118] sm:$0x3]  ;;  %v854_v48 = vrot.slane %v4839_v12, 2  ;;  %v856_v55 = vrot.slane %v4827_v8, 2  ;;  %v861_v12 = vrot.slane %v4962_v51, 2 }
  0xa4   : > { %8146 = vst [vmem:[#allocation32_spill] sm:$0xff] %v5226_v63  ;;  %v699_v42 = vrot.slane %v5249_v23, 1  ;;  %v857_v63 = vrot.slane %v4831_v9, 2 }
  0xa5   : > { %8147 = vst [vmem:[#allocation33_spill] sm:$0xff] %v5241_v4 }
  0xa6   : > { %8148 = vst [vmem:[#allocation34_spill] sm:$0xff] %v5244_v0  ;;  %v5270_v49 = vsel %vm850_vm4, %v856_v55, %v857_v63 }
  0xa7   : > { %8149 = vst [vmem:[#allocation35_spill] sm:$0xff] %v5247_v33 }
  0xa8   : > { %781 = vrot.lane.b32.xlu0 %v5244_v0, %s4594_s25  ;;  %818 = vst.msk [vmem:[#allocation4] sm:$0xff] %vm817_vm3, %v722_v5  ;;  %v8150_v0 = vrot.slane %v5103_v19, 1  ;;  %v5282_v5 = vsel %vm640_vm1, %v706_v2, %v707_v47  ;;  %v867_v47 = vrot.slane %v4900_v29, 2  ;;  %v869_v2 = vrot.slane %v4905_v31, 2 }
  0xa9   : > { %8152 = vst [vmem:[#allocation37_spill] sm:$0xff] %v5270_v49  ;;  %v851_v31 = vrot.slane %v4727_v1, 2  ;;  %v859_v1 = vrot.slane %v4844_v14, 2 }
  0xaa   : > { %761 = vrot.lane.b32.xlu2 %v5241_v4, %s4594_s25  ;;  %783 = vrot.lane.b32.xlu1 %v5247_v33, %s4594_s25  ;;  %v5266_v4 = vsel %vm640_vm1, %v8150_v0, %v699_v42  ;;  %v855_v33 = vsel %vm850_vm4, %v852_v22, %v854_v48  ;;  %v862_v0 = vrot.slane %v4985_v61, 2  ;;  %v864_v42 = vrot.slane %v5000_v6, 2  ;;  %8153 = vst [vmem:[#allocation38_spill] sm:$0xff] %v5282_v5 }
  0xab   : > { %8151 = vst [vmem:[#allocation36_spill] sm:$0xff] %v5266_v4 }
  0xac   : > { %v5285_v48 = vsel %vm850_vm4, %v861_v12, %v862_v0  ;;  %v5288_v55 = vsel %vm850_vm4, %v862_v0, %v864_v42  ;;  %v871_v12 = vrot.slane %v4992_v3, 2  ;;  %v872_v0 = vrot.slane %v4911_v34, 2 }
  0xad   : > { %8154 = vst [vmem:[#allocation39_spill] sm:$0xff] %v5285_v48 }
  0xae   : > { %8155 = vst [vmem:[#allocation40_spill] sm:$0xff] %v5288_v55 }
  0xb0   : > { %933 = vrot.lane.b32.xlu0 %v855_v33, %s4595_s11  ;;  %v5290_v33 = vld [vmem:[#allocation2 + $0x160] sm:$0x3] }
  0xb1   : > { %v714_v6 = vrot.slane %v5290_v33, 1 }
  0xb2   : > { %767 = vrot.lane.b32.xlu2 %v5266_v4, %s4594_s25  ;;  %935 = vrot.lane.b32.xlu1 %v5270_v49, %s4595_s11  ;;  %v5307_v49 = vsel %vm850_vm4, %v867_v47, %v869_v2  ;;  %v879_v2 = vrot.slane %v5101_v16, 2  ;;  %v882_v16 = vrot.slane %v4943_v46, 2 }
  0xb3   : > { %v5304_v42 = vsel %vm640_vm1, %v712_v37, %v714_v6  ;;  %8157 = vst [vmem:[#allocation42_spill] sm:$0xff] %v5307_v49  ;;  %v876_v37 = vrot.slane %v4924_v38, 2  ;;  %v877_v6 = vrot.slane %v4930_v39, 2 }
  0xb4   : > { %8156 = vst [vmem:[#allocation41_spill] sm:$0xff] %v5304_v42 }
  0xb8   : > { %939 = vrot.lane.b32.xlu0 %v5285_v48, %s4595_s11  ;;  %v5310_v48 = vsel %vm850_vm4, %v871_v12, %v872_v0  ;;  %v853_v12 = vsel %vm850_vm4, %v851_v31, %v852_v22  ;;  %v884_v22 = vrot.slane %v4968_v53, 2  ;;  %v886_v31 = vrot.slane %v5074_v52, 2 }
  0xb9   : > { %8158 = vst [vmem:[#allocation43_spill] sm:$0xff] %v5310_v48  ;;  %v866_v53 = vrot.slane %v4896_v27, 2 }
  0xba   : > { %773 = vrot.lane.b32.xlu2 %v5282_v5, %s4594_s25  ;;  %941 = vrot.lane.b32.xlu1 %v5288_v55, %s4595_s11  ;;  %v5324_v55 = vsel %vm850_vm4, %v876_v37, %v877_v6  ;;  %v5342_v37 = vsel %vm850_vm4, %v857_v63, %v859_v1  ;;  %v894_v1 = vrot.slane %v5196_v50, 2  ;;  %v874_v50 = vrot.slane %v4913_v35, 2 }
  0xc0   : > { %945 = vrot.lane.b32.xlu0 %v5307_v49, %s4595_s11 }
  0xc2   : > { %779 = vrot.lane.b32.xlu2 %v5304_v42, %s4594_s25  ;;  %947 = vrot.lane.b32.xlu1 %v5310_v48, %s4595_s11  ;;  %v5327_v42 = vsel %vm850_vm4, %v877_v6, %v879_v2  ;;  %v726_v49 = vpop.permute.xlu1 %725  ;;  %v891_v2 = vrot.slane %v5016_v13, 2  ;;  %s4599_s25 = smov 24  }
  0xc3   : > { %820 = vst.msk [vmem:[#allocation4 + $0x10] sm:$0xff] %vm817_vm3, %v726_v49  ;;  %v724_v48 = vpop.permute.xlu0 %723  ;;  %v8002_v49 = vrot.slane %v5007_v10, 2 }
  0xc4   : > { %819 = vst.msk [vmem:[#allocation4 + $0x8] sm:$0xff] %vm817_vm3, %v724_v48  ;;  %v5345_v48 = vsel %vm850_vm4, %v882_v16, %v884_v22  ;;  %v5365_v22 = vsel %vm850_vm4, %v866_v53, %v867_v47  ;;  %v897_v47 = vrot.slane %v5036_v25, 2  ;;  %v899_v53 = vrot.slane %v5061_v43, 2 }
  0xc5   : > { %v5350_v6 = vsel %vm850_vm4, %v886_v31, %v8002_v49 }
  0xc6   : > { %8159 = vst [vmem:[#allocation44_spill] sm:$0xff] %v5350_v6  ;;  %v5391_v35 = vsel %vm850_vm4, %v897_v47, %v899_v53  ;;  %v909_v53 = vrot.slane %v5249_v23, 2  ;;  %v889_v23 = vrot.slane %v5009_v11, 2 }
  0xc7   : > { %8161 = vst [vmem:[#allocation46_spill] sm:$0xff] %v5391_v35 }
  0xc8   : > { %951 = vrot.lane.b32.xlu0 %v5324_v55, %s4595_s11 }
  0xca   : > { %931 = vrot.lane.b32.xlu2 %v853_v12, %s4595_s11  ;;  %953 = vrot.lane.b32.xlu1 %v5327_v42, %s4595_s11  ;;  %v728_v14 = vpop.permute.xlu1 %727  ;;  %v892_v12 = vrot.slane %v5023_v17, 2 }
  0xcb   : > { %821 = vst.msk [vmem:[#allocation4 + $0x18] sm:$0xff] %vm817_vm3, %v728_v14 }
  0xcc   : > { %v5368_v31 = vsel %vm850_vm4, %v891_v2, %v892_v12  ;;  %v5371_v14 = vsel %vm850_vm4, %v892_v12, %v894_v1  ;;  %v901_v2 = vrot.slane %v5155_v28, 2  ;;  %v8005_v12 = vrot.slane %v5083_v58, 2 }
  0xcd   : > { %8160 = vst [vmem:[#allocation45_spill] sm:$0xff] %v5371_v14 }
  0xce   : > { %v5396_v43 = vsel %vm850_vm4, %v901_v2, %v8005_v12 }
  0xcf   : > { %v730_v63 = vpop.permute.xlu2 %729  ;;  %8162 = vst [vmem:[#allocation47_spill] sm:$0xff] %v5396_v43 }
  0xd0   : > { %957 = vrot.lane.b32.xlu0 %v5345_v48, %s4595_s11  ;;  %822 = vst.msk [vmem:[#allocation4 + $0x20] sm:$0xff] %vm817_vm3, %v730_v63 }
  0xd2   : > { %937 = vrot.lane.b32.xlu2 %v5342_v37, %s4595_s11  ;;  %959 = vrot.lane.b32.xlu1 %v5350_v6, %s4595_s11 }
  0xd7   : > { %v732_v63 = vpop.permute.xlu2 %731  ;;  %v734_v1 = vpop.permute.xlu0 %733 }
  0xd8   : > { %963 = vrot.lane.b32.xlu0 %v5368_v31, %s4595_s11  ;;  %823 = vst.msk [vmem:[#allocation4 + $0x28] sm:$0xff] %vm817_vm3, %v732_v63  ;;  %v736_v49 = vpop.permute.xlu1 %735  ;;  %v907_v63 = vrot.slane %v5103_v19, 2 }
  0xd9   : > { %824 = vst.msk [vmem:[#allocation4 + $0x30] sm:$0xff] %vm817_vm3, %v734_v1 }
  0xda   : > { %943 = vrot.lane.b32.xlu2 %v5365_v22, %s4595_s11  ;;  %965 = vrot.lane.b32.xlu1 %v5371_v14, %s4595_s11  ;;  %825 = vst.msk [vmem:[#allocation4 + $0x38] sm:$0xff] %vm817_vm3, %v736_v49  ;;  %v5388_v14 = vsel %vm850_vm4, %v872_v0, %v874_v50  ;;  %v881_v0 = vrot.slane %v4941_v45, 2  ;;  %v906_v50 = vrot.slane %v5093_v60, 2  ;;  %v5418_v6 = vsel %vm850_vm4, %v907_v63, %v909_v53 }
  0xdb   : > { %8164 = vst [vmem:[#allocation49_spill] sm:$0xff] %v5418_v6 }
  0xdc   : > { %v5412_v12 = vsel %vm850_vm4, %v881_v0, %v882_v16  ;;  %v912_v16 = vrot.slane %v5116_v26, 2  ;;  %v914_v0 = vrot.slane %v5157_v20, 2 }
  0xdf   : > { %v738_v49 = vpop.permute.xlu2 %737  ;;  %v740_v2 = vpop.permute.xlu0 %739 }
  0xe0   : > { %969 = vrot.lane.b32.xlu0 %v5391_v35, %s4595_s11  ;;  %826 = vst.msk [vmem:[#allocation4 + $0x40] sm:$0xff] %vm817_vm3, %v738_v49  ;;  %v742_v1 = vpop.permute.xlu1 %741 }
  0xe1   : > { %827 = vst.msk [vmem:[#allocation4 + $0x48] sm:$0xff] %vm817_vm3, %v740_v2 }
  0xe2   : > { %949 = vrot.lane.b32.xlu2 %v5388_v14, %s4595_s11  ;;  %971 = vrot.lane.b32.xlu1 %v5396_v43, %s4595_s11  ;;  %828 = vst.msk [vmem:[#allocation4 + $0x50] sm:$0xff] %vm817_vm3, %v742_v1  ;;  %v5415_v43 = vsel %vm850_vm4, %v906_v50, %v907_v63  ;;  %v916_v50 = vrot.slane %v5209_v44, 2  ;;  %v917_v63 = vrot.slane %v5134_v56, 2  ;;  %v8165_v1 = vrot.slane %v5007_v10, 2 }
  0xe3   : > { %8163 = vst [vmem:[#allocation48_spill] sm:$0xff] %v5415_v43 }
  0xe4   : > { %v5437_v11 = vsel %vm850_vm4, %v8165_v1, %v889_v23  ;;  %v5443_v20 = vsel %vm850_vm4, %v916_v50, %v917_v63  ;;  %v921_v23 = vrot.slane %v5168_v32, 2 }
  0xe5   : > { %8167 = vst [vmem:[#allocation51_spill] sm:$0xff] %v5443_v20 }
  0xe7   : > { %v744_v49 = vpop.permute.xlu2 %743  ;;  %v746_v53 = vpop.permute.xlu0 %745 }
  0xe8   : > { %975 = vrot.lane.b32.xlu0 %v5415_v43, %s4595_s11  ;;  %829 = vst.msk [vmem:[#allocation4 + $0x58] sm:$0xff] %vm817_vm3, %v744_v49  ;;  %v748_v2 = vpop.permute.xlu1 %747  ;;  %v896_v49 = vrot.slane %v5034_v24, 2 }
  0xe9   : > { %830 = vst.msk [vmem:[#allocation4 + $0x60] sm:$0xff] %vm817_vm3, %v746_v53 }
  0xea   : > { %955 = vrot.lane.b32.xlu2 %v5412_v12, %s4595_s11  ;;  %977 = vrot.lane.b32.xlu1 %v5418_v6, %s4595_s11  ;;  %831 = vst.msk [vmem:[#allocation4 + $0x68] sm:$0xff] %vm817_vm3, %v748_v2  ;;  %v5440_v6 = vsel %vm850_vm4, %v912_v16, %v914_v0  ;;  %v922_v0 = vrot.slane %v5173_v57, 2  ;;  %v924_v2 = vrot.slane %v5290_v33, 2  ;;  %v904_v33 = vrot.slane %v5107_v41, 2 }
  0xeb   : > { %8166 = vst [vmem:[#allocation50_spill] sm:$0xff] %v5440_v6 }
  0xec   : > { %v5465_v43 = vsel %vm850_vm4, %v922_v0, %v924_v2  ;;  %v8170_v2 = vrot.slane %v5083_v58, 2 }
  0xef   : > { %v752_v50 = vpop.permute.xlu0 %751 }
  0xf0   : > { %981 = vrot.lane.b32.xlu0 %v5440_v6, %s4595_s11  ;;  %v754_v1 = vpop.permute.xlu1 %753  ;;  %833 = vst.msk [vmem:[#allocation4 + $0x78] sm:$0xff] %vm817_vm3, %v752_v50  ;;  %v5459_v6 = vsel %vm850_vm4, %v896_v49, %v897_v47  ;;  %v927_v47 = vrot.slane %v5186_v40, 2  ;;  %v929_v49 = vrot.slane %v5228_v7, 2  ;;  %v5482_v50 = vsel %vm850_vm4, %v8170_v2, %v904_v33 }
  0xf1   : > { %834 = vst.msk [vmem:[#allocation4 + $0x80] sm:$0xff] %vm817_vm3, %v754_v1  ;;  %v911_v7 = vrot.slane %v5111_v21, 2 }
  0xf2   : > { %961 = vrot.lane.b32.xlu2 %v5437_v11, %s4595_s11  ;;  %983 = vrot.lane.b32.xlu1 %v5443_v20, %s4595_s11  ;;  %8168 = vst [vmem:[#allocation52_spill] sm:$0xff] %v5459_v6  ;;  %v5462_v20 = vsel %vm850_vm4, %v921_v23, %v922_v0  ;;  %v5485_v41 = vsel %vm850_vm4, %v927_v47, %v929_v49 }
  0xf3   : > { %8169 = vst [vmem:[#allocation53_spill] sm:$0xff] %v5462_v20  ;;  %v5498_v49 = vsel %vm850_vm4, %v911_v7, %v912_v16 }
  0xf4   : > { %v750_v53 = vpop.permute.xlu2 %749  ;;  %8171 = vst [vmem:[#allocation54_spill] sm:$0xff] %v5485_v41 }
  0xf5   : > { %832 = vst.msk [vmem:[#allocation4 + $0x70] sm:$0xff] %vm817_vm3, %v750_v53 }
  0xf7   : > { %v758_v23 = vpop.permute.xlu0 %757 }
  0xf8   : > { %987 = vrot.lane.b32.xlu0 %v5462_v20, %s4595_s11  ;;  %v760_v0 = vpop.permute.xlu1 %759  ;;  %836 = vst.msk [vmem:[#allocation4 + $0x90] sm:$0xff] %vm817_vm3, %v758_v23 }
  0xf9   : > { %837 = vst.msk [vmem:[#allocation4 + $0x98] sm:$0xff] %vm817_vm3, %v760_v0 }
  0xfa   : > { %967 = vrot.lane.b32.xlu2 %v5459_v6, %s4595_s11  ;;  %989 = vrot.lane.b32.xlu1 %v5465_v43, %s4595_s11 }
  0xfc   : > { %v756_v53 = vpop.permute.xlu2 %755 }
  0xfd   : > { %835 = vst.msk [vmem:[#allocation4 + $0x88] sm:$0xff] %vm817_vm3, %v756_v53 }
  0xff   : > { %v764_v53 = vpop.permute.xlu0 %763 }
 0x100   : > { %993 = vrot.lane.b32.xlu0 %v5485_v41, %s4595_s11  ;;  %839 = vst.msk [vmem:[#allocation4 + $0xa8] sm:$0xff] %vm817_vm3, %v764_v53 }
 0x102   : > { %973 = vrot.lane.b32.xlu2 %v5482_v50, %s4595_s11  ;;  %1062 = vrot.lane.b32.xlu1 %v4827_v8, %s4596_s12  ;;  %v919_v8 = vrot.slane %v5200_v62, 2  ;;  %v926_v62 = vrot.slane %v5179_v54, 2 }
 0x104   : > { %v762_v1 = vpop.permute.xlu2 %761  ;;  %v766_v33 = vpop.permute.xlu1 %765  ;;  %v5511_v16 = vsel %vm850_vm4, %v917_v63, %v919_v8  ;;  %v5524_v63 = vsel %vm850_vm4, %v926_v62, %v927_v47 }
 0x105   : > { %838 = vst.msk [vmem:[#allocation4 + $0xa0] sm:$0xff] %vm817_vm3, %v762_v1 }
 0x106   : > { %840 = vst.msk [vmem:[#allocation4 + $0xb0] sm:$0xff] %vm817_vm3, %v766_v33 }
 0x107   : > { %v770_v0 = vpop.permute.xlu0 %769  ;;  %8172 = vst [vmem:[#allocation55_spill] sm:$0xff] %v5524_v63 }
 0x108   : > { %1066 = vrot.lane.b32.xlu0 %v4962_v51, %s4596_s12  ;;  %842 = vst.msk [vmem:[#allocation4 + $0xc0] sm:$0xff] %vm817_vm3, %v770_v0 }
 0x10a   : > { %979 = vrot.lane.b32.xlu2 %v5498_v49, %s4595_s11  ;;  %1068 = vrot.lane.b32.xlu1 %v4985_v61, %s4596_s12 }
 0x10c   : > { %v768_v23 = vpop.permute.xlu2 %767  ;;  %v772_v2 = vpop.permute.xlu1 %771 }
 0x10d   : > { %841 = vst.msk [vmem:[#allocation4 + $0xb8] sm:$0xff] %vm817_vm3, %v768_v23 }
 0x10e   : > { %843 = vst.msk [vmem:[#allocation4 + $0xc8] sm:$0xff] %vm817_vm3, %v772_v2 }
 0x110   : > { %1072 = vrot.lane.b32.xlu0 %v4900_v29, %s4596_s12 }
 0x112   : > { %985 = vrot.lane.b32.xlu2 %v5511_v16, %s4595_s11  ;;  %1074 = vrot.lane.b32.xlu1 %v4992_v3, %s4596_s12  ;;  %v776_v1 = vpop.permute.xlu0 %775 }
 0x113   : > { %845 = vst.msk [vmem:[#allocation4 + $0xd8] sm:$0xff] %vm817_vm3, %v776_v1  ;;  %v471_v1 = vld [vmem:[%s4801_s30 + $0xf0] sm:$0xff] }
 0x114   : > { %v774_v7 = vpop.permute.xlu2 %773  ;;  %v778_v53 = vpop.permute.xlu1 %777  ;;  %504 = vst.msk [vmem:[#allocation2 + $0x181] sm:$0xff] %vm385_vm0, %v471_v1 }
 0x115   : > { %844 = vst.msk [vmem:[#allocation4 + $0xd0] sm:$0xff] %vm817_vm3, %v774_v7 }
 0x116   : > { %846 = vst.msk [vmem:[#allocation4 + $0xe0] sm:$0xff] %vm817_vm3, %v778_v53 }
 0x118   : > { %1078 = vrot.lane.b32.xlu0 %v4924_v38, %s4596_s12 }
 0x11a   : > { %991 = vrot.lane.b32.xlu2 %v5524_v63, %s4595_s11  ;;  %1080 = vrot.lane.b32.xlu1 %v4930_v39, %s4596_s12  ;;  %v782_v8 = vpop.permute.xlu0 %781  ;;  %s6231_s11 = scalar_lea.vmem %s7941_s10, %s4372_s27  ;;  %s8111_s27 = smov 112  }
 0x11b   : > { %848 = vst.msk [vmem:[#allocation4 + $0xf0] sm:$0xff] %vm817_vm3, %v782_v8 }
 0x11c   : > { %v780_v33 = vpop.permute.xlu2 %779  ;;  %v784_v23 = vpop.permute.xlu1 %783 }
 0x11d   : > { %847 = vst.msk [vmem:[#allocation4 + $0xe8] sm:$0xff] %vm817_vm3, %v780_v33 }
 0x11e   : > { %849 = vst.msk [vmem:[#allocation4 + $0xf8] sm:$0xff] %vm817_vm3, %v784_v23  ;;  %vm2918_vm3 = vcmask 523648  }
 0x120   : > { %1084 = vrot.lane.b32.xlu0 %v4943_v46, %s4596_s12 }
 0x122   : > { %1064 = vrot.lane.b32.xlu2 %v4831_v9, %s4596_s12  ;;  %1086 = vrot.lane.b32.xlu1 %v5074_v52, %s4596_s12  ;;  %v934_v0 = vpop.permute.xlu0 %933 }
 0x123   : > { %1029 = vst.msk [vmem:[#allocation4 + $0x8] sm:$0xff] %vm1027_vm5, %v934_v0 }
 0x124   : > { %v932_v47 = vpop.permute.xlu2 %931  ;;  %v936_v2 = vpop.permute.xlu1 %935 }
 0x125   : > { %1028 = vst.msk [vmem:[#allocation4] sm:$0xff] %vm1027_vm5, %v932_v47 }
 0x126   : > { %1030 = vst.msk [vmem:[#allocation4 + $0x10] sm:$0xff] %vm1027_vm5, %v936_v2 }
 0x128   : > { %1090 = vrot.lane.b32.xlu0 %v5016_v13, %s4596_s12 }
 0x12a   : > { %1070 = vrot.lane.b32.xlu2 %v4896_v27, %s4596_s12  ;;  %1092 = vrot.lane.b32.xlu1 %v5023_v17, %s4596_s12  ;;  %v940_v62 = vpop.permute.xlu0 %939 }
 0x12b   : > { %1032 = vst.msk [vmem:[#allocation4 + $0x20] sm:$0xff] %vm1027_vm5, %v940_v62 }
 0x12c   : > { %v938_v9 = vpop.permute.xlu2 %937  ;;  %v942_v7 = vpop.permute.xlu1 %941 }
 0x12d   : > { %1031 = vst.msk [vmem:[#allocation4 + $0x18] sm:$0xff] %vm1027_vm5, %v938_v9 }
 0x12e   : > { %1033 = vst.msk [vmem:[#allocation4 + $0x28] sm:$0xff] %vm1027_vm5, %v942_v7 }
 0x130   : > { %1096 = vrot.lane.b32.xlu0 %v5036_v25, %s4596_s12 }
 0x132   : > { %1076 = vrot.lane.b32.xlu2 %v4911_v34, %s4596_s12  ;;  %1098 = vrot.lane.b32.xlu1 %v5155_v28, %s4596_s12  ;;  %v946_v33 = vpop.permute.xlu0 %945 }
 0x133   : > { %1035 = vst.msk [vmem:[#allocation4 + $0x38] sm:$0xff] %vm1027_vm5, %v946_v33  ;;  %v472_v33 = vld [vmem:[%s4801_s30 + $0xf8] sm:$0xff]  ;;  %s8103_s30 = smov 80  }
 0x134   : > { %v944_v53 = vpop.permute.xlu2 %943  ;;  %v948_v8 = vpop.permute.xlu1 %947  ;;  %505 = vst.msk [vmem:[#allocation2 + $0x189] sm:$0xff] %vm385_vm0, %v472_v33  ;;  %vm2578_vm0 = vcmask 261248  }
 0x135   : > { %1034 = vst.msk [vmem:[#allocation4 + $0x30] sm:$0xff] %vm1027_vm5, %v944_v53 }
 0x136   : > { %1036 = vst.msk [vmem:[#allocation4 + $0x40] sm:$0xff] %vm1027_vm5, %v948_v8  ;;  %v5592_v8 = vld [vmem:[#allocation2 + $0x180] sm:$0xff] }
 0x138   : > { %1102 = vrot.lane.b32.xlu0 %v5093_v60, %s4596_s12 }
 0x13a   : > { %1082 = vrot.lane.b32.xlu2 %v4941_v45, %s4596_s12  ;;  %1104 = vrot.lane.b32.xlu1 %v5103_v19, %s4596_s12  ;;  %v952_v47 = vpop.permute.xlu0 %951 }
 0x13b   : > { %1038 = vst.msk [vmem:[#allocation4 + $0x50] sm:$0xff] %vm1027_vm5, %v952_v47 }
 0x13c   : > { %v950_v23 = vpop.permute.xlu2 %949  ;;  %v954_v0 = vpop.permute.xlu1 %953 }
 0x13d   : > { %1037 = vst.msk [vmem:[#allocation4 + $0x48] sm:$0xff] %vm1027_vm5, %v950_v23 }
 0x13e   : > { %1039 = vst.msk [vmem:[#allocation4 + $0x58] sm:$0xff] %vm1027_vm5, %v954_v0 }
 0x140   : > { %1108 = vrot.lane.b32.xlu0 %v5116_v26, %s4596_s12 }
 0x142   : > { %1088 = vrot.lane.b32.xlu2 %v5007_v10, %s4596_s12  ;;  %1110 = vrot.lane.b32.xlu1 %v5209_v44, %s4596_s12  ;;  %v958_v9 = vpop.permute.xlu0 %957 }
 0x143   : > { %1041 = vst.msk [vmem:[#allocation4 + $0x68] sm:$0xff] %vm1027_vm5, %v958_v9 }
 0x144   : > { %v956_v2 = vpop.permute.xlu2 %955  ;;  %v960_v62 = vpop.permute.xlu1 %959 }
 0x145   : > { %1040 = vst.msk [vmem:[#allocation4 + $0x60] sm:$0xff] %vm1027_vm5, %v956_v2 }
 0x146   : > { %1042 = vst.msk [vmem:[#allocation4 + $0x70] sm:$0xff] %vm1027_vm5, %v960_v62 }
 0x148   : > { %1114 = vrot.lane.b32.xlu0 %v5168_v32, %s4596_s12 }
 0x14a   : > { %1094 = vrot.lane.b32.xlu2 %v5034_v24, %s4596_s12  ;;  %1116 = vrot.lane.b32.xlu1 %v5173_v57, %s4596_s12  ;;  %v964_v1 = vpop.permute.xlu0 %963 }
 0x14b   : > { %1044 = vst.msk [vmem:[#allocation4 + $0x80] sm:$0xff] %vm1027_vm5, %v964_v1  ;;  %v8173_v1 = vld [vmem:[#allocation14_spill] sm:$0xff] }
 0x14c   : > { %v962_v7 = vpop.permute.xlu2 %961  ;;  %v966_v53 = vpop.permute.xlu1 %965 }
 0x14d   : > { %1043 = vst.msk [vmem:[#allocation4 + $0x78] sm:$0xff] %vm1027_vm5, %v962_v7 }
 0x14e   : > { %1045 = vst.msk [vmem:[#allocation4 + $0x88] sm:$0xff] %vm1027_vm5, %v966_v53 }
 0x150   : > { %1120 = vrot.lane.b32.xlu0 %v5186_v40, %s4596_s12 }
 0x152   : > { %1100 = vrot.lane.b32.xlu2 %v5083_v58, %s4596_s12  ;;  %1122 = vrot.lane.b32.xlu1 %v5592_v8, %s4596_s12  ;;  %v970_v47 = vpop.permute.xlu0 %969 }
 0x153   : > { %1047 = vst.msk [vmem:[#allocation4 + $0x98] sm:$0xff] %vm1027_vm5, %v970_v47  ;;  %v5631_v47 = vld [vmem:[#allocation2 + $0x188] sm:$0xff] }
 0x154   : > { %v968_v23 = vpop.permute.xlu2 %967  ;;  %v972_v0 = vpop.permute.xlu1 %971 }
 0x155   : > { %1046 = vst.msk [vmem:[#allocation4 + $0x90] sm:$0xff] %vm1027_vm5, %v968_v23 }
 0x156   : > { %1048 = vst.msk [vmem:[#allocation4 + $0xa0] sm:$0xff] %vm1027_vm5, %v972_v0  ;;  %v8174_v0 = vld [vmem:[#allocation24_spill] sm:$0xff] }
 0x158   : > { %1197 = vrot.lane.b32.xlu0 %v4847_v15, %s4597_s20 }
 0x15a   : > { %1106 = vrot.lane.b32.xlu2 %v5111_v21, %s4596_s12  ;;  %1199 = vrot.lane.b32.xlu1 %v4871_v18, %s4597_s20  ;;  %v976_v9 = vpop.permute.xlu0 %975 }
 0x15b   : > { %1050 = vst.msk [vmem:[#allocation4 + $0xb0] sm:$0xff] %vm1027_vm5, %v976_v9 }
 0x15c   : > { %v974_v2 = vpop.permute.xlu2 %973  ;;  %v978_v62 = vpop.permute.xlu1 %977 }
 0x15d   : > { %1049 = vst.msk [vmem:[#allocation4 + $0xa8] sm:$0xff] %vm1027_vm5, %v974_v2  ;;  %v8175_v2 = vld [vmem:[#allocation16_spill] sm:$0xff] }
 0x15e   : > { %1051 = vst.msk [vmem:[#allocation4 + $0xb8] sm:$0xff] %vm1027_vm5, %v978_v62 }
 0x160   : > { %1203 = vrot.lane.b32.xlu0 %v5045_v30, %s4597_s20 }
 0x162   : > { %1112 = vrot.lane.b32.xlu2 %v5134_v56, %s4596_s12  ;;  %1205 = vrot.lane.b32.xlu1 %v4917_v36, %s4597_s20  ;;  %v982_v18 = vpop.permute.xlu0 %981 }
 0x163   : > { %1053 = vst.msk [vmem:[#allocation4 + $0xc8] sm:$0xff] %vm1027_vm5, %v982_v18  ;;  %v8176_v18 = vld [vmem:[#allocation18_spill] sm:$0xff] }
 0x164   : > { %v980_v15 = vpop.permute.xlu2 %979  ;;  %v984_v7 = vpop.permute.xlu1 %983 }
 0x165   : > { %1052 = vst.msk [vmem:[#allocation4 + $0xc0] sm:$0xff] %vm1027_vm5, %v980_v15 }
 0x166   : > { %1054 = vst.msk [vmem:[#allocation4 + $0xd0] sm:$0xff] %vm1027_vm5, %v984_v7  ;;  %v8177_v7 = vld [vmem:[#allocation27_spill] sm:$0xff] }
 0x168   : > { %1209 = vrot.lane.b32.xlu0 %v5089_v59, %s4597_s20 }
 0x16a   : > { %1118 = vrot.lane.b32.xlu2 %v5179_v54, %s4596_s12  ;;  %1211 = vrot.lane.b32.xlu1 %v8173_v1, %s4597_s20  ;;  %v988_v33 = vpop.permute.xlu0 %987 }
 0x16b   : > { %1056 = vst.msk [vmem:[#allocation4 + $0xe0] sm:$0xff] %vm1027_vm5, %v988_v33 }
 0x16c   : > { %v986_v53 = vpop.permute.xlu2 %985  ;;  %v990_v23 = vpop.permute.xlu1 %989 }
 0x16d   : > { %1055 = vst.msk [vmem:[#allocation4 + $0xd8] sm:$0xff] %vm1027_vm5, %v986_v53  ;;  %v8178_v53 = vld [vmem:[#allocation19_spill] sm:$0xff] }
 0x16e   : > { %1057 = vst.msk [vmem:[#allocation4 + $0xe8] sm:$0xff] %vm1027_vm5, %v990_v23 }
 0x170   : > { %1215 = vrot.lane.b32.xlu0 %v8174_v0, %s4597_s20 }
 0x172   : > { %1124 = vrot.lane.b32.xlu2 %v5631_v47, %s4596_s12  ;;  %1217 = vrot.lane.b32.xlu1 %v8175_v2, %s4597_s20  ;;  %v994_v62 = vpop.permute.xlu0 %993  ;;  %s8285_s12 = smov 48  }
 0x173   : > { %1059 = vst.msk [vmem:[#allocation4 + $0xf8] sm:$0xff] %vm1027_vm5, %v994_v62  ;;  %v8180_v62 = vld [vmem:[#allocation30_spill] sm:$0xff] }
 0x174   : > { %v992_v9 = vpop.permute.xlu2 %991  ;;  %v1063_v15 = vpop.permute.xlu1 %1062 }
 0x175   : > { %1058 = vst.msk [vmem:[#allocation4 + $0xf0] sm:$0xff] %vm1027_vm5, %v992_v9  ;;  %v8179_v9 = vld [vmem:[#allocation13_spill] sm:$0xff]  ;;  %vm3053_vm5 = vcmask 654848  }
 0x176   : > { %1159 = vst.msk [vmem:[#allocation4] sm:$0xff] %vm1158_vm6, %v1063_v15  ;;  %v8181_v15 = vld [vmem:[#allocation22_spill] sm:$0xff] }
 0x178   : > { %1221 = vrot.lane.b32.xlu0 %v8177_v7, %s4597_s20 }
 0x17a   : > { %1201 = vrot.lane.b32.xlu2 %v8176_v18, %s4597_s20  ;;  %1223 = vrot.lane.b32.xlu1 %v8178_v53, %s4597_s20  ;;  %v1067_v23 = vpop.permute.xlu0 %1066 }
 0x17b   : > { %1161 = vst.msk [vmem:[#allocation4 + $0x10] sm:$0xff] %vm1158_vm6, %v1067_v23  ;;  %v8184_v23 = vld [vmem:[#allocation25_spill] sm:$0xff] }
 0x17c   : > { %v1065_v33 = vpop.permute.xlu2 %1064  ;;  %v1069_v59 = vpop.permute.xlu1 %1068 }
 0x17d   : > { %1160 = vst.msk [vmem:[#allocation4 + $0x8] sm:$0xff] %vm1158_vm6, %v1065_v33  ;;  %v8183_v33 = vld [vmem:[#allocation33_spill] sm:$0xff] }
 0x17e   : > { %1162 = vst.msk [vmem:[#allocation4 + $0x18] sm:$0xff] %vm1158_vm6, %v1069_v59  ;;  %v8182_v59 = vld [vmem:[#allocation15_spill] sm:$0xff] }
 0x180   : > { %1227 = vrot.lane.b32.xlu0 %v8180_v62, %s4597_s20 }
 0x182   : > { %1207 = vrot.lane.b32.xlu2 %v8179_v9, %s4597_s20  ;;  %1229 = vrot.lane.b32.xlu1 %v8181_v15, %s4597_s20  ;;  %v1073_v53 = vpop.permute.xlu0 %1072 }
 0x183   : > { %1164 = vst.msk [vmem:[#allocation4 + $0x28] sm:$0xff] %vm1158_vm6, %v1073_v53 }
 0x184   : > { %v1071_v7 = vpop.permute.xlu2 %1070  ;;  %v1075_v2 = vpop.permute.xlu1 %1074 }
 0x185   : > { %1163 = vst.msk [vmem:[#allocation4 + $0x20] sm:$0xff] %vm1158_vm6, %v1071_v7  ;;  %v8186_v7 = vld [vmem:[#allocation28_spill] sm:$0xff] }
 0x186   : > { %1165 = vst.msk [vmem:[#allocation4 + $0x30] sm:$0xff] %vm1158_vm6, %v1075_v2  ;;  %v8185_v2 = vld [vmem:[#allocation17_spill] sm:$0xff] }
 0x188   : > { %1233 = vrot.lane.b32.xlu0 %v8183_v33, %s4597_s20 }
 0x18a   : > { %1213 = vrot.lane.b32.xlu2 %v8182_v59, %s4597_s20  ;;  %1235 = vrot.lane.b32.xlu1 %v8184_v23, %s4597_s20  ;;  %v1079_v15 = vpop.permute.xlu0 %1078 }
 0x18b   : > { %1167 = vst.msk [vmem:[#allocation4 + $0x40] sm:$0xff] %vm1158_vm6, %v1079_v15 }
 0x18c   : > { %v1077_v62 = vpop.permute.xlu2 %1076  ;;  %v1081_v9 = vpop.permute.xlu1 %1080 }
 0x18d   : > { %1166 = vst.msk [vmem:[#allocation4 + $0x38] sm:$0xff] %vm1158_vm6, %v1077_v62  ;;  %v8188_v62 = vld [vmem:[#allocation31_spill] sm:$0xff] }
 0x18e   : > { %1168 = vst.msk [vmem:[#allocation4 + $0x48] sm:$0xff] %vm1158_vm6, %v1081_v9  ;;  %v8187_v9 = vld [vmem:[#allocation20_spill] sm:$0xff] }
 0x190   : > { %1239 = vrot.lane.b32.xlu0 %v5266_v4, %s4597_s20 }
 0x192   : > { %1219 = vrot.lane.b32.xlu2 %v8185_v2, %s4597_s20  ;;  %1241 = vrot.lane.b32.xlu1 %v8186_v7, %s4597_s20  ;;  %v1085_v23 = vpop.permute.xlu0 %1084  ;;  %v1192_v2 = vrot.slane %v5592_v8, 1 }
 0x193   : > { %1170 = vst.msk [vmem:[#allocation4 + $0x58] sm:$0xff] %vm1158_vm6, %v1085_v23  ;;  %v5687_v23 = vld [vmem:[#allocation2 + $0x190] sm:$0x3] }
 0x194   : > { %v1083_v53 = vpop.permute.xlu2 %1082  ;;  %v1087_v33 = vpop.permute.xlu1 %1086 }
 0x195   : > { %1169 = vst.msk [vmem:[#allocation4 + $0x50] sm:$0xff] %vm1158_vm6, %v1083_v53  ;;  %v8190_v53 = vld [vmem:[#allocation41_spill] sm:$0xff] }
 0x196   : > { %1171 = vst.msk [vmem:[#allocation4 + $0x60] sm:$0xff] %vm1158_vm6, %v1087_v33  ;;  %v8189_v33 = vld [vmem:[#allocation23_spill] sm:$0xff] }
 0x198   : > { %1245 = vrot.lane.b32.xlu0 %v5282_v5, %s4597_s20  ;;  %v8191_v5 = vld [vmem:[#allocation34_spill] sm:$0xff] }
 0x19a   : > { %1225 = vrot.lane.b32.xlu2 %v8187_v9, %s4597_s20  ;;  %1247 = vrot.lane.b32.xlu1 %v8188_v62, %s4597_s20  ;;  %v1091_v7 = vpop.permute.xlu0 %1090 }
 0x19b   : > { %1173 = vst.msk [vmem:[#allocation4 + $0x70] sm:$0xff] %vm1158_vm6, %v1091_v7  ;;  %v1195_v7 = vrot.slane %v5687_v23, 1 }
 0x19c   : > { %v1089_v15 = vpop.permute.xlu2 %1088  ;;  %v1093_v4 = vpop.permute.xlu1 %1092 }
 0x19d   : > { %1172 = vst.msk [vmem:[#allocation4 + $0x68] sm:$0xff] %vm1158_vm6, %v1089_v15  ;;  %v1193_v15 = vrot.slane %v5631_v47, 1 }
 0x19e   : > { %1174 = vst.msk [vmem:[#allocation4 + $0x78] sm:$0xff] %vm1158_vm6, %v1093_v4 }
 0x1a0   : > { %1251 = vrot.lane.b32.xlu0 %v8190_v53, %s4597_s20  ;;  %v5702_v53 = vsel %vm640_vm1, %v1192_v2, %v1193_v15  ;;  %v8195_v2 = vld [vmem:[#allocation29_spill] sm:$0xff] }
 0x1a1   : > { %8192 = vst [vmem:[#allocation14_spill] sm:$0xff] %v5702_v53 }
 0x1a2   : > { %1231 = vrot.lane.b32.xlu2 %v8189_v33, %s4597_s20  ;;  %1253 = vrot.lane.b32.xlu1 %v8191_v5, %s4597_s20  ;;  %v1097_v9 = vpop.permute.xlu0 %1096  ;;  %v5705_v5 = vsel %vm640_vm1, %v1193_v15, %v1195_v7  ;;  %v8194_v33 = vld [vmem:[#allocation26_spill] sm:$0xff]  ;;  %v8196_v15 = vld [vmem:[#allocation39_spill] sm:$0xff] }
 0x1a3   : > { %1176 = vst.msk [vmem:[#allocation4 + $0x88] sm:$0xff] %vm1158_vm6, %v1097_v9 }
 0x1a4   : > { %v1095_v62 = vpop.permute.xlu2 %1094  ;;  %v1099_v4 = vpop.permute.xlu1 %1098  ;;  %8193 = vst [vmem:[#allocation18_spill] sm:$0xff] %v5705_v5 }
 0x1a5   : > { %1175 = vst.msk [vmem:[#allocation4 + $0x80] sm:$0xff] %vm1158_vm6, %v1095_v62 }
 0x1a6   : > { %1177 = vst.msk [vmem:[#allocation4 + $0x90] sm:$0xff] %vm1158_vm6, %v1099_v4 }
 0x1a8   : > { %1257 = vrot.lane.b32.xlu0 %v5702_v53, %s4597_s20 }
 0x1aa   : > { %1237 = vrot.lane.b32.xlu2 %v8194_v33, %s4597_s20  ;;  %1259 = vrot.lane.b32.xlu1 %v5705_v5, %s4597_s20  ;;  %v1103_v0 = vpop.permute.xlu0 %1102 }
 0x1ab   : > { %1179 = vst.msk [vmem:[#allocation4 + $0xa0] sm:$0xff] %vm1158_vm6, %v1103_v0  ;;  %v8197_v0 = vld [vmem:[#allocation32_spill] sm:$0xff] }
 0x1ac   : > { %v1101_v62 = vpop.permute.xlu2 %1100  ;;  %v1105_v9 = vpop.permute.xlu1 %1104 }
 0x1ad   : > { %1178 = vst.msk [vmem:[#allocation4 + $0x98] sm:$0xff] %vm1158_vm6, %v1101_v62 }
 0x1ae   : > { %1180 = vst.msk [vmem:[#allocation4 + $0xa8] sm:$0xff] %vm1158_vm6, %v1105_v9 }
 0x1b0   : > { %1333 = vrot.lane.b32.xlu0 %v5342_v37, %s4598_s21  ;;  %v8198_v37 = vld [vmem:[#allocation42_spill] sm:$0xff] }
 0x1b2   : > { %1243 = vrot.lane.b32.xlu2 %v8195_v2, %s4597_s20  ;;  %1335 = vrot.lane.b32.xlu1 %v8196_v15, %s4598_s21  ;;  %v1109_v4 = vpop.permute.xlu0 %1108 }
 0x1b3   : > { %1182 = vst.msk [vmem:[#allocation4 + $0xb8] sm:$0xff] %vm1158_vm6, %v1109_v4 }
 0x1b4   : > { %v1107_v7 = vpop.permute.xlu2 %1106  ;;  %v1111_v62 = vpop.permute.xlu1 %1110 }
 0x1b5   : > { %1181 = vst.msk [vmem:[#allocation4 + $0xb0] sm:$0xff] %vm1158_vm6, %v1107_v7  ;;  %v8199_v7 = vld [vmem:[#allocation35_spill] sm:$0xff] }
 0x1b6   : > { %1183 = vst.msk [vmem:[#allocation4 + $0xc0] sm:$0xff] %vm1158_vm6, %v1111_v62 }
 0x1b8   : > { %1339 = vrot.lane.b32.xlu0 %v5365_v22, %s4598_s21 }
 0x1ba   : > { %1249 = vrot.lane.b32.xlu2 %v8197_v0, %s4597_s20  ;;  %1341 = vrot.lane.b32.xlu1 %v8198_v37, %s4598_s21  ;;  %v1115_v53 = vpop.permute.xlu0 %1114 }
 0x1bb   : > { %1185 = vst.msk [vmem:[#allocation4 + $0xd0] sm:$0xff] %vm1158_vm6, %v1115_v53 }
 0x1bc   : > { %v1113_v9 = vpop.permute.xlu2 %1112  ;;  %v1117_v5 = vpop.permute.xlu1 %1116 }
 0x1bd   : > { %1184 = vst.msk [vmem:[#allocation4 + $0xc8] sm:$0xff] %vm1158_vm6, %v1113_v9 }
 0x1be   : > { %1186 = vst.msk [vmem:[#allocation4 + $0xd8] sm:$0xff] %vm1158_vm6, %v1117_v5  ;;  %v8200_v5 = vld [vmem:[#allocation37_spill] sm:$0xff] }
 0x1c0   : > { %1345 = vrot.lane.b32.xlu0 %v5388_v14, %s4598_s21 }
 0x1c2   : > { %1255 = vrot.lane.b32.xlu2 %v8199_v7, %s4597_s20  ;;  %1347 = vrot.lane.b32.xlu1 %v5324_v55, %s4598_s21  ;;  %v1121_v62 = vpop.permute.xlu0 %1120 }
 0x1c3   : > { %1188 = vst.msk [vmem:[#allocation4 + $0xe8] sm:$0xff] %vm1158_vm6, %v1121_v62 }
 0x1c4   : > { %v1119_v4 = vpop.permute.xlu2 %1118  ;;  %v1123_v0 = vpop.permute.xlu1 %1122 }
 0x1c5   : > { %1187 = vst.msk [vmem:[#allocation4 + $0xe0] sm:$0xff] %vm1158_vm6, %v1119_v4 }
 0x1c6   : > { %1189 = vst.msk [vmem:[#allocation4 + $0xf0] sm:$0xff] %vm1158_vm6, %v1123_v0  ;;  %v8201_v0 = vld [vmem:[#allocation40_spill] sm:$0xff] }
 0x1c8   : > { %1351 = vrot.lane.b32.xlu0 %v5412_v12, %s4598_s21 }
 0x1ca   : > { %1331 = vrot.lane.b32.xlu2 %v8200_v5, %s4598_s21  ;;  %1353 = vrot.lane.b32.xlu1 %v5345_v48, %s4598_s21  ;;  %v1198_v9 = vpop.permute.xlu0 %1197 }
 0x1cb   : > { %1294 = vst.msk [vmem:[#allocation4] sm:$0xff] %vm1293_vm7, %v1198_v9 }
 0x1cc   : > { %v1125_v53 = vpop.permute.xlu2 %1124  ;;  %v1200_v4 = vpop.permute.xlu1 %1199 }
 0x1cd   : > { %1190 = vst.msk [vmem:[#allocation4 + $0xf8] sm:$0xff] %vm1158_vm6, %v1125_v53  ;;  %v8202_v53 = vld [vmem:[#allocation43_spill] sm:$0xff]  ;;  %vm3187_vm6 = vcmask 786048  }
 0x1ce   : > { %1295 = vst.msk [vmem:[#allocation4 + $0x8] sm:$0xff] %vm1293_vm7, %v1200_v4 }
 0x1d0   : > { %1357 = vrot.lane.b32.xlu0 %v5437_v11, %s4598_s21 }
 0x1d2   : > { %1337 = vrot.lane.b32.xlu2 %v8201_v0, %s4598_s21  ;;  %1359 = vrot.lane.b32.xlu1 %v5368_v31, %s4598_s21  ;;  %v1204_v5 = vpop.permute.xlu0 %1203 }
 0x1d3   : > { %1297 = vst.msk [vmem:[#allocation4 + $0x18] sm:$0xff] %vm1293_vm7, %v1204_v5 }
 0x1d4   : > { %v1202_v62 = vpop.permute.xlu2 %1201  ;;  %v1206_v7 = vpop.permute.xlu1 %1205 }
 0x1d5   : > { %1296 = vst.msk [vmem:[#allocation4 + $0x10] sm:$0xff] %vm1293_vm7, %v1202_v62 }
 0x1d6   : > { %1298 = vst.msk [vmem:[#allocation4 + $0x20] sm:$0xff] %vm1293_vm7, %v1206_v7  ;;  %v8203_v7 = vld [vmem:[#allocation48_spill] sm:$0xff] }
 0x1d8   : > { %1363 = vrot.lane.b32.xlu0 %v5459_v6, %s4598_s21 }
 0x1da   : > { %1343 = vrot.lane.b32.xlu2 %v8202_v53, %s4598_s21  ;;  %1365 = vrot.lane.b32.xlu1 %v5391_v35, %s4598_s21  ;;  %v1210_v4 = vpop.permute.xlu0 %1209 }
 0x1db   : > { %1300 = vst.msk [vmem:[#allocation4 + $0x30] sm:$0xff] %vm1293_vm7, %v1210_v4 }
 0x1dc   : > { %v1208_v9 = vpop.permute.xlu2 %1207  ;;  %v1212_v2 = vpop.permute.xlu1 %1211 }
 0x1dd   : > { %1299 = vst.msk [vmem:[#allocation4 + $0x28] sm:$0xff] %vm1293_vm7, %v1208_v9  ;;  %v8205_v9 = vld [vmem:[#allocation50_spill] sm:$0xff] }
 0x1de   : > { %1301 = vst.msk [vmem:[#allocation4 + $0x38] sm:$0xff] %vm1293_vm7, %v1212_v2  ;;  %v8204_v2 = vld [vmem:[#allocation44_spill] sm:$0xff] }
 0x1e0   : > { %1369 = vrot.lane.b32.xlu0 %v5482_v50, %s4598_s21 }
 0x1e2   : > { %1349 = vrot.lane.b32.xlu2 %v5327_v42, %s4598_s21  ;;  %1371 = vrot.lane.b32.xlu1 %v8203_v7, %s4598_s21  ;;  %v1216_v5 = vpop.permute.xlu0 %1215 }
 0x1e3   : > { %1303 = vst.msk [vmem:[#allocation4 + $0x48] sm:$0xff] %vm1293_vm7, %v1216_v5 }
 0x1e4   : > { %v1214_v62 = vpop.permute.xlu2 %1213  ;;  %v1218_v35 = vpop.permute.xlu1 %1217 }
 0x1e5   : > { %1302 = vst.msk [vmem:[#allocation4 + $0x40] sm:$0xff] %vm1293_vm7, %v1214_v62 }
 0x1e6   : > { %1304 = vst.msk [vmem:[#allocation4 + $0x50] sm:$0xff] %vm1293_vm7, %v1218_v35  ;;  %v8206_v35 = vld [vmem:[#allocation45_spill] sm:$0xff] }
 0x1e8   : > { %1375 = vrot.lane.b32.xlu0 %v5498_v49, %s4598_s21 }
 0x1ea   : > { %1355 = vrot.lane.b32.xlu2 %v8204_v2, %s4598_s21  ;;  %1377 = vrot.lane.b32.xlu1 %v8205_v9, %s4598_s21  ;;  %v1222_v7 = vpop.permute.xlu0 %1221 }
 0x1eb   : > { %1306 = vst.msk [vmem:[#allocation4 + $0x60] sm:$0xff] %vm1293_vm7, %v1222_v7  ;;  %v1327_v7 = vrot.slane %v5631_v47, 2 }
 0x1ec   : > { %v1220_v4 = vpop.permute.xlu2 %1219  ;;  %v1224_v6 = vpop.permute.xlu1 %1223 }
 0x1ed   : > { %1305 = vst.msk [vmem:[#allocation4 + $0x58] sm:$0xff] %vm1293_vm7, %v1220_v4 }
 0x1ee   : > { %1307 = vst.msk [vmem:[#allocation4 + $0x68] sm:$0xff] %vm1293_vm7, %v1224_v6  ;;  %v8207_v6 = vld [vmem:[#allocation47_spill] sm:$0xff] }
 0x1f0   : > { %1381 = vrot.lane.b32.xlu0 %v5511_v16, %s4598_s21 }
 0x1f2   : > { %1361 = vrot.lane.b32.xlu2 %v8206_v35, %s4598_s21  ;;  %1383 = vrot.lane.b32.xlu1 %v5462_v20, %s4598_s21  ;;  %v1228_v5 = vpop.permute.xlu0 %1227  ;;  %v1329_v20 = vrot.slane %v5687_v23, 2 }
 0x1f3   : > { %1309 = vst.msk [vmem:[#allocation4 + $0x78] sm:$0xff] %vm1293_vm7, %v1228_v5 }
 0x1f4   : > { %v1226_v62 = vpop.permute.xlu2 %1225  ;;  %v1230_v9 = vpop.permute.xlu1 %1229 }
 0x1f5   : > { %1308 = vst.msk [vmem:[#allocation4 + $0x70] sm:$0xff] %vm1293_vm7, %v1226_v62 }
 0x1f6   : > { %1310 = vst.msk [vmem:[#allocation4 + $0x80] sm:$0xff] %vm1293_vm7, %v1230_v9  ;;  %v5809_v9 = vsel %vm850_vm4, %v1327_v7, %v1329_v20  ;;  %v8209_v20 = vld [vmem:[#allocation51_spill] sm:$0xff] }
 0x1f8   : > { %1387 = vrot.lane.b32.xlu0 %v5524_v63, %s4598_s21  ;;  %v8208_v63 = vld [vmem:[#allocation49_spill] sm:$0xff] }
 0x1fa   : > { %1367 = vrot.lane.b32.xlu2 %v8207_v6, %s4598_s21  ;;  %1389 = vrot.lane.b32.xlu1 %v5485_v41, %s4598_s21  ;;  %v1234_v62 = vpop.permute.xlu0 %1233 }
 0x1fb   : > { %1312 = vst.msk [vmem:[#allocation4 + $0x90] sm:$0xff] %vm1293_vm7, %v1234_v62 }
 0x1fc   : > { %v1232_v4 = vpop.permute.xlu2 %1231  ;;  %v1236_v5 = vpop.permute.xlu1 %1235 }
 0x1fd   : > { %1311 = vst.msk [vmem:[#allocation4 + $0x88] sm:$0xff] %vm1293_vm7, %v1232_v4 }
 0x1fe   : > { %1313 = vst.msk [vmem:[#allocation4 + $0x98] sm:$0xff] %vm1293_vm7, %v1236_v5 }
 0x200   : > { %1393 = vrot.lane.b32.xlu0 %v5809_v9, %s4598_s21 }
 0x202   : > { %1373 = vrot.lane.b32.xlu2 %v8208_v63, %s4598_s21  ;;  %1462 = vrot.lane.b32.xlu1 %v4962_v51, %s4599_s25  ;;  %v1240_v4 = vpop.permute.xlu0 %1239 }
 0x203   : > { %1315 = vst.msk [vmem:[#allocation4 + $0xa8] sm:$0xff] %vm1293_vm7, %v1240_v4 }
 0x204   : > { %v1238_v23 = vpop.permute.xlu2 %1237  ;;  %v1242_v62 = vpop.permute.xlu1 %1241 }
 0x205   : > { %1314 = vst.msk [vmem:[#allocation4 + $0xa0] sm:$0xff] %vm1293_vm7, %v1238_v23  ;;  %v1326_v23 = vrot.slane %v5592_v8, 2 }
 0x206   : > { %1316 = vst.msk [vmem:[#allocation4 + $0xb0] sm:$0xff] %vm1293_vm7, %v1242_v62 }
 0x208   : > { %1466 = vrot.lane.b32.xlu0 %v4896_v27, %s4599_s25 }
 0x20a   : > { %1379 = vrot.lane.b32.xlu2 %v8209_v20, %s4598_s21  ;;  %1468 = vrot.lane.b32.xlu1 %v4900_v29, %s4599_s25  ;;  %v1246_v51 = vpop.permute.xlu0 %1245 }
 0x20b   : > { %1318 = vst.msk [vmem:[#allocation4 + $0xc0] sm:$0xff] %vm1293_vm7, %v1246_v51 }
 0x20c   : > { %v1244_v5 = vpop.permute.xlu2 %1243  ;;  %v1248_v41 = vpop.permute.xlu1 %1247 }
 0x20d   : > { %1317 = vst.msk [vmem:[#allocation4 + $0xb8] sm:$0xff] %vm1293_vm7, %v1244_v5  ;;  %v5932_v5 = vld [vmem:[#allocation2 + $0x1a0] sm:$0xff] }
 0x20e   : > { %1319 = vst.msk [vmem:[#allocation4 + $0xc8] sm:$0xff] %vm1293_vm7, %v1248_v41  ;;  %v5840_v41 = vsel %vm850_vm4, %v1326_v23, %v1327_v7  ;;  %v5952_v23 = vld [vmem:[#allocation2 + $0x198] sm:$0xff] }
 0x210   : > { %1472 = vrot.lane.b32.xlu0 %v4911_v34, %s4599_s25 }
 0x212   : > { %1385 = vrot.lane.b32.xlu2 %v5465_v43, %s4598_s21  ;;  %1474 = vrot.lane.b32.xlu1 %v4924_v38, %s4599_s25  ;;  %v1252_v29 = vpop.permute.xlu0 %1251 }
 0x213   : > { %1321 = vst.msk [vmem:[#allocation4 + $0xd8] sm:$0xff] %vm1293_vm7, %v1252_v29  ;;  %v8211_v29 = vld [vmem:[#allocation13_spill] sm:$0xff] }
 0x214   : > { %v1250_v27 = vpop.permute.xlu2 %1249  ;;  %v1254_v4 = vpop.permute.xlu1 %1253 }
 0x215   : > { %1320 = vst.msk [vmem:[#allocation4 + $0xd0] sm:$0xff] %vm1293_vm7, %v1250_v27 }
 0x216   : > { %1322 = vst.msk [vmem:[#allocation4 + $0xe0] sm:$0xff] %vm1293_vm7, %v1254_v4  ;;  %v8212_v4 = vld [vmem:[#allocation16_spill] sm:$0xff] }
 0x218   : > { %1478 = vrot.lane.b32.xlu0 %v4941_v45, %s4599_s25 }
 0x21a   : > { %1391 = vrot.lane.b32.xlu2 %v5840_v41, %s4598_s21  ;;  %1480 = vrot.lane.b32.xlu1 %v4943_v46, %s4599_s25  ;;  %v1258_v38 = vpop.permute.xlu0 %1257  ;;  %s7843_s21 = sand.u32 1, %s4583_s14  }
 0x21b   : > { %1324 = vst.msk [vmem:[#allocation4 + $0xf0] sm:$0xff] %vm1293_vm7, %v1258_v38 }
 0x21c   : > { %v1256_v34 = vpop.permute.xlu2 %1255  ;;  %v1260_v62 = vpop.permute.xlu1 %1259 }
 0x21d   : > { %1323 = vst.msk [vmem:[#allocation4 + $0xe8] sm:$0xff] %vm1293_vm7, %v1256_v34 }
 0x21e   : > { %1325 = vst.msk [vmem:[#allocation4 + $0xf8] sm:$0xff] %vm1293_vm7, %v1260_v62  ;;  %v8213_v62 = vld [vmem:[#allocation21_spill] sm:$0xff]  ;;  %vm3318_vm7 = vcmask 917248  }
 0x220   : > { %1484 = vrot.lane.b32.xlu0 %v5007_v10, %s4599_s25 }
 0x222   : > { %1464 = vrot.lane.b32.xlu2 %v4985_v61, %s4599_s25  ;;  %1486 = vrot.lane.b32.xlu1 %v5016_v13, %s4599_s25  ;;  %v1334_v46 = vpop.permute.xlu0 %1333 }
 0x223   : > { %1429 = vst.msk [vmem:[#allocation4 + $0x8] sm:$0xff] %vm1427_vm8, %v1334_v46 }
 0x224   : > { %v1332_v45 = vpop.permute.xlu2 %1331  ;;  %v1336_v7 = vpop.permute.xlu1 %1335 }
 0x225   : > { %1428 = vst.msk [vmem:[#allocation4] sm:$0xff] %vm1427_vm8, %v1332_v45  ;;  %v8214_v45 = vld [vmem:[#allocation27_spill] sm:$0xff] }
 0x226   : > { %1430 = vst.msk [vmem:[#allocation4 + $0x10] sm:$0xff] %vm1427_vm8, %v1336_v7 }
 0x228   : > { %1490 = vrot.lane.b32.xlu0 %v5034_v24, %s4599_s25 }
 0x22a   : > { %1470 = vrot.lane.b32.xlu2 %v4992_v3, %s4599_s25  ;;  %1492 = vrot.lane.b32.xlu1 %v5036_v25, %s4599_s25  ;;  %v1340_v10 = vpop.permute.xlu0 %1339 }
 0x22b   : > { %1432 = vst.msk [vmem:[#allocation4 + $0x20] sm:$0xff] %vm1427_vm8, %v1340_v10 }
 0x22c   : > { %v1338_v61 = vpop.permute.xlu2 %1337  ;;  %v1342_v13 = vpop.permute.xlu1 %1341 }
 0x22d   : > { %1431 = vst.msk [vmem:[#allocation4 + $0x18] sm:$0xff] %vm1427_vm8, %v1338_v61  ;;  %v8215_v61 = vld [vmem:[#allocation20_spill] sm:$0xff] }
 0x22e   : > { %1433 = vst.msk [vmem:[#allocation4 + $0x28] sm:$0xff] %vm1427_vm8, %v1342_v13 }
 0x230   : > { %1496 = vrot.lane.b32.xlu0 %v5083_v58, %s4599_s25 }
 0x232   : > { %1476 = vrot.lane.b32.xlu2 %v4930_v39, %s4599_s25  ;;  %1498 = vrot.lane.b32.xlu1 %v5093_v60, %s4599_s25  ;;  %v1346_v24 = vpop.permute.xlu0 %1345 }
 0x233   : > { %1435 = vst.msk [vmem:[#allocation4 + $0x38] sm:$0xff] %vm1427_vm8, %v1346_v24 }
 0x234   : > { %v1344_v3 = vpop.permute.xlu2 %1343  ;;  %v1348_v25 = vpop.permute.xlu1 %1347 }
 0x235   : > { %1434 = vst.msk [vmem:[#allocation4 + $0x30] sm:$0xff] %vm1427_vm8, %v1344_v3 }
 0x236   : > { %1436 = vst.msk [vmem:[#allocation4 + $0x40] sm:$0xff] %vm1427_vm8, %v1348_v25  ;;  %v8217_v25 = vld [vmem:[#allocation17_spill] sm:$0xff] }
 0x238   : > { %1502 = vrot.lane.b32.xlu0 %v5111_v21, %s4599_s25 }
 0x23a   : > { %1482 = vrot.lane.b32.xlu2 %v5074_v52, %s4599_s25  ;;  %1504 = vrot.lane.b32.xlu1 %v5116_v26, %s4599_s25  ;;  %v1352_v58 = vpop.permute.xlu0 %1351 }
 0x23b   : > { %1438 = vst.msk [vmem:[#allocation4 + $0x50] sm:$0xff] %vm1427_vm8, %v1352_v58 }
 0x23c   : > { %v1350_v39 = vpop.permute.xlu2 %1349  ;;  %v1354_v60 = vpop.permute.xlu1 %1353 }
 0x23d   : > { %1437 = vst.msk [vmem:[#allocation4 + $0x48] sm:$0xff] %vm1427_vm8, %v1350_v39 }
 0x23e   : > { %1439 = vst.msk [vmem:[#allocation4 + $0x58] sm:$0xff] %vm1427_vm8, %v1354_v60  ;;  %v1896_v60 = vld [vmem:[%s8219_s1 + $0x20] sm:$0xf] }
 0x23f   : > { %4304 = vmatpush.msk.msra.mxu0 %vm1998_vm10, %v1896_v60  ;;  %4374 = vmatpush.msk.msra.mxu3 %vm1998_vm10, %v1896_v60 }
 0x240   : > { %1508 = vrot.lane.b32.xlu0 %v5134_v56, %s4599_s25 }
 0x242   : > { %1488 = vrot.lane.b32.xlu2 %v5023_v17, %s4599_s25  ;;  %1510 = vrot.lane.b32.xlu1 %v5168_v32, %s4599_s25  ;;  %v1358_v21 = vpop.permute.xlu0 %1357 }
 0x243   : > { %1441 = vst.msk [vmem:[#allocation4 + $0x68] sm:$0xff] %vm1427_vm8, %v1358_v21 }
 0x244   : > { %v1356_v52 = vpop.permute.xlu2 %1355  ;;  %v1360_v26 = vpop.permute.xlu1 %1359 }
 0x245   : > { %1440 = vst.msk [vmem:[#allocation4 + $0x60] sm:$0xff] %vm1427_vm8, %v1356_v52  ;;  %v1895_v52 = vld [vmem:[%s8219_s1 + $0x18] sm:$0xff] }
 0x246   : > { %1442 = vst.msk [vmem:[#allocation4 + $0x70] sm:$0xff] %vm1427_vm8, %v1360_v26  ;;  %2014 = vmatpush.msra.mxu0 %v1895_v52  ;;  %4375 = vmatpush.msra.mxu3 %v1895_v52 }
 0x248   : > { %1514 = vrot.lane.b32.xlu0 %v5179_v54, %s4599_s25 }
 0x24a   : > { %1494 = vrot.lane.b32.xlu2 %v5155_v28, %s4599_s25  ;;  %1516 = vrot.lane.b32.xlu1 %v5186_v40, %s4599_s25  ;;  %v1364_v56 = vpop.permute.xlu0 %1363 }
 0x24b   : > { %1444 = vst.msk [vmem:[#allocation4 + $0x80] sm:$0xff] %vm1427_vm8, %v1364_v56  ;;  %v1894_v56 = vld [vmem:[%s8219_s1 + $0x10] sm:$0xff] }
 0x24c   : > { %v1362_v17 = vpop.permute.xlu2 %1361  ;;  %v1366_v32 = vpop.permute.xlu1 %1365  ;;  %2015 = vmatpush.msra.mxu0 %v1894_v56  ;;  %4376 = vmatpush.msra.mxu3 %v1894_v56 }
 0x24d   : > { %1443 = vst.msk [vmem:[#allocation4 + $0x78] sm:$0xff] %vm1427_vm8, %v1362_v17 }
 0x24e   : > { %1445 = vst.msk [vmem:[#allocation4 + $0x88] sm:$0xff] %vm1427_vm8, %v1366_v32  ;;  %v8221_v32 = vld [vmem:[#allocation30_spill] sm:$0xff] }
 0x250   : > { %1597 = vrot.lane.b32.xlu0 %v8176_v18, %s4600_s28 }
 0x252   : > { %1500 = vrot.lane.b32.xlu2 %v5103_v19, %s4599_s25  ;;  %1731 = vrot.lane.b32.xlu1 %v8196_v15, %s8107_s29  ;;  %v1370_v54 = vpop.permute.xlu0 %1369 }
 0x253   : > { %1447 = vst.msk [vmem:[#allocation4 + $0x98] sm:$0xff] %vm1427_vm8, %v1370_v54  ;;  %v8223_v54 = vld [vmem:[#allocation28_spill] sm:$0xff] }
 0x254   : > { %v1368_v40 = vpop.permute.xlu2 %1367  ;;  %v1372_v28 = vpop.permute.xlu1 %1371 }
 0x255   : > { %1446 = vst.msk [vmem:[#allocation4 + $0x90] sm:$0xff] %vm1427_vm8, %v1368_v40  ;;  %v8222_v40 = vld [vmem:[#allocation36_spill] sm:$0xff] }
 0x256   : > { %1448 = vst.msk [vmem:[#allocation4 + $0xa0] sm:$0xff] %vm1427_vm8, %v1372_v28 }
 0x258   : > { %1599 = vrot.lane.b32.xlu0 %v5045_v30, %s4600_s28 }
 0x25a   : > { %1506 = vrot.lane.b32.xlu2 %v5209_v44, %s4599_s25  ;;  %1733 = vrot.lane.b32.xlu1 %v8201_v0, %s8107_s29  ;;  %v1376_v18 = vpop.permute.xlu0 %1375 }
 0x25b   : > { %1450 = vst.msk [vmem:[#allocation4 + $0xb0] sm:$0xff] %vm1427_vm8, %v1376_v18 }
 0x25c   : > { %v1374_v19 = vpop.permute.xlu2 %1373  ;;  %v1378_v15 = vpop.permute.xlu1 %1377 }
 0x25d   : > { %1449 = vst.msk [vmem:[#allocation4 + $0xa8] sm:$0xff] %vm1427_vm8, %v1374_v19 }
 0x25e   : > { %1451 = vst.msk [vmem:[#allocation4 + $0xb8] sm:$0xff] %vm1427_vm8, %v1378_v15  ;;  %v8224_v15 = vld [vmem:[#allocation23_spill] sm:$0xff] }
 0x260   : > { %1601 = vrot.lane.b32.xlu0 %v4917_v36, %s4600_s28 }
 0x262   : > { %1512 = vrot.lane.b32.xlu2 %v5173_v57, %s4599_s25  ;;  %1735 = vrot.lane.b32.xlu1 %v5365_v22, %s8107_s29  ;;  %v1382_v44 = vpop.permute.xlu0 %1381 }
 0x263   : > { %1453 = vst.msk [vmem:[#allocation4 + $0xc8] sm:$0xff] %vm1427_vm8, %v1382_v44  ;;  %v8226_v44 = vld [vmem:[#allocation38_spill] sm:$0xff] }
 0x264   : > { %v1380_v30 = vpop.permute.xlu2 %1379  ;;  %v1384_v0 = vpop.permute.xlu1 %1383 }
 0x265   : > { %1452 = vst.msk [vmem:[#allocation4 + $0xc0] sm:$0xff] %vm1427_vm8, %v1380_v30  ;;  %v8225_v30 = vld [vmem:[#allocation29_spill] sm:$0xff] }
 0x266   : > { %1454 = vst.msk [vmem:[#allocation4 + $0xd0] sm:$0xff] %vm1427_vm8, %v1384_v0 }
 0x268   : > { %1737 = vrot.lane.b32.xlu0 %v8198_v37, %s8107_s29 }
 0x26a   : > { %1518 = vrot.lane.b32.xlu2 %v5592_v8, %s4599_s25  ;;  %1524 = vrot.lane.b32.xlu1 %v5932_v5, %s4599_s25  ;;  %v1388_v57 = vpop.permute.xlu0 %1387 }
 0x26b   : > { %1456 = vst.msk [vmem:[#allocation4 + $0xe0] sm:$0xff] %vm1427_vm8, %v1388_v57 }
 0x26c   : > { %v1386_v36 = vpop.permute.xlu2 %1385  ;;  %v1390_v22 = vpop.permute.xlu1 %1389 }
 0x26d   : > { %1455 = vst.msk [vmem:[#allocation4 + $0xd8] sm:$0xff] %vm1427_vm8, %v1386_v36 }
 0x26e   : > { %1457 = vst.msk [vmem:[#allocation4 + $0xe8] sm:$0xff] %vm1427_vm8, %v1390_v22  ;;  %v8227_v22 = vld [vmem:[#allocation25_spill] sm:$0xff] }
 0x270   : > { %1739 = vrot.lane.b32.xlu0 %v8202_v53, %s8107_s29 }
 0x272   : > { %1520 = vrot.lane.b32.xlu2 %v5631_v47, %s4599_s25  ;;  %1607 = vrot.lane.b32.xlu1 %v8173_v1, %s4600_s28  ;;  %v1394_v37 = vpop.permute.xlu0 %1393  ;;  %v8210_v1 = vld [vmem:[#allocation24_spill] sm:$0xff] }
 0x273   : > { %1459 = vst.msk [vmem:[#allocation4 + $0xf8] sm:$0xff] %vm1427_vm8, %v1394_v37 }
 0x274   : > { %v1392_v8 = vpop.permute.xlu2 %1391  ;;  %v1463_v51 = vpop.permute.xlu1 %1462 }
 0x275   : > { %1458 = vst.msk [vmem:[#allocation4 + $0xf0] sm:$0xff] %vm1427_vm8, %v1392_v8  ;;  %v8228_v8 = vld [vmem:[#allocation31_spill] sm:$0xff]  ;;  %vm3453_vm8 = vcmask 1048448  }
 0x276   : > { %1559 = vst.msk [vmem:[#allocation4] sm:$0xff] %vm1558_vm9, %v1463_v51 }
 0x278   : > { %1609 = vrot.lane.b32.xlu0 %v8182_v59, %s4600_s28 }
 0x27a   : > { %1522 = vrot.lane.b32.xlu2 %v5952_v23, %s4599_s25  ;;  %1611 = vrot.lane.b32.xlu1 %v8210_v1, %s4600_s28  ;;  %v1467_v53 = vpop.permute.xlu0 %1466  ;;  %s8105_s25 = smov 64  }
 0x27b   : > { %1561 = vst.msk [vmem:[#allocation4 + $0x10] sm:$0xff] %vm1558_vm9, %v1467_v53 }
 0x27c   : > { %v1465_v47 = vpop.permute.xlu2 %1464  ;;  %v1469_v27 = vpop.permute.xlu1 %1468 }
 0x27d   : > { %1560 = vst.msk [vmem:[#allocation4 + $0x8] sm:$0xff] %vm1558_vm9, %v1465_v47  ;;  %v8229_v47 = vld [vmem:[#allocation41_spill] sm:$0xff] }
 0x27e   : > { %1562 = vst.msk [vmem:[#allocation4 + $0x18] sm:$0xff] %vm1558_vm9, %v1469_v27 }
 0x280   : > { %1613 = vrot.lane.b32.xlu0 %v8212_v4, %s4600_s28  ;;  %v8231_v4 = vld [vmem:[#allocation35_spill] sm:$0xff] }
 0x282   : > { %1603 = vrot.lane.b32.xlu2 %v8211_v29, %s4600_s28  ;;  %1745 = vrot.lane.b32.xlu1 %v5327_v42, %s8107_s29  ;;  %v1473_v34 = vpop.permute.xlu0 %1472 }
 0x283   : > { %1564 = vst.msk [vmem:[#allocation4 + $0x28] sm:$0xff] %vm1558_vm9, %v1473_v34 }
 0x284   : > { %v1471_v59 = vpop.permute.xlu2 %1470  ;;  %v1475_v38 = vpop.permute.xlu1 %1474 }
 0x285   : > { %1563 = vst.msk [vmem:[#allocation4 + $0x20] sm:$0xff] %vm1558_vm9, %v1471_v59 }
 0x286   : > { %1565 = vst.msk [vmem:[#allocation4 + $0x30] sm:$0xff] %vm1558_vm9, %v1475_v38 }
 0x288   : > { %1617 = vrot.lane.b32.xlu0 %v8214_v45, %s4600_s28  ;;  %v6079_v45 = vld [vmem:[#allocation2 + $0x1a8] sm:$0x3] }
 0x28a   : > { %1605 = vrot.lane.b32.xlu2 %v8213_v62, %s4600_s28  ;;  %1747 = vrot.lane.b32.xlu1 %v5412_v12, %s8107_s29  ;;  %v1479_v42 = vpop.permute.xlu0 %1478 }
 0x28b   : > { %1567 = vst.msk [vmem:[#allocation4 + $0x40] sm:$0xff] %vm1558_vm9, %v1479_v42  ;;  %v8233_v42 = vld [vmem:[#allocation46_spill] sm:$0xff] }
 0x28c   : > { %v1477_v46 = vpop.permute.xlu2 %1476  ;;  %v1481_v7 = vpop.permute.xlu1 %1480 }
 0x28d   : > { %1566 = vst.msk [vmem:[#allocation4 + $0x38] sm:$0xff] %vm1558_vm9, %v1477_v46  ;;  %v1592_v46 = vrot.slane %v5952_v23, 1 }
 0x28e   : > { %1568 = vst.msk [vmem:[#allocation4 + $0x48] sm:$0xff] %vm1558_vm9, %v1481_v7  ;;  %v8234_v7 = vld [vmem:[#allocation18_spill] sm:$0xff] }
 0x290   : > { %1621 = vrot.lane.b32.xlu0 %v8215_v61, %s4600_s28  ;;  %v1593_v61 = vrot.slane %v5932_v5, 1 }
 0x292   : > { %1741 = vrot.lane.b32.xlu2 %v5388_v14, %s8107_s29  ;;  %1749 = vrot.lane.b32.xlu1 %v5345_v48, %s8107_s29  ;;  %v1485_v12 = vpop.permute.xlu0 %1484  ;;  %v8216_v14 = vld [vmem:[#allocation22_spill] sm:$0xff] }
 0x293   : > { %1570 = vst.msk [vmem:[#allocation4 + $0x58] sm:$0xff] %vm1558_vm9, %v1485_v12  ;;  %v1595_v12 = vrot.slane %v6079_v45, 1 }
 0x294   : > { %v1483_v10 = vpop.permute.xlu2 %1482  ;;  %v1487_v13 = vpop.permute.xlu1 %1486 }
 0x295   : > { %1569 = vst.msk [vmem:[#allocation4 + $0x50] sm:$0xff] %vm1558_vm9, %v1483_v10 }
 0x296   : > { %1571 = vst.msk [vmem:[#allocation4 + $0x60] sm:$0xff] %vm1558_vm9, %v1487_v13 }
 0x298   : > { %1751 = vrot.lane.b32.xlu0 %v8204_v2, %s8107_s29 }
 0x29a   : > { %1743 = vrot.lane.b32.xlu2 %v5324_v55, %s8107_s29  ;;  %1625 = vrot.lane.b32.xlu1 %v8216_v14, %s4600_s28  ;;  %v1491_v48 = vpop.permute.xlu0 %1490  ;;  %v8218_v55 = vld [vmem:[#allocation33_spill] sm:$0xff] }
 0x29b   : > { %1573 = vst.msk [vmem:[#allocation4 + $0x70] sm:$0xff] %vm1558_vm9, %v1491_v48  ;;  %v1594_v48 = vsel %vm640_vm1, %v1592_v46, %v1593_v61 }
 0x29c   : > { %v1489_v3 = vpop.permute.xlu2 %1488  ;;  %v1493_v24 = vpop.permute.xlu1 %1492 }
 0x29d   : > { %1572 = vst.msk [vmem:[#allocation4 + $0x68] sm:$0xff] %vm1558_vm9, %v1489_v3 }
 0x29e   : > { %1574 = vst.msk [vmem:[#allocation4 + $0x78] sm:$0xff] %vm1558_vm9, %v1493_v24  ;;  %v8235_v24 = vld [vmem:[#allocation32_spill] sm:$0xff] }
 0x2a0   : > { %1753 = vrot.lane.b32.xlu0 %v5437_v11, %s8107_s29  ;;  %v8220_v11 = vld [vmem:[#allocation19_spill] sm:$0xff] }
 0x2a2   : > { %1615 = vrot.lane.b32.xlu2 %v8217_v25, %s4600_s28  ;;  %1629 = vrot.lane.b32.xlu1 %v8218_v55, %s4600_s28  ;;  %v1497_v39 = vpop.permute.xlu0 %1496 }
 0x2a3   : > { %1576 = vst.msk [vmem:[#allocation4 + $0x88] sm:$0xff] %vm1558_vm9, %v1497_v39 }
 0x2a4   : > { %v1495_v2 = vpop.permute.xlu2 %1494  ;;  %v1499_v58 = vpop.permute.xlu1 %1498 }
 0x2a5   : > { %1575 = vst.msk [vmem:[#allocation4 + $0x80] sm:$0xff] %vm1558_vm9, %v1495_v2 }
 0x2a6   : > { %1577 = vst.msk [vmem:[#allocation4 + $0x90] sm:$0xff] %vm1558_vm9, %v1499_v58  ;;  %v8236_v58 = vld [vmem:[#allocation34_spill] sm:$0xff] }
 0x2a8   : > { %1755 = vrot.lane.b32.xlu0 %v5368_v31, %s8107_s29  ;;  %v1893_v31 = vld [vmem:[%s8219_s1 + $0x8] sm:$0xff] }
 0x2a9   : > { %2016 = vmatpush.msra.mxu0 %v1893_v31  ;;  %4377 = vmatpush.msra.mxu3 %v1893_v31 }
 0x2aa   : > { %1619 = vrot.lane.b32.xlu2 %v8220_v11, %s4600_s28  ;;  %1633 = vrot.lane.b32.xlu1 %v8194_v33, %s4600_s28  ;;  %v1503_v26 = vpop.permute.xlu0 %1502  ;;  %v1892_v33 = vld [vmem:[%s8219_s1] sm:$0xff] }
 0x2ab   : > { %1579 = vst.msk [vmem:[#allocation4 + $0xa0] sm:$0xff] %vm1558_vm9, %v1503_v26  ;;  %2017 = vmatpush.msra.mxu0 %v1892_v33  ;;  %4378 = vmatpush.msra.mxu3 %v1892_v33 }
 0x2ac   : > { %v1501_v21 = vpop.permute.xlu2 %1500  ;;  %v1505_v17 = vpop.permute.xlu1 %1504 }
 0x2ad   : > { %1578 = vst.msk [vmem:[#allocation4 + $0x98] sm:$0xff] %vm1558_vm9, %v1501_v21  ;;  %v8237_v21 = vld [vmem:[#allocation14_spill] sm:$0xff] }
 0x2ae   : > { %1580 = vst.msk [vmem:[#allocation4 + $0xa8] sm:$0xff] %vm1558_vm9, %v1505_v17 }
 0x2b0   : > { %1635 = vrot.lane.b32.xlu0 %v8222_v40, %s4600_s28  ;;  %v8239_v40 = vld [vmem:[#allocation50_spill] sm:$0xff] }
 0x2b2   : > { %1623 = vrot.lane.b32.xlu2 %v8221_v32, %s4600_s28  ;;  %1637 = vrot.lane.b32.xlu1 %v8223_v54, %s4600_s28  ;;  %v1509_v19 = vpop.permute.xlu0 %1508 }
 0x2b3   : > { %1582 = vst.msk [vmem:[#allocation4 + $0xb8] sm:$0xff] %vm1558_vm9, %v1509_v19  ;;  %v8240_v19 = vld [vmem:[#allocation53_spill] sm:$0xff] }
 0x2b4   : > { %v1507_v28 = vpop.permute.xlu2 %1506  ;;  %v1511_v18 = vpop.permute.xlu1 %1510 }
 0x2b5   : > { %1581 = vst.msk [vmem:[#allocation4 + $0xb0] sm:$0xff] %vm1558_vm9, %v1507_v28 }
 0x2b6   : > { %1583 = vst.msk [vmem:[#allocation4 + $0xc0] sm:$0xff] %vm1558_vm9, %v1511_v18 }
 0x2b8   : > { %1639 = vrot.lane.b32.xlu0 %v8225_v30, %s4600_s28 }
 0x2ba   : > { %1627 = vrot.lane.b32.xlu2 %v8224_v15, %s4600_s28  ;;  %1641 = vrot.lane.b32.xlu1 %v8226_v44, %s4600_s28  ;;  %v1515_v36 = vpop.permute.xlu0 %1514 }
 0x2bb   : > { %1585 = vst.msk [vmem:[#allocation4 + $0xd0] sm:$0xff] %vm1558_vm9, %v1515_v36 }
 0x2bc   : > { %v1513_v0 = vpop.permute.xlu2 %1512  ;;  %v1517_v57 = vpop.permute.xlu1 %1516 }
 0x2bd   : > { %1584 = vst.msk [vmem:[#allocation4 + $0xc8] sm:$0xff] %vm1558_vm9, %v1513_v0  ;;  %v8241_v0 = vld [vmem:[#allocation54_spill] sm:$0xff] }
 0x2be   : > { %1586 = vst.msk [vmem:[#allocation4 + $0xd8] sm:$0xff] %vm1558_vm9, %v1517_v57 }
 0x2c0   : > { %1643 = vrot.lane.b32.xlu0 %v8228_v8, %s4600_s28 }
 0x2c2   : > { %1631 = vrot.lane.b32.xlu2 %v8227_v22, %s4600_s28  ;;  %1763 = vrot.lane.b32.xlu1 %v8207_v6, %s8107_s29  ;;  %v1598_v51 = vpop.permute.xlu0 %1597 }
 0x2c3   : > { %1694 = vst.msk [vmem:[#allocation4] sm:$0xff] %vm1693_vm11, %v1598_v51 }
 0x2c4   : > { %v1519_v37 = vpop.permute.xlu2 %1518  ;;  %v1732_v1 = vpop.permute.xlu1 %1731 }
 0x2c5   : > { %1587 = vst.msk [vmem:[#allocation4 + $0xe0] sm:$0xff] %vm1558_vm9, %v1519_v37 }
 0x2c6   : > { %1828 = vst.msk [vmem:[#allocation4] sm:$0xff] %vm1827_vm12, %v1732_v1 }
 0x2c8   : > { %1647 = vrot.lane.b32.xlu0 %v8229_v47, %s4600_s28 }
 0x2ca   : > { %1757 = vrot.lane.b32.xlu2 %v8206_v35, %s8107_s29  ;;  %1765 = vrot.lane.b32.xlu1 %v5482_v50, %s8107_s29  ;;  %v1600_v53 = vpop.permute.xlu0 %1599  ;;  %v8230_v35 = vld [vmem:[#allocation52_spill] sm:$0xff] }
 0x2cb   : > { %1695 = vst.msk [vmem:[#allocation4 + $0x8] sm:$0xff] %vm1693_vm11, %v1600_v53  ;;  %v8232_v50 = vld [vmem:[#allocation48_spill] sm:$0xff] }
 0x2cc   : > { %v1521_v6 = vpop.permute.xlu2 %1520  ;;  %v1734_v27 = vpop.permute.xlu1 %1733 }
 0x2cd   : > { %1588 = vst.msk [vmem:[#allocation4 + $0xe8] sm:$0xff] %vm1558_vm9, %v1521_v6  ;;  %v1860_v29 = vld [vmem:[#allocation4] sm:$0xff] }
 0x2ce   : > { %1829 = vst.msk [vmem:[#allocation4 + $0x8] sm:$0xff] %vm1827_vm12, %v1734_v27  ;;  %4305 = vmatmul.msk.f32.vlgmr.msra.gmra.mxu0 %vm1901_vm13, %v1860_v29 }
 0x2d0   : > { %1651 = vrot.lane.b32.xlu0 %v8231_v4, %s4600_s28 }
 0x2d2   : > { %1759 = vrot.lane.b32.xlu2 %v8230_v35, %s8107_s29  ;;  %1767 = vrot.lane.b32.xlu1 %v8232_v50, %s8107_s29  ;;  %v1602_v34 = vpop.permute.xlu0 %1601 }
 0x2d3   : > { %1696 = vst.msk [vmem:[#allocation4 + $0x10] sm:$0xff] %vm1693_vm11, %v1602_v34  ;;  %v8242_v34 = vmov 0.0  }
 0x2d4   : > { %v1523_v59 = vpop.permute.xlu2 %1522  ;;  %v1736_v38 = vpop.permute.xlu1 %1735  ;;  %2184 = vst.msk [vmem:[#allocation3 + $0x18] sm:$0xff] %vm2147_vm14, %v8242_v34 }
 0x2d5   : > { %1589 = vst.msk [vmem:[#allocation4 + $0xf0] sm:$0xff] %vm1558_vm9, %v1523_v59  ;;  %v1861_v62 = vld [vmem:[#allocation4 + $0x8] sm:$0xff] }
 0x2d6   : > { %1830 = vst.msk [vmem:[#allocation4 + $0x10] sm:$0xff] %vm1827_vm12, %v1736_v38  ;;  %4306 = vmatmul.msk.f32.gmra.mxu0 %vm1901_vm13, %v1861_v62 }
 0x2d7   : > { %2185 = vst.msk [vmem:[#allocation3 + $0x20] sm:$0xff] %vm2147_vm14, %v8242_v34 }
 0x2d8   : > { %1769 = vrot.lane.b32.xlu0 %v8208_v63, %s8107_s29  ;;  %v1596_v63 = vsel %vm640_vm1, %v1593_v61, %v1595_v12  ;;  %2180 = vst.msk [vmem:[#allocation3] sm:$0xff] %vm2147_vm14, %v8242_v34 }
 0x2d9   : > { %2181 = vst.msk [vmem:[#allocation3 + $0x8] sm:$0xff] %vm2147_vm14, %v8242_v34 }
 0x2da   : > { %1761 = vrot.lane.b32.xlu2 %v8233_v42, %s8107_s29  ;;  %1655 = vrot.lane.b32.xlu1 %v8234_v7, %s4600_s28  ;;  %v1738_v13 = vpop.permute.xlu0 %1737  ;;  %2187 = vst.msk [vmem:[#allocation3 + $0x30] sm:$0xff] %vm2147_vm14, %v8242_v34 }
 0x2db   : > { %2188 = vst.msk [vmem:[#allocation3 + $0x38] sm:$0xff] %vm2147_vm14, %v8242_v34 }
 0x2dc   : > { %v1604_v10 = vpop.permute.xlu2 %1603  ;;  %v1525_v14 = vpop.permute.xlu1 %1524  ;;  %2190 = vst.msk [vmem:[#allocation3 + $0x48] sm:$0xff] %vm2147_vm14, %v8242_v34 }
 0x2dd   : > { %1697 = vst.msk [vmem:[#allocation4 + $0x18] sm:$0xff] %vm1693_vm11, %v1604_v10  ;;  %v1862_v3 = vld [vmem:[#allocation4 + $0x10] sm:$0xff] }
 0x2de   : > { %1831 = vst.msk [vmem:[#allocation4 + $0x18] sm:$0xff] %vm1827_vm12, %v1738_v13  ;;  %4307 = vmatmul.msk.f32.gmra.mxu0 %vm1901_vm13, %v1862_v3 }
 0x2df   : > { %1590 = vst.msk [vmem:[#allocation4 + $0xf8] sm:$0xff] %vm1558_vm9, %v1525_v14  ;;  %vm3995_vm9 = vcmask 523264  }
 0x2e0   : > { %1771 = vrot.lane.b32.xlu0 %v5498_v49, %s8107_s29  ;;  %2191 = vst.msk [vmem:[#allocation3 + $0x50] sm:$0xff] %vm2147_vm14, %v8242_v34 }
 0x2e1   : > { %2193 = vst.msk [vmem:[#allocation3 + $0x60] sm:$0xff] %vm2147_vm14, %v8242_v34 }
 0x2e2   : > { %1645 = vrot.lane.b32.xlu2 %v8235_v24, %s4600_s28  ;;  %1659 = vrot.lane.b32.xlu1 %v1596_v63, %s4600_s28  ;;  %v1740_v55 = vpop.permute.xlu0 %1739  ;;  %2194 = vst.msk [vmem:[#allocation3 + $0x68] sm:$0xff] %vm2147_vm14, %v8242_v34  ;;  %v6211_v63 = vld [vmem:[%s8243_s2] ss:$0 sm:$0xff] }
 0x2e3   : > { %2196 = vst.msk [vmem:[#allocation3 + $0x78] sm:$0xff] %vm2147_vm14, %v8242_v34 }
 0x2e4   : > { %v1606_v25 = vpop.permute.xlu2 %1605  ;;  %v1608_v39 = vpop.permute.xlu1 %1607  ;;  %2197 = vst.msk [vmem:[#allocation3 + $0x80] sm:$0xff] %vm2147_vm14, %v8242_v34 }
 0x2e5   : > { %1698 = vst.msk [vmem:[#allocation4 + $0x20] sm:$0xff] %vm1693_vm11, %v1606_v25  ;;  %v1863_v2 = vld [vmem:[#allocation4 + $0x18] sm:$0xff] }
 0x2e6   : > { %1832 = vst.msk [vmem:[#allocation4 + $0x20] sm:$0xff] %vm1827_vm12, %v1740_v55  ;;  %4308 = vmatmul.msk.f32.gmra.mxu0 %vm1901_vm13, %v1863_v2  ;;  %v1727_v2 = vrot.slane %v5932_v5, 2  ;;  %v1729_v5 = vrot.slane %v6079_v45, 2 }
 0x2e7   : > { %1699 = vst.msk [vmem:[#allocation4 + $0x28] sm:$0xff] %vm1693_vm11, %v1608_v39 }
 0x2e8   : > { %1775 = vrot.lane.b32.xlu0 %v8209_v20, %s8107_s29  ;;  %2199 = vst.msk [vmem:[#allocation3 + $0x90] sm:$0xff] %vm2147_vm14, %v8242_v34 }
 0x2e9   : > { %2200 = vst.msk [vmem:[#allocation3 + $0x98] sm:$0xff] %vm2147_vm14, %v8242_v34 }
 0x2ea   : > { %1649 = vrot.lane.b32.xlu2 %v8236_v58, %s4600_s28  ;;  %1777 = vrot.lane.b32.xlu1 %v5511_v16, %s8107_s29  ;;  %v1610_v60 = vpop.permute.xlu0 %1609  ;;  %v8238_v16 = vld [vmem:[#allocation55_spill] sm:$0xff]  ;;  %2202 = vst.msk [vmem:[#allocation3 + $0xa8] sm:$0xff] %vm2147_vm14, %v8242_v34 }
 0x2eb   : > { %1700 = vst.msk [vmem:[#allocation4 + $0x30] sm:$0xff] %vm1693_vm11, %v1610_v60  ;;  %v6238_v60 = vld [vmem:[#allocation3 + $0x8] sm:$0xff] }
 0x2ec   : > { %v1742_v49 = vpop.permute.xlu2 %1741  ;;  %v1612_v52 = vpop.permute.xlu1 %1611  ;;  %2203 = vst.msk [vmem:[#allocation3 + $0xb0] sm:$0xff] %vm2147_vm14, %v8242_v34 }
 0x2ed   : > { %1833 = vst.msk [vmem:[#allocation4 + $0x28] sm:$0xff] %vm1827_vm12, %v1742_v49  ;;  %v1864_v11 = vld [vmem:[#allocation4 + $0x20] sm:$0xff]  ;;  %v6236_v49 = vld [vmem:[#allocation3] sm:$0xff] }
 0x2ee   : > { %4309 = vmatmul.msk.f32.gmra.mxu0 %vm1901_vm13, %v1864_v11  ;;  %1701 = vst.msk [vmem:[#allocation4 + $0x38] sm:$0xff] %vm1693_vm11, %v1612_v52  ;;  %v2402_v11 = vrot.slane %v6236_v49, 1  ;;  %v2403_v52 = vrot.slane %v6238_v60, 1 }
 0x2ef   : > { %2205 = vst.msk [vmem:[#allocation3 + $0xc0] sm:$0xff] %vm2147_vm14, %v8242_v34 }
 0x2f0   : > { %1781 = vrot.lane.b32.xlu0 %v5465_v43, %s8107_s29  ;;  %2206 = vst.msk [vmem:[#allocation3 + $0xc8] sm:$0xff] %vm2147_vm14, %v8242_v34 }
 0x2f1   : > { %2208 = vst.msk [vmem:[#allocation3 + $0xd8] sm:$0xff] %vm2147_vm14, %v8242_v34 }
 0x2f2   : > { %1653 = vrot.lane.b32.xlu2 %v8237_v21, %s4600_s28  ;;  %1783 = vrot.lane.b32.xlu1 %v8238_v16, %s8107_s29  ;;  %v1614_v17 = vpop.permute.xlu0 %1613  ;;  %2209 = vst.msk [vmem:[#allocation3 + $0xe0] sm:$0xff] %vm2147_vm14, %v8242_v34  ;;  %v1730_v21 = vsel %vm850_vm4, %v1727_v2, %v1729_v5  ;;  %v2404_v16 = vsel %vm640_vm1, %v2402_v11, %v2403_v52 }
 0x2f3   : > { %1702 = vst.msk [vmem:[#allocation4 + $0x40] sm:$0xff] %vm1693_vm11, %v1614_v17  ;;  %v1726_v17 = vrot.slane %v5952_v23, 2 }
 0x2f4   : > { %v1744_v20 = vpop.permute.xlu2 %1743  ;;  %v1865_v26 = vld [vmem:[#allocation4 + $0x28] sm:$0xff]  ;;  %v1746_v56 = vpop.permute.xlu1 %1745  ;;  %2211 = vst.msk [vmem:[#allocation3 + $0xf0] sm:$0xff] %vm2147_vm14, %v8242_v34 }
 0x2f5   : > { %1834 = vst.msk [vmem:[#allocation4 + $0x30] sm:$0xff] %vm1827_vm12, %v1744_v20 }
 0x2f6   : > { %4310 = vmatmul.msk.f32.gmra.mxu0 %vm1901_vm13, %v1865_v26  ;;  %1835 = vst.msk [vmem:[#allocation4 + $0x38] sm:$0xff] %vm1827_vm12, %v1746_v56 }
 0x2f7   : > { %2212 = vst.msk [vmem:[#allocation3 + $0xf8] sm:$0xff] %vm2147_vm14, %v8242_v34 }
 0x2f8   : > { %1787 = vrot.lane.b32.xlu0 %v5840_v41, %s8107_s29  ;;  %2214 = vst.msk [vmem:[#allocation3 + $0x108] sm:$0xff] %vm2147_vm14, %v8242_v34 }
 0x2f9   : > { %2215 = vst.msk [vmem:[#allocation3 + $0x110] sm:$0xff] %vm2147_vm14, %v8242_v34 }
 0x2fa   : > { %1657 = vrot.lane.b32.xlu2 %v1594_v48, %s4600_s28  ;;  %1789 = vrot.lane.b32.xlu1 %v5809_v9, %s8107_s29  ;;  %v1618_v33 = vpop.permute.xlu0 %1617  ;;  %2217 = vst.msk [vmem:[#allocation3 + $0x120] sm:$0xff] %vm2147_vm14, %v8242_v34  ;;  %s4607_s28 = smov 118  }
 0x2fb   : > { %1704 = vst.msk [vmem:[#allocation4 + $0x50] sm:$0xff] %vm1693_vm11, %v1618_v33 }
 0x2fc   : > { %v1866_v43 = vld [vmem:[#allocation4 + $0x30] sm:$0xff]  ;;  %v1616_v31 = vpop.permute.xlu2 %1615  ;;  %v1748_v32 = vpop.permute.xlu1 %1747  ;;  %2218 = vst.msk [vmem:[#allocation3 + $0x128] sm:$0xff] %vm2147_vm14, %v8242_v34 }
 0x2fd   : > { %1703 = vst.msk [vmem:[#allocation4 + $0x48] sm:$0xff] %vm1693_vm11, %v1616_v31  ;;  %v1867_v54 = vld [vmem:[#allocation4 + $0x38] sm:$0xff] }
 0x2fe   : > { %4311 = vmatmul.msk.f32.gmra.mxu0 %vm1901_vm13, %v1866_v43  ;;  %1836 = vst.msk [vmem:[#allocation4 + $0x40] sm:$0xff] %vm1827_vm12, %v1748_v32  ;;  %v1728_v32 = vsel %vm850_vm4, %v1726_v17, %v1727_v2 }
 0x2ff   : > { %2220 = vst.msk [vmem:[#allocation3 + $0x138] sm:$0xff] %vm2147_vm14, %v8242_v34 }
 0x300   : > { %1793 = vrot.lane.b32.xlu0 %v1730_v21, %s8107_s29  ;;  %2221 = vst.msk [vmem:[#allocation3 + $0x140] sm:$0xff] %vm2147_vm14, %v8242_v34 }
 0x301   : > { %2223 = vst.msk [vmem:[#allocation3 + $0x150] sm:$0xff] %vm2147_vm14, %v8242_v34 }
 0x302   : > { %1773 = vrot.lane.b32.xlu2 %v8239_v40, %s8107_s29  ;;  %v1622_v28 = vpop.permute.xlu0 %1621  ;;  %2482 = vrot.lane.b32.xlu1 %v2404_v16, %s4597_s20  ;;  %2224 = vst.msk [vmem:[#allocation3 + $0x158] sm:$0xff] %vm2147_vm14, %v8242_v34 }
 0x303   : > { %1706 = vst.msk [vmem:[#allocation4 + $0x60] sm:$0xff] %vm1693_vm11, %v1622_v28 }
 0x304   : > { %v1620_v41 = vpop.permute.xlu2 %1619  ;;  %v1750_v9 = vpop.permute.xlu1 %1749  ;;  %2226 = vst.msk [vmem:[#allocation3 + $0x168] sm:$0xff] %vm2147_vm14, %v8242_v34 }
 0x305   : > { %1705 = vst.msk [vmem:[#allocation4 + $0x58] sm:$0xff] %vm1693_vm11, %v1620_v41  ;;  %v1868_v18 = vld [vmem:[#allocation4 + $0x40] sm:$0xff] }
 0x306   : > { %4312 = vmatmul.msk.f32.gmra.mxu0 %vm1901_vm13, %v1867_v54  ;;  %1837 = vst.msk [vmem:[#allocation4 + $0x48] sm:$0xff] %vm1827_vm12, %v1750_v9 }
 0x307   : > { %2227 = vst.msk [vmem:[#allocation3 + $0x170] sm:$0xff] %vm2147_vm14, %v8242_v34 }
 0x308   : > { %2229 = vst.msk [vmem:[#allocation3 + $0x180] sm:$0xff] %vm2147_vm14, %v8242_v34 }
 0x309   : > { %2230 = vst.msk [vmem:[#allocation3 + $0x188] sm:$0xff] %vm2147_vm14, %v8242_v34 }
 0x30a   : > { %1779 = vrot.lane.b32.xlu2 %v8240_v19, %s8107_s29  ;;  %v1752_v30 = vpop.permute.xlu0 %1751  ;;  %2232 = vst.msk [vmem:[#allocation3 + $0x198] sm:$0xff] %vm2147_vm14, %v8242_v34 }
 0x30b   : > { %1838 = vst.msk [vmem:[#allocation4 + $0x50] sm:$0xff] %vm1827_vm12, %v1752_v30 }
 0x30c   : > { %v1624_v15 = vpop.permute.xlu2 %1623  ;;  %v1626_v44 = vpop.permute.xlu1 %1625  ;;  %2233 = vst.msk [vmem:[#allocation3 + $0x1a0] sm:$0xff] %vm2147_vm14, %v8242_v34 }
 0x30d   : > { %1707 = vst.msk [vmem:[#allocation4 + $0x68] sm:$0xff] %vm1693_vm11, %v1624_v15  ;;  %v1869_v36 = vld [vmem:[#allocation4 + $0x48] sm:$0xff] }
 0x30e   : > { %4313 = vmatmul.msk.f32.gmra.mxu0 %vm1901_vm13, %v1868_v18  ;;  %1708 = vst.msk [vmem:[#allocation4 + $0x70] sm:$0xff] %vm1693_vm11, %v1626_v44 }
 0x30f   : > { %2186 = vst.msk [vmem:[#allocation3 + $0x28] sm:$0x3] %vm2182_vm15, %v8242_v34 }
 0x310   : > { %2183 = vst.msk [vmem:[#allocation3 + $0x10] sm:$0x3] %vm2182_vm15, %v8242_v34 }
 0x311   : > { %2189 = vst.msk [vmem:[#allocation3 + $0x40] sm:$0x3] %vm2182_vm15, %v8242_v34 }
 0x312   : > { %1785 = vrot.lane.b32.xlu2 %v8241_v0, %s8107_s29  ;;  %v1754_v22 = vpop.permute.xlu0 %1753  ;;  %v1870_v47 = vld [vmem:[#allocation4 + $0x50] sm:$0xff]  ;;  %2192 = vst.msk [vmem:[#allocation3 + $0x58] sm:$0x3] %vm2182_vm15, %v8242_v34 }
 0x313   : > { %1839 = vst.msk [vmem:[#allocation4 + $0x58] sm:$0xff] %vm1827_vm12, %v1754_v22 }
 0x314   : > { %v1628_v57 = vpop.permute.xlu2 %1627  ;;  %v1630_v8 = vpop.permute.xlu1 %1629  ;;  %2195 = vst.msk [vmem:[#allocation3 + $0x70] sm:$0x3] %vm2182_vm15, %v8242_v34 }
 0x315   : > { %1709 = vst.msk [vmem:[#allocation4 + $0x78] sm:$0xff] %vm1693_vm11, %v1628_v57 }
 0x316   : > { %4314 = vmatmul.msk.f32.gmra.mxu0 %vm1901_vm13, %v1869_v36  ;;  %1710 = vst.msk [vmem:[#allocation4 + $0x80] sm:$0xff] %vm1693_vm11, %v1630_v8 }
 0x317   : > { %2198 = vst.msk [vmem:[#allocation3 + $0x88] sm:$0x3] %vm2182_vm15, %v8242_v34  ;;  %v2270_v36 = vld [vmem:[#allocation3 + $0x10] sm:$0x3] }
 0x318   : > { %2201 = vst.msk [vmem:[#allocation3 + $0xa0] sm:$0x3] %vm2182_vm15, %v8242_v34  ;;  %v2405_v57 = vrot.slane %v2270_v36, 1 }
 0x319   : > { %2204 = vst.msk [vmem:[#allocation3 + $0xb8] sm:$0x3] %vm2182_vm15, %v8242_v34 }
 0x31a   : > { %v1756_v51 = vpop.permute.xlu0 %1755  ;;  %v1871_v29 = vld [vmem:[#allocation4 + $0x58] sm:$0xff]  ;;  %1791 = vrot.lane.b32.xlu2 %v1728_v32, %s8107_s29  ;;  %2207 = vst.msk [vmem:[#allocation3 + $0xd0] sm:$0x3] %vm2182_vm15, %v8242_v34 }
 0x31b   : > { %1840 = vst.msk [vmem:[#allocation4 + $0x60] sm:$0xff] %vm1827_vm12, %v1756_v51 }
 0x31c   : > { %v1632_v37 = vpop.permute.xlu2 %1631  ;;  %v1634_v1 = vpop.permute.xlu1 %1633  ;;  %2210 = vst.msk [vmem:[#allocation3 + $0xe8] sm:$0x3] %vm2182_vm15, %v8242_v34 }
 0x31d   : > { %1711 = vst.msk [vmem:[#allocation4 + $0x88] sm:$0xff] %vm1693_vm11, %v1632_v37 }
 0x31e   : > { %4315 = vmatmul.msk.f32.gmra.mxu0 %vm1901_vm13, %v1870_v47  ;;  %1712 = vst.msk [vmem:[#allocation4 + $0x90] sm:$0xff] %vm1693_vm11, %v1634_v1  ;;  %v2406_v1 = vsel %vm640_vm1, %v2403_v52, %v2405_v57  ;;  %v3636_v47 = vld [vmem:[%s8244_s3 + $0x88] sm:$0xff] }
 0x31f   : > { %2213 = vst.msk [vmem:[#allocation3 + $0x100] sm:$0x3] %vm2182_vm15, %v8242_v34  ;;  %3864 = vmatpush.msra.mxu2 %v3636_v47 }
 0x320   : > { %2216 = vst.msk [vmem:[#allocation3 + $0x118] sm:$0x3] %vm2182_vm15, %v8242_v34 }
 0x321   : > { %2219 = vst.msk [vmem:[#allocation3 + $0x130] sm:$0x3] %vm2182_vm15, %v8242_v34 }
 0x322   : > { %v1636_v53 = vpop.permute.xlu0 %1635  ;;  %v1872_v59 = vld [vmem:[#allocation4 + $0x60] sm:$0xff]  ;;  %2484 = vrot.lane.b32.xlu2 %v2406_v1, %s4597_s20  ;;  %2222 = vst.msk [vmem:[#allocation3 + $0x148] sm:$0x3] %vm2182_vm15, %v8242_v34 }
 0x323   : > { %1713 = vst.msk [vmem:[#allocation4 + $0x98] sm:$0xff] %vm1693_vm11, %v1636_v53 }
 0x324   : > { %v1758_v6 = vpop.permute.xlu2 %1757  ;;  %v1638_v27 = vpop.permute.xlu1 %1637  ;;  %2225 = vst.msk [vmem:[#allocation3 + $0x160] sm:$0x3] %vm2182_vm15, %v8242_v34 }
 0x325   : > { %1841 = vst.msk [vmem:[#allocation4 + $0x68] sm:$0xff] %vm1827_vm12, %v1758_v6 }
 0x326   : > { %4316 = vmatmul.msk.f32.gmra.mxu0 %vm1901_vm13, %v1871_v29  ;;  %1714 = vst.msk [vmem:[#allocation4 + $0xa0] sm:$0xff] %vm1693_vm11, %v1638_v27 }
 0x327   : > { %2228 = vst.msk [vmem:[#allocation3 + $0x178] sm:$0x3] %vm2182_vm15, %v8242_v34 }
 0x328   : > { %2231 = vst.msk [vmem:[#allocation3 + $0x190] sm:$0x3] %vm2182_vm15, %v8242_v34 }
 0x329   : > { %2234 = vst.msk [vmem:[#allocation3 + $0x1a8] sm:$0x3] %vm2182_vm15, %v8242_v34 }
 0x32a   : > { %v1640_v4 = vpop.permute.xlu0 %1639  ;;  %2322 = vst.msk [vmem:[#allocation5] sm:$0xff] %vm2147_vm14, %v6236_v49 }
 0x32b   : > { %1715 = vst.msk [vmem:[#allocation4 + $0xa8] sm:$0xff] %vm1693_vm11, %v1640_v4 }
 0x32c   : > { %v1760_v35 = vpop.permute.xlu2 %1759  ;;  %v1642_v50 = vpop.permute.xlu1 %1641  ;;  %v1873_v38 = vld [vmem:[#allocation4 + $0x68] sm:$0xff]  ;;  %2323 = vst.msk [vmem:[#allocation5 + $0x10] sm:$0xff] %vm2147_vm14, %v6238_v60 }
 0x32d   : > { %1842 = vst.msk [vmem:[#allocation4 + $0x70] sm:$0xff] %vm1827_vm12, %v1760_v35  ;;  %v3635_v35 = vld [vmem:[%s8244_s3 + $0x80] sm:$0xff] }
 0x32e   : > { %4317 = vmatmul.msk.f32.gmra.mxu0 %vm1901_vm13, %v1872_v59  ;;  %1716 = vst.msk [vmem:[#allocation4 + $0xb0] sm:$0xff] %vm1693_vm11, %v1642_v50  ;;  %3865 = vmatpush.msra.mxu2 %v3635_v35 }
 0x332   : > { %v1644_v46 = vpop.permute.xlu0 %1643 }
 0x333   : > { %1717 = vst.msk [vmem:[#allocation4 + $0xb8] sm:$0xff] %vm1693_vm11, %v1644_v46 }
 0x334   : > { %v1762_v62 = vpop.permute.xlu2 %1761  ;;  %v1764_v42 = vpop.permute.xlu1 %1763  ;;  %v1874_v7 = vld [vmem:[#allocation4 + $0x70] sm:$0xff] }
 0x335   : > { %1843 = vst.msk [vmem:[#allocation4 + $0x78] sm:$0xff] %vm1827_vm12, %v1762_v62 }
 0x336   : > { %4318 = vmatmul.msk.f32.gmra.mxu0 %vm1901_vm13, %v1873_v38  ;;  %1844 = vst.msk [vmem:[#allocation4 + $0x80] sm:$0xff] %vm1827_vm12, %v1764_v42 }
 0x33a   : > { %v1648_v10 = vpop.permute.xlu0 %1647 }
 0x33b   : > { %1719 = vst.msk [vmem:[#allocation4 + $0xc8] sm:$0xff] %vm1693_vm11, %v1648_v10 }
 0x33c   : > { %v1646_v61 = vpop.permute.xlu2 %1645  ;;  %v1766_v12 = vpop.permute.xlu1 %1765  ;;  %v1875_v13 = vld [vmem:[#allocation4 + $0x78] sm:$0xff] }
 0x33d   : > { %1718 = vst.msk [vmem:[#allocation4 + $0xc0] sm:$0xff] %vm1693_vm11, %v1646_v61  ;;  %v1876_v39 = vld [vmem:[#allocation4 + $0x80] sm:$0xff] }
 0x33e   : > { %4319 = vmatmul.msk.f32.gmra.mxu0 %vm1901_vm13, %v1874_v7  ;;  %1845 = vst.msk [vmem:[#allocation4 + $0x88] sm:$0xff] %vm1827_vm12, %v1766_v12 }
 0x342   : > { %v1652_v3 = vpop.permute.xlu0 %1651 }
 0x343   : > { %1721 = vst.msk [vmem:[#allocation4 + $0xd8] sm:$0xff] %vm1693_vm11, %v1652_v3 }
 0x344   : > { %v1650_v14 = vpop.permute.xlu2 %1649  ;;  %v1768_v48 = vpop.permute.xlu1 %1767 }
 0x345   : > { %1720 = vst.msk [vmem:[#allocation4 + $0xd0] sm:$0xff] %vm1693_vm11, %v1650_v14  ;;  %v1877_v20 = vld [vmem:[#allocation4 + $0x88] sm:$0xff] }
 0x346   : > { %4320 = vmatmul.msk.f32.gmra.mxu0 %vm1901_vm13, %v1875_v13  ;;  %1846 = vst.msk [vmem:[#allocation4 + $0x90] sm:$0xff] %vm1827_vm12, %v1768_v48 }
 0x34a   : > { %v1770_v25 = vpop.permute.xlu0 %1769 }
 0x34b   : > { %v2019_v24 = vpop.f32.mrf.mxu0  ;;  %1847 = vst.msk [vmem:[#allocation4 + $0x98] sm:$0xff] %vm1827_vm12, %v1770_v25 }
 0x34c   : > { %v2020_v55 = vadd.f32 %v6211_v63, %v2019_v24  ;;  %v1654_v43 = vpop.permute.xlu2 %1653  ;;  %v1656_v40 = vpop.permute.xlu1 %1655 }
 0x34d   : > { %v1878_v31 = vld [vmem:[#allocation4 + $0x90] sm:$0xff]  ;;  %1722 = vst.msk [vmem:[#allocation4 + $0xe0] sm:$0xff] %vm1693_vm11, %v1654_v43 }
 0x34e   : > { %v2115_v58 = vmax.f32 %v2020_v55, 0.0  ;;  %4321 = vmatmul.msk.f32.gmra.mxu0 %vm1901_vm13, %v1876_v39  ;;  %1723 = vst.msk [vmem:[#allocation4 + $0xe8] sm:$0xff] %vm1693_vm11, %v1656_v40 }
 0x350   : > { %2148 = vst.msk [vmem:[%s6231_s11] sm:$0xff] %vm2147_vm14, %v2115_v58 }
 0x351   : > { %2236 = vst.msk [vmem:[#allocation3 + $0x19] sm:$0xff] %vm2147_vm14, %v2115_v58 }
 0x352   : > { %v1772_v23 = vpop.permute.xlu0 %1771  ;;  %v1879_v41 = vld [vmem:[#allocation4 + $0x98] sm:$0xff] }
 0x353   : > { %v2022_v45 = vpop.f32.mrf.mxu0  ;;  %1848 = vst.msk [vmem:[#allocation4 + $0xa0] sm:$0xff] %vm1827_vm12, %v1772_v23 }
 0x354   : > { %v2023_v26 = vadd.f32 %v6211_v63, %v2022_v45  ;;  %v1658_v28 = vpop.permute.xlu2 %1657  ;;  %v1660_v8 = vpop.permute.xlu1 %1659 }
 0x355   : > { %1724 = vst.msk [vmem:[#allocation4 + $0xf0] sm:$0xff] %vm1693_vm11, %v1658_v28 }
 0x356   : > { %4322 = vmatmul.msk.f32.gmra.mxu0 %vm1901_vm13, %v1877_v20  ;;  %v2116_v33 = vmax.f32 %v2023_v26, 0.0  ;;  %1725 = vst.msk [vmem:[#allocation4 + $0xf8] sm:$0xff] %vm1693_vm11, %v1660_v8 }
 0x358   : > { %2149 = vst.msk [vmem:[%s6231_s11 + $0x8] sm:$0xff] %vm2147_vm14, %v2116_v33  ;;  %v6303_v9 = vld [vmem:[#allocation3 + $0x18] sm:$0xff] }
 0x359   : > { %2237 = vst.msk [vmem:[#allocation3 + $0x21] sm:$0xff] %vm2147_vm14, %v2116_v33  ;;  %v2407_v15 = vrot.slane %v6303_v9, 1 }
 0x35a   : > { %v1880_v22 = vld [vmem:[#allocation4 + $0xa0] sm:$0xff]  ;;  %v1776_v6 = vpop.permute.xlu0 %1775  ;;  %2324 = vst.msk [vmem:[#allocation5 + $0x20] sm:$0xff] %vm2147_vm14, %v6303_v9 }
 0x35b   : > { %v2025_v56 = vpop.f32.mrf.mxu0  ;;  %1850 = vst.msk [vmem:[#allocation4 + $0xb0] sm:$0xff] %vm1827_vm12, %v1776_v6 }
 0x35c   : > { %v1774_v53 = vpop.permute.xlu2 %1773  ;;  %v2026_v27 = vadd.f32 %v6211_v63, %v2025_v56  ;;  %v1778_v50 = vpop.permute.xlu1 %1777 }
 0x35d   : > { %1849 = vst.msk [vmem:[#allocation4 + $0xa8] sm:$0xff] %vm1827_vm12, %v1774_v53 }
 0x35e   : > { %4323 = vmatmul.msk.f32.gmra.mxu0 %vm1901_vm13, %v1878_v31  ;;  %v2117_v4 = vmax.f32 %v2026_v27, 0.0  ;;  %1851 = vst.msk [vmem:[#allocation4 + $0xb8] sm:$0xff] %vm1827_vm12, %v1778_v50 }
 0x360   : > { %v6311_v19 = vld [vmem:[#allocation3 + $0x20] sm:$0xff]  ;;  %v2273_v18 = vld [vmem:[#allocation3 + $0x28] sm:$0x3]  ;;  %2150 = vst.msk [vmem:[%s6231_s11 + $0x10] sm:$0xff] %vm2147_vm14, %v2117_v4 }
 0x361   : > { %v2408_v44 = vrot.slane %v6311_v19, 1  ;;  %v2410_v0 = vrot.slane %v2273_v18, 1  ;;  %2238 = vst.msk [vmem:[#allocation3 + $0x31] sm:$0xff] %vm2147_vm14, %v2117_v4 }
 0x362   : > { %v1782_v59 = vpop.permute.xlu0 %1781  ;;  %2325 = vst.msk [vmem:[#allocation5 + $0x30] sm:$0xff] %vm2147_vm14, %v6311_v19  ;;  %v1882_v23 = vld [vmem:[#allocation4 + $0xb0] sm:$0xff] }
 0x363   : > { %v2028_v54 = vpop.f32.mrf.mxu0  ;;  %v6322_v37 = vsel %vm640_vm1, %v2408_v44, %v2410_v0  ;;  %v6325_v51 = vsel %vm640_vm1, %v2407_v15, %v2408_v44  ;;  %1853 = vst.msk [vmem:[#allocation4 + $0xc8] sm:$0xff] %vm1827_vm12, %v1782_v59 }
 0x364   : > { %2488 = vrot.lane.b32.xlu1 %v6322_v37, %s4597_s20  ;;  %2486 = vrot.lane.b32.xlu0 %v6325_v51, %s4597_s20  ;;  %v2029_v34 = vadd.f32 %v6211_v63, %v2028_v54  ;;  %v1780_v38 = vpop.permute.xlu2 %1779  ;;  %v1784_v61 = vpop.permute.xlu1 %1783  ;;  %v1881_v13 = vld [vmem:[#allocation4 + $0xa8] sm:$0xff] }
 0x365   : > { %1852 = vst.msk [vmem:[#allocation4 + $0xc0] sm:$0xff] %vm1827_vm12, %v1780_v38  ;;  %v1883_v4 = vld [vmem:[#allocation4 + $0xb8] sm:$0xff] }
 0x366   : > { %4324 = vmatmul.msk.f32.gmra.mxu0 %vm1901_vm13, %v1879_v41  ;;  %v2118_v46 = vmax.f32 %v2029_v34, 0.0  ;;  %1854 = vst.msk [vmem:[#allocation4 + $0xd0] sm:$0xff] %vm1827_vm12, %v1784_v61 }
 0x368   : > { %2151 = vst.msk [vmem:[%s6231_s11 + $0x18] sm:$0xff] %vm2147_vm14, %v2118_v46  ;;  %v6387_v24 = vld [vmem:[#allocation3 + $0x30] sm:$0xff] }
 0x369   : > { %2239 = vst.msk [vmem:[#allocation3 + $0x39] sm:$0xff] %vm2147_vm14, %v2118_v46  ;;  %v2412_v39 = vrot.slane %v6387_v24, 1  ;;  %v2621_v58 = vrot.slane %v6387_v24, 2 }
 0x36a   : > { %v1885_v14 = vld [vmem:[#allocation4 + $0xc8] sm:$0xff]  ;;  %v1788_v5 = vpop.permute.xlu0 %1787  ;;  %2326 = vst.msk [vmem:[#allocation5 + $0x40] sm:$0xff] %vm2147_vm14, %v6387_v24 }
 0x36b   : > { %v2031_v30 = vpop.f32.mrf.mxu0  ;;  %4330 = vmatmul.msk.f32.vlgmr.msra.gmra.mxu3 %vm1901_vm13, %v1885_v14  ;;  %1856 = vst.msk [vmem:[#allocation4 + $0xe0] sm:$0xff] %vm1827_vm12, %v1788_v5 }
 0x36c   : > { %v2032_v42 = vadd.f32 %v6211_v63, %v2031_v30  ;;  %v1786_v3 = vpop.permute.xlu2 %1785  ;;  %v1790_v40 = vpop.permute.xlu1 %1789 }
 0x36d   : > { %1855 = vst.msk [vmem:[#allocation4 + $0xd8] sm:$0xff] %vm1827_vm12, %v1786_v3  ;;  %v1886_v26 = vld [vmem:[#allocation4 + $0xd0] sm:$0xff] }
 0x36e   : > { %4325 = vmatmul.msk.f32.gmra.mxu0 %vm1901_vm13, %v1880_v22  ;;  %v2119_v10 = vmax.f32 %v2032_v42, 0.0  ;;  %1857 = vst.msk [vmem:[#allocation4 + $0xe8] sm:$0xff] %vm1827_vm12, %v1790_v40 }
 0x370   : > { %2152 = vst.msk [vmem:[%s6231_s11 + $0x20] sm:$0xff] %vm2147_vm14, %v2119_v10  ;;  %v6394_v55 = vld [vmem:[#allocation3 + $0x38] sm:$0xff]  ;;  %v2276_v2 = vld [vmem:[#allocation3 + $0x40] sm:$0x3] }
 0x371   : > { %2240 = vst.msk [vmem:[#allocation3 + $0x49] sm:$0xff] %vm2147_vm14, %v2119_v10  ;;  %v2413_v52 = vrot.slane %v6394_v55, 1  ;;  %v2415_v21 = vrot.slane %v2276_v2, 1  ;;  %v2622_v16 = vrot.slane %v6394_v55, 2  ;;  %v2624_v45 = vrot.slane %v2276_v2, 2 }
 0x372   : > { %2327 = vst.msk [vmem:[#allocation5 + $0x50] sm:$0xff] %vm2147_vm14, %v6394_v55  ;;  %v1888_v34 = vld [vmem:[#allocation4 + $0xe0] sm:$0xff] }
 0x373   : > { %v2034_v29 = vpop.f32.mrf.mxu0  ;;  %v6406_v56 = vsel %vm640_vm1, %v2413_v52, %v2415_v21  ;;  %v6409_v43 = vsel %vm850_vm4, %v2622_v16, %v2624_v45  ;;  %v6412_v31 = vsel %vm640_vm1, %v2412_v39, %v2413_v52  ;;  %v6415_v33 = vsel %vm850_vm4, %v2621_v58, %v2622_v16  ;;  %4331 = vmatmul.msk.f32.gmra.mxu3 %vm1901_vm13, %v1886_v26  ;;  %v1884_v58 = vld [vmem:[#allocation4 + $0xc0] sm:$0xff] }
 0x374   : > { %v2035_v7 = vadd.f32 %v6211_v63, %v2034_v29  ;;  %3524 = vst.msk [vmem:[#allocation5 + $0x18] sm:$0xff] %vm2147_vm14, %v6409_v43  ;;  %2492 = vrot.lane.b32.xlu0 %v6406_v56, %s4597_s20  ;;  %2490 = vrot.lane.b32.xlu2 %v6412_v31, %s4597_s20  ;;  %v1887_v22 = vld [vmem:[#allocation4 + $0xd8] sm:$0xff] }
 0x375   : > { %3523 = vst.msk [vmem:[#allocation5 + $0x8] sm:$0xff] %vm2147_vm14, %v6415_v33  ;;  %v1889_v52 = vld [vmem:[#allocation4 + $0xe8] sm:$0xff] }
 0x376   : > { %v2120_v48 = vmax.f32 %v2035_v7, 0.0  ;;  %4326 = vmatmul.msk.f32.gmra.mxu0 %vm1901_vm13, %v1881_v13 }
 0x378   : > { %2153 = vst.msk [vmem:[%s6231_s11 + $0x28] sm:$0xff] %vm2147_vm14, %v2120_v48  ;;  %v6423_v32 = vld [vmem:[#allocation3 + $0x48] sm:$0xff] }
 0x379   : > { %2241 = vst.msk [vmem:[#allocation3 + $0x51] sm:$0xff] %vm2147_vm14, %v2120_v48  ;;  %v2417_v28 = vrot.slane %v6423_v32, 1  ;;  %v2626_v18 = vrot.slane %v6423_v32, 2 }
 0x37a   : > { %2328 = vst.msk [vmem:[#allocation5 + $0x60] sm:$0xff] %vm2147_vm14, %v6423_v32 }
 0x37b   : > { %v2037_v62 = vpop.f32.mrf.mxu0  ;;  %4332 = vmatmul.msk.f32.gmra.mxu3 %vm1901_vm13, %v1887_v22  ;;  %v3558_v3 = vld [vmem:[#allocation5 + $0x18] sm:$0xff] }
 0x37c   : > { %v2038_v25 = vadd.f32 %v6211_v63, %v2037_v62  ;;  %v3556_v35 = vld [vmem:[#allocation5 + $0x8] sm:$0xff] }
 0x37d   : > { %4337 = vmatmul.msk.f32.vlgmr.msra.gmra.mxu2 %vm2147_vm14, %v3556_v35 }
 0x37e   : > { %v2121_v17 = vmax.f32 %v2038_v25, 0.0  ;;  %4327 = vmatmul.msk.f32.gmra.mxu0 %vm1901_vm13, %v1882_v23 }
 0x380   : > { %2154 = vst.msk [vmem:[%s6231_s11 + $0x30] sm:$0xff] %vm2147_vm14, %v2121_v17  ;;  %v6433_v41 = vld [vmem:[#allocation3 + $0x50] sm:$0xff]  ;;  %v2279_v15 = vld [vmem:[#allocation3 + $0x58] sm:$0x3] }
 0x381   : > { %2242 = vst.msk [vmem:[#allocation3 + $0x61] sm:$0xff] %vm2147_vm14, %v2121_v17  ;;  %v2418_v44 = vrot.slane %v6433_v41, 1  ;;  %v2420_v0 = vrot.slane %v2279_v15, 1  ;;  %v2627_v36 = vrot.slane %v6433_v41, 2  ;;  %v2629_v57 = vrot.slane %v2279_v15, 2 }
 0x382   : > { %2329 = vst.msk [vmem:[#allocation5 + $0x70] sm:$0xff] %vm2147_vm14, %v6433_v41 }
 0x383   : > { %v2040_v12 = vpop.f32.mrf.mxu0  ;;  %v6445_v1 = vsel %vm640_vm1, %v2417_v28, %v2418_v44  ;;  %v6448_v47 = vsel %vm640_vm1, %v2418_v44, %v2420_v0  ;;  %v6451_v6 = vsel %vm850_vm4, %v2626_v18, %v2627_v36  ;;  %v6458_v53 = vsel %vm850_vm4, %v2627_v36, %v2629_v57  ;;  %4333 = vmatmul.msk.f32.gmra.mxu3 %vm1901_vm13, %v1888_v34 }
 0x384   : > { %v2041_v11 = vadd.f32 %v6211_v63, %v2040_v12  ;;  %2494 = vrot.lane.b32.xlu1 %v6445_v1, %s4597_s20  ;;  %3525 = vst.msk [vmem:[#allocation5 + $0x28] sm:$0xff] %vm2147_vm14, %v6451_v6  ;;  %2496 = vrot.lane.b32.xlu2 %v6448_v47, %s4597_s20 }
 0x385   : > { %3526 = vst.msk [vmem:[#allocation5 + $0x38] sm:$0xff] %vm2147_vm14, %v6458_v53  ;;  %4338 = vmatmul.msk.f32.gmra.mxu2 %vm2147_vm14, %v3558_v3 }
 0x386   : > { %v2122_v54 = vmax.f32 %v2041_v11, 0.0  ;;  %4328 = vmatmul.msk.f32.gmra.mxu0 %vm1901_vm13, %v1883_v4 }
 0x388   : > { %2155 = vst.msk [vmem:[%s6231_s11 + $0x38] sm:$0xff] %vm2147_vm14, %v2122_v54  ;;  %v6472_v59 = vld [vmem:[#allocation3 + $0x60] sm:$0xff] }
 0x389   : > { %2243 = vst.msk [vmem:[#allocation3 + $0x69] sm:$0xff] %vm2147_vm14, %v2122_v54  ;;  %v2422_v46 = vrot.slane %v6472_v59, 1  ;;  %v2631_v42 = vrot.slane %v6472_v59, 2 }
 0x38a   : > { %2330 = vst.msk [vmem:[#allocation5 + $0x80] sm:$0xff] %vm2147_vm14, %v6472_v59 }
 0x38b   : > { %v2043_v20 = vpop.f32.mrf.mxu0  ;;  %v3560_v17 = vld [vmem:[#allocation5 + $0x28] sm:$0xff]  ;;  %4334 = vmatmul.msk.f32.gmra.mxu3 %vm1901_vm13, %v1889_v52 }
 0x38c   : > { %v2044_v30 = vadd.f32 %v6211_v63, %v2043_v20 }
 0x38d   : > { %4339 = vmatmul.msk.f32.gmra.mxu2 %vm2147_vm14, %v3560_v17 }
 0x38e   : > { %v2123_v27 = vmax.f32 %v2044_v30, 0.0  ;;  %4329 = vmatmul.msk.f32.gmra.mxu0 %vm1901_vm13, %v1884_v58 }
 0x390   : > { %2156 = vst.msk [vmem:[%s6231_s11 + $0x40] sm:$0xff] %vm2147_vm14, %v2123_v27  ;;  %v6479_v38 = vld [vmem:[#allocation3 + $0x68] sm:$0xff]  ;;  %v2282_v62 = vld [vmem:[#allocation3 + $0x70] sm:$0x3] }
 0x391   : > { %2244 = vst.msk [vmem:[#allocation3 + $0x79] sm:$0xff] %vm2147_vm14, %v2123_v27  ;;  %v2423_v61 = vrot.slane %v6479_v38, 1  ;;  %v2425_v10 = vrot.slane %v2282_v62, 1  ;;  %v2632_v12 = vrot.slane %v6479_v38, 2  ;;  %v2634_v13 = vrot.slane %v2282_v62, 2  ;;  %v3562_v27 = vld [vmem:[#allocation5 + $0x38] sm:$0xff] }
 0x392   : > { %2331 = vst.msk [vmem:[#allocation5 + $0x90] sm:$0xff] %vm2147_vm14, %v6479_v38 }
 0x393   : > { %v2046_v8 = vpop.f32.mrf.mxu0  ;;  %v6491_v48 = vsel %vm640_vm1, %v2423_v61, %v2425_v10  ;;  %v6494_v25 = vsel %vm850_vm4, %v2632_v12, %v2634_v13  ;;  %v6497_v2 = vsel %vm640_vm1, %v2422_v46, %v2423_v61  ;;  %v6500_v39 = vsel %vm850_vm4, %v2631_v42, %v2632_v12 }
 0x394   : > { %v2047_v29 = vadd.f32 %v6211_v63, %v2046_v8  ;;  %3528 = vst.msk [vmem:[#allocation5 + $0x58] sm:$0xff] %vm2147_vm14, %v6494_v25  ;;  %2500 = vrot.lane.b32.xlu1 %v6491_v48, %s4597_s20  ;;  %2498 = vrot.lane.b32.xlu0 %v6497_v2, %s4597_s20 }
 0x395   : > { %3527 = vst.msk [vmem:[#allocation5 + $0x48] sm:$0xff] %vm2147_vm14, %v6500_v39  ;;  %4340 = vmatmul.msk.f32.gmra.mxu2 %vm2147_vm14, %v3562_v27 }
 0x396   : > { %v2124_v50 = vmax.f32 %v2047_v29, 0.0 }
 0x398   : > { %2157 = vst.msk [vmem:[%s6231_s11 + $0x48] sm:$0xff] %vm2147_vm14, %v2124_v50  ;;  %v6514_v11 = vld [vmem:[#allocation3 + $0x78] sm:$0xff] }
 0x399   : > { %2245 = vst.msk [vmem:[#allocation3 + $0x81] sm:$0xff] %vm2147_vm14, %v2124_v50  ;;  %v2427_v20 = vrot.slane %v6514_v11, 1  ;;  %v2636_v26 = vrot.slane %v6514_v11, 2 }
 0x39a   : > { %2332 = vst.msk [vmem:[#allocation5 + $0xa0] sm:$0xff] %vm2147_vm14, %v6514_v11 }
 0x39b   : > { %v2049_v7 = vpop.f32.mrf.mxu0 }
 0x39c   : > { %v2050_v14 = vadd.f32 %v6211_v63, %v2049_v7  ;;  %v3564_v3 = vld [vmem:[#allocation5 + $0x48] sm:$0xff] }
 0x39d   : > { %4341 = vmatmul.msk.f32.gmra.mxu2 %vm2147_vm14, %v3564_v3 }
 0x39e   : > { %v2125_v5 = vmax.f32 %v2050_v14, 0.0 }
 0x3a0   : > { %2158 = vst.msk [vmem:[%s6231_s11 + $0x50] sm:$0xff] %vm2147_vm14, %v2125_v5  ;;  %v6519_v16 = vld [vmem:[#allocation3 + $0x80] sm:$0xff]  ;;  %v2285_v45 = vld [vmem:[#allocation3 + $0x88] sm:$0x3] }
 0x3a1   : > { %2246 = vst.msk [vmem:[#allocation3 + $0x91] sm:$0xff] %vm2147_vm14, %v2125_v5  ;;  %v2428_v40 = vrot.slane %v6519_v16, 1  ;;  %v2430_v54 = vrot.slane %v2285_v45, 1  ;;  %v2637_v28 = vrot.slane %v6519_v16, 2  ;;  %v2639_v18 = vrot.slane %v2285_v45, 2 }
 0x3a2   : > { %2333 = vst.msk [vmem:[#allocation5 + $0xb0] sm:$0xff] %vm2147_vm14, %v6519_v16 }
 0x3a3   : > { %v2052_v21 = vpop.f32.mrf.mxu0  ;;  %v6532_v30 = vsel %vm640_vm1, %v2428_v40, %v2430_v54  ;;  %v6535_v44 = vsel %vm640_vm1, %v2427_v20, %v2428_v40  ;;  %v6538_v0 = vsel %vm850_vm4, %v2636_v26, %v2637_v28  ;;  %v6542_v36 = vsel %vm850_vm4, %v2637_v28, %v2639_v18  ;;  %v3566_v26 = vld [vmem:[#allocation5 + $0x58] sm:$0xff] }
 0x3a4   : > { %v2053_v23 = vadd.f32 %v6211_v63, %v2052_v21  ;;  %3529 = vst.msk [vmem:[#allocation5 + $0x68] sm:$0xff] %vm2147_vm14, %v6538_v0  ;;  %2502 = vrot.lane.b32.xlu2 %v6535_v44, %s4597_s20  ;;  %2504 = vrot.lane.b32.xlu0 %v6532_v30, %s4597_s20  ;;  %v1792_v21 = vpop.permute.xlu2 %1791 }
 0x3a5   : > { %3530 = vst.msk [vmem:[#allocation5 + $0x78] sm:$0xff] %vm2147_vm14, %v6542_v36  ;;  %4342 = vmatmul.msk.f32.gmra.mxu2 %vm2147_vm14, %v3566_v26 }
 0x3a6   : > { %v2126_v15 = vmax.f32 %v2053_v23, 0.0  ;;  %1858 = vst.msk [vmem:[#allocation4 + $0xf0] sm:$0xff] %vm1827_vm12, %v1792_v21 }
 0x3a8   : > { %2159 = vst.msk [vmem:[%s6231_s11 + $0x58] sm:$0xff] %vm2147_vm14, %v2126_v15  ;;  %v6555_v57 = vld [vmem:[#allocation3 + $0x90] sm:$0xff] }
 0x3a9   : > { %2247 = vst.msk [vmem:[#allocation3 + $0x99] sm:$0xff] %vm2147_vm14, %v2126_v15  ;;  %v2432_v4 = vrot.slane %v6555_v57, 1  ;;  %v2641_v50 = vrot.slane %v6555_v57, 2 }
 0x3aa   : > { %2334 = vst.msk [vmem:[#allocation5 + $0xc0] sm:$0xff] %vm2147_vm14, %v6555_v57 }
 0x3ab   : > { %v2055_v22 = vpop.f32.mrf.mxu0 }
 0x3ac   : > { %v2056_v8 = vadd.f32 %v6211_v63, %v2055_v22  ;;  %v3570_v21 = vld [vmem:[#allocation5 + $0x78] sm:$0xff] }
 0x3ae   : > { %v2127_v29 = vmax.f32 %v2056_v8, 0.0 }
 0x3b0   : > { %2160 = vst.msk [vmem:[%s6231_s11 + $0x60] sm:$0xff] %vm2147_vm14, %v2127_v29  ;;  %v6563_v35 = vld [vmem:[#allocation3 + $0x98] sm:$0xff]  ;;  %v2288_v34 = vld [vmem:[#allocation3 + $0xa0] sm:$0x3] }
 0x3b1   : > { %2248 = vst.msk [vmem:[#allocation3 + $0xa9] sm:$0xff] %vm2147_vm14, %v2127_v29  ;;  %v2433_v62 = vrot.slane %v6563_v35, 1  ;;  %v2435_v46 = vrot.slane %v2288_v34, 1  ;;  %v2642_v42 = vrot.slane %v6563_v35, 2  ;;  %v2644_v7 = vrot.slane %v2288_v34, 2 }
 0x3b2   : > { %2335 = vst.msk [vmem:[#allocation5 + $0xd0] sm:$0xff] %vm2147_vm14, %v6563_v35 }
 0x3b3   : > { %v2058_v61 = vpop.f32.mrf.mxu0  ;;  %v6573_v10 = vsel %vm640_vm1, %v2432_v4, %v2433_v62  ;;  %v6576_v12 = vsel %vm640_vm1, %v2433_v62, %v2435_v46  ;;  %v6579_v13 = vsel %vm850_vm4, %v2641_v50, %v2642_v42  ;;  %v6582_v14 = vsel %vm850_vm4, %v2642_v42, %v2644_v7  ;;  %v3568_v62 = vld [vmem:[#allocation5 + $0x68] sm:$0xff]  ;;  %v1794_v7 = vpop.permute.xlu0 %1793 }
 0x3b4   : > { %8245 = vst [vmem:[#allocation15_spill] sm:$0xff] %v6582_v14  ;;  %v2059_v58 = vadd.f32 %v6211_v63, %v2058_v61  ;;  %2506 = vrot.lane.b32.xlu1 %v6573_v10, %s4597_s20  ;;  %2508 = vrot.lane.b32.xlu2 %v6576_v12, %s4597_s20  ;;  %v2485_v61 = vpop.permute.xlu2 %2484 }
 0x3b5   : > { %3531 = vst.msk [vmem:[#allocation5 + $0x88] sm:$0xff] %vm2147_vm14, %v6579_v13  ;;  %4343 = vmatmul.msk.f32.gmra.mxu2 %vm2147_vm14, %v3568_v62 }
 0x3b6   : > { %3532 = vst.msk [vmem:[#allocation5 + $0x98] sm:$0xff] %vm2147_vm14, %v6582_v14  ;;  %v2128_v5 = vmax.f32 %v2059_v58, 0.0  ;;  %v2483_v58 = vpop.permute.xlu1 %2482 }
 0x3b7   : > { %1859 = vst.msk [vmem:[#allocation4 + $0xf8] sm:$0xff] %vm1827_vm12, %v1794_v7 }
 0x3b8   : > { %2161 = vst.msk [vmem:[%s6231_s11 + $0x68] sm:$0xff] %vm2147_vm14, %v2128_v5  ;;  %v6596_v52 = vld [vmem:[#allocation3 + $0xa8] sm:$0xff] }
 0x3b9   : > { %8246 = vst [vmem:[#allocation26_spill] sm:$0xff] %v6596_v52  ;;  %v2437_v54 = vrot.slane %v6596_v52, 1  ;;  %v2646_v28 = vrot.slane %v6596_v52, 2 }
 0x3ba   : > { %2249 = vst.msk [vmem:[#allocation3 + $0xb1] sm:$0xff] %vm2147_vm14, %v2128_v5 }
 0x3bb   : > { %2336 = vst.msk [vmem:[#allocation5 + $0xe0] sm:$0xff] %vm2147_vm14, %v6596_v52  ;;  %v2061_v45 = vpop.f32.mrf.mxu0 }
 0x3bc   : > { %v2062_v20 = vadd.f32 %v6211_v63, %v2061_v45  ;;  %2580 = vst.msk [vmem:[#allocation5 + $0x10] sm:$0xff] %vm2578_vm0, %v2485_v61  ;;  %v3572_v7 = vld [vmem:[#allocation5 + $0x88] sm:$0xff] }
 0x3bd   : > { %2579 = vst.msk [vmem:[#allocation5] sm:$0xff] %vm2578_vm0, %v2483_v58  ;;  %4344 = vmatmul.msk.f32.gmra.mxu2 %vm2147_vm14, %v3570_v21 }
 0x3be   : > { %v2129_v17 = vmax.f32 %v2062_v20, 0.0 }
 0x3c0   : > { %2162 = vst.msk [vmem:[%s6231_s11 + $0x70] sm:$0xff] %vm2147_vm14, %v2129_v17 }
 0x3c1   : > { %v6606_v23 = vld [vmem:[#allocation3 + $0xb0] sm:$0xff]  ;;  %v2291_v40 = vld [vmem:[#allocation3 + $0xb8] sm:$0x3]  ;;  %2250 = vst.msk [vmem:[#allocation3 + $0xc1] sm:$0xff] %vm2147_vm14, %v2129_v17 }
 0x3c2   : > { %8247 = vst [vmem:[#allocation39_spill] sm:$0xff] %v6606_v23  ;;  %v2438_v18 = vrot.slane %v6606_v23, 1  ;;  %v2440_v15 = vrot.slane %v2291_v40, 1  ;;  %v2647_v22 = vrot.slane %v6606_v23, 2  ;;  %v2649_v8 = vrot.slane %v2291_v40, 2 }
 0x3c3   : > { %2337 = vst.msk [vmem:[#allocation5 + $0xf0] sm:$0xff] %vm2147_vm14, %v6606_v23  ;;  %v2064_v27 = vpop.f32.mrf.mxu0 }
 0x3c4   : > { %v6616_v29 = vsel %vm640_vm1, %v2438_v18, %v2440_v15  ;;  %v6619_v4 = vsel %vm850_vm4, %v2647_v22, %v2649_v8  ;;  %v6622_v50 = vsel %vm640_vm1, %v2437_v54, %v2438_v18  ;;  %v6625_v34 = vsel %vm850_vm4, %v2646_v28, %v2647_v22 }
 0x3c5   : > { %8248 = vst [vmem:[#allocation42_spill] sm:$0xff] %v6616_v29  ;;  %v2065_v46 = vadd.f32 %v6211_v63, %v2064_v27  ;;  %2512 = vrot.lane.b32.xlu1 %v6616_v29, %s4597_s20  ;;  %2510 = vrot.lane.b32.xlu0 %v6622_v50, %s4597_s20 }
 0x3c6   : > { %8249 = vst [vmem:[#allocation37_spill] sm:$0xff] %v6619_v4  ;;  %4345 = vmatmul.msk.f32.gmra.mxu2 %vm2147_vm14, %v3572_v7 }
 0x3c7   : > { %8250 = vst [vmem:[#allocation40_spill] sm:$0xff] %v6622_v50  ;;  %v2130_v42 = vmax.f32 %v2065_v46, 0.0 }
 0x3c8   : > { %8251 = vst [vmem:[#allocation43_spill] sm:$0xff] %v6625_v34  ;;  %v6645_v20 = vld [vmem:[#allocation3 + $0xc0] sm:$0xff] }
 0x3c9   : > { %3534 = vst.msk [vmem:[#allocation5 + $0xb8] sm:$0xff] %vm2147_vm14, %v6619_v4  ;;  %v2442_v40 = vrot.slane %v6645_v20, 1  ;;  %v2651_v54 = vrot.slane %v6645_v20, 2 }
 0x3ca   : > { %3533 = vst.msk [vmem:[#allocation5 + $0xa8] sm:$0xff] %vm2147_vm14, %v6625_v34 }
 0x3cb   : > { %2163 = vst.msk [vmem:[%s6231_s11 + $0x78] sm:$0xff] %vm2147_vm14, %v2130_v42  ;;  %v2067_v3 = vpop.f32.mrf.mxu0 }
 0x3cc   : > { %2251 = vst.msk [vmem:[#allocation3 + $0xc9] sm:$0xff] %vm2147_vm14, %v2130_v42  ;;  %v2068_v5 = vadd.f32 %v6211_v63, %v2067_v3 }
 0x3cd   : > { %8252 = vst [vmem:[#allocation44_spill] sm:$0xff] %v6645_v20 }
 0x3ce   : > { %v2131_v45 = vmax.f32 %v2068_v5, 0.0  ;;  %2338 = vst.msk [vmem:[#allocation5 + $0x100] sm:$0xff] %vm2147_vm14, %v6645_v20 }
 0x3d0   : > { %2164 = vst.msk [vmem:[%s6231_s11 + $0x80] sm:$0xff] %vm2147_vm14, %v2131_v45 }
 0x3d1   : > { %2252 = vst.msk [vmem:[#allocation3 + $0xd9] sm:$0xff] %vm2147_vm14, %v2131_v45  ;;  %v3574_v45 = vld [vmem:[#allocation5 + $0x98] sm:$0xff] }
 0x3d2   : > { %4346 = vmatmul.msk.f32.gmra.mxu2 %vm2147_vm14, %v3574_v45 }
 0x3d3   : > { %v6649_v26 = vld [vmem:[#allocation3 + $0xc8] sm:$0xff]  ;;  %v2294_v17 = vld [vmem:[#allocation3 + $0xd0] sm:$0x3]  ;;  %v2070_v8 = vpop.f32.mrf.mxu0 }
 0x3d4   : > { %8253 = vst [vmem:[#allocation45_spill] sm:$0xff] %v6649_v26  ;;  %v2443_v28 = vrot.slane %v6649_v26, 1  ;;  %v2445_v18 = vrot.slane %v2294_v17, 1  ;;  %v2652_v15 = vrot.slane %v6649_v26, 2  ;;  %v2654_v22 = vrot.slane %v2294_v17, 2 }
 0x3d5   : > { %2339 = vst.msk [vmem:[#allocation5 + $0x110] sm:$0xff] %vm2147_vm14, %v6649_v26  ;;  %v2071_v61 = vadd.f32 %v6211_v63, %v2070_v8 }
 0x3d6   : > { %v6659_v27 = vsel %vm640_vm1, %v2443_v28, %v2445_v18  ;;  %v6662_v62 = vsel %vm850_vm4, %v2652_v15, %v2654_v22  ;;  %v6665_v46 = vsel %vm640_vm1, %v2442_v40, %v2443_v28  ;;  %v6668_v42 = vsel %vm850_vm4, %v2651_v54, %v2652_v15  ;;  %v2487_v15 = vpop.permute.xlu0 %2486  ;;  %v2489_v22 = vpop.permute.xlu1 %2488 }
 0x3d7   : > { %8254 = vst [vmem:[#allocation47_spill] sm:$0xff] %v6659_v27  ;;  %2516 = vrot.lane.b32.xlu0 %v6659_v27, %s4597_s20  ;;  %2514 = vrot.lane.b32.xlu2 %v6665_v46, %s4597_s20  ;;  %v2132_v3 = vmax.f32 %v2071_v61, 0.0 }
 0x3d8   : > { %8255 = vst [vmem:[#allocation49_spill] sm:$0xff] %v6662_v62  ;;  %v6684_v58 = vld [vmem:[#allocation3 + $0xd8] sm:$0xff] }
 0x3d9   : > { %8256 = vst [vmem:[#allocation51_spill] sm:$0xff] %v6665_v46  ;;  %v2447_v54 = vrot.slane %v6684_v58, 1  ;;  %v2656_v28 = vrot.slane %v6684_v58, 2 }
 0x3da   : > { %8257 = vst [vmem:[#allocation24_spill] sm:$0xff] %v6668_v42 }
 0x3db   : > { %3536 = vst.msk [vmem:[#allocation5 + $0xd8] sm:$0xff] %vm2147_vm14, %v6662_v62  ;;  %v2073_v5 = vpop.f32.mrf.mxu0 }
 0x3dc   : > { %3535 = vst.msk [vmem:[#allocation5 + $0xc8] sm:$0xff] %vm2147_vm14, %v6668_v42  ;;  %v2074_v21 = vadd.f32 %v6211_v63, %v2073_v5 }
 0x3dd   : > { %2165 = vst.msk [vmem:[%s6231_s11 + $0x88] sm:$0xff] %vm2147_vm14, %v2132_v3 }
 0x3de   : > { %8258 = vst [vmem:[#allocation13_spill] sm:$0xff] %v6684_v58  ;;  %v2133_v17 = vmax.f32 %v2074_v21, 0.0 }
 0x3df   : > { %2253 = vst.msk [vmem:[#allocation3 + $0xe1] sm:$0xff] %vm2147_vm14, %v2132_v3 }
 0x3e0   : > { %2340 = vst.msk [vmem:[#allocation5 + $0x120] sm:$0xff] %vm2147_vm14, %v6684_v58  ;;  %v3576_v58 = vld [vmem:[#allocation5 + $0xa8] sm:$0xff] }
 0x3e1   : > { %2166 = vst.msk [vmem:[%s6231_s11 + $0x90] sm:$0xff] %vm2147_vm14, %v2133_v17  ;;  %4347 = vmatmul.msk.f32.gmra.mxu2 %vm2147_vm14, %v3576_v58 }
 0x3e2   : > { %2254 = vst.msk [vmem:[#allocation3 + $0xf1] sm:$0xff] %vm2147_vm14, %v2133_v17 }
 0x3e3   : > { %2581 = vst.msk [vmem:[#allocation5 + $0x20] sm:$0xff] %vm2578_vm0, %v2487_v15  ;;  %v2076_v5 = vpop.f32.mrf.mxu0 }
 0x3e4   : > { %2582 = vst.msk [vmem:[#allocation5 + $0x30] sm:$0xff] %vm2578_vm0, %v2489_v22 }
 0x3e6   : > { %v6693_v40 = vld [vmem:[#allocation3 + $0xe0] sm:$0xff]  ;;  %v2297_v18 = vld [vmem:[#allocation3 + $0xe8] sm:$0x3] }
 0x3e7   : > { %8259 = vst [vmem:[#allocation16_spill] sm:$0xff] %v6693_v40  ;;  %v2448_v8 = vrot.slane %v6693_v40, 1  ;;  %v2450_v7 = vrot.slane %v2297_v18, 1  ;;  %v2657_v61 = vrot.slane %v6693_v40, 2  ;;  %v2659_v3 = vrot.slane %v2297_v18, 2 }
 0x3e8   : > { %v2077_v18 = vadd.f32 %v6211_v63, %v2076_v5  ;;  %2341 = vst.msk [vmem:[#allocation5 + $0x130] sm:$0xff] %vm2147_vm14, %v6693_v40  ;;  %v3580_v40 = vld [vmem:[#allocation5 + $0xc8] sm:$0xff] }
 0x3e9   : > { %v6703_v21 = vsel %vm640_vm1, %v2447_v54, %v2448_v8  ;;  %v6706_v45 = vsel %vm640_vm1, %v2448_v8, %v2450_v7  ;;  %v6709_v17 = vsel %vm850_vm4, %v2656_v28, %v2657_v61  ;;  %v6712_v62 = vsel %vm850_vm4, %v2657_v61, %v2659_v3  ;;  %v2491_v28 = vpop.permute.xlu2 %2490  ;;  %v3578_v8 = vld [vmem:[#allocation5 + $0xb8] sm:$0xff]  ;;  %v6732_v61 = vld [vmem:[#allocation3 + $0xf0] sm:$0xff] }
 0x3ea   : > { %8260 = vst [vmem:[#allocation21_spill] sm:$0xff] %v6703_v21  ;;  %2518 = vrot.lane.b32.xlu1 %v6703_v21, %s4597_s20  ;;  %2520 = vrot.lane.b32.xlu2 %v6706_v45, %s4597_s20  ;;  %v2134_v54 = vmax.f32 %v2077_v18, 0.0  ;;  %v2452_v5 = vrot.slane %v6732_v61, 1  ;;  %v2661_v18 = vrot.slane %v6732_v61, 2 }
 0x3eb   : > { %8261 = vst [vmem:[#allocation27_spill] sm:$0xff] %v6706_v45  ;;  %v2079_v15 = vpop.f32.mrf.mxu0  ;;  %4348 = vmatmul.msk.f32.gmra.mxu2 %vm2147_vm14, %v3578_v8 }
 0x3ec   : > { %8262 = vst [vmem:[#allocation20_spill] sm:$0xff] %v6709_v17  ;;  %v2080_v22 = vadd.f32 %v6211_v63, %v2079_v15 }
 0x3ed   : > { %8263 = vst [vmem:[#allocation22_spill] sm:$0xff] %v6712_v62 }
 0x3ee   : > { %3537 = vst.msk [vmem:[#allocation5 + $0xe8] sm:$0xff] %vm2147_vm14, %v6709_v17  ;;  %v2135_v7 = vmax.f32 %v2080_v22, 0.0 }
 0x3ef   : > { %3538 = vst.msk [vmem:[#allocation5 + $0xf8] sm:$0xff] %vm2147_vm14, %v6712_v62 }
 0x3f0   : > { %2167 = vst.msk [vmem:[%s6231_s11 + $0x98] sm:$0xff] %vm2147_vm14, %v2134_v54 }
 0x3f1   : > { %2255 = vst.msk [vmem:[#allocation3 + $0xf9] sm:$0xff] %vm2147_vm14, %v2134_v54  ;;  %v2497_v54 = vpop.permute.xlu2 %2496 }
 0x3f2   : > { %2583 = vst.msk [vmem:[#allocation5 + $0x40] sm:$0xff] %vm2578_vm0, %v2491_v28 }
 0x3f3   : > { %8264 = vst [vmem:[#allocation17_spill] sm:$0xff] %v6732_v61  ;;  %4349 = vmatmul.msk.f32.gmra.mxu2 %vm2147_vm14, %v3580_v40 }
 0x3f4   : > { %2168 = vst.msk [vmem:[%s6231_s11 + $0xa0] sm:$0xff] %vm2147_vm14, %v2135_v7 }
 0x3f5   : > { %2256 = vst.msk [vmem:[#allocation3 + $0x109] sm:$0xff] %vm2147_vm14, %v2135_v7 }
 0x3f6   : > { %2586 = vst.msk [vmem:[#allocation5 + $0x70] sm:$0xff] %vm2578_vm0, %v2497_v54 }
 0x3f7   : > { %2342 = vst.msk [vmem:[#allocation5 + $0x140] sm:$0xff] %vm2147_vm14, %v6732_v61 }
 0x3f8   : > { %v6736_v3 = vld [vmem:[#allocation3 + $0xf8] sm:$0xff]  ;;  %v2300_v58 = vld [vmem:[#allocation3 + $0x100] sm:$0x3] }
 0x3f9   : > { %8265 = vst [vmem:[#allocation33_spill] sm:$0xff] %v6736_v3  ;;  %v2453_v28 = vrot.slane %v6736_v3, 1  ;;  %v2455_v15 = vrot.slane %v2300_v58, 1  ;;  %v2662_v22 = vrot.slane %v6736_v3, 2  ;;  %v2664_v8 = vrot.slane %v2300_v58, 2  ;;  %v3582_v58 = vld [vmem:[#allocation5 + $0xd8] sm:$0xff] }
 0x3fa   : > { %2343 = vst.msk [vmem:[#allocation5 + $0x150] sm:$0xff] %vm2147_vm14, %v6736_v3 }
 0x3fb   : > { %v6745_v62 = vsel %vm640_vm1, %v2453_v28, %v2455_v15  ;;  %v6748_v17 = vsel %vm850_vm4, %v2662_v22, %v2664_v8  ;;  %v6753_v45 = vsel %vm640_vm1, %v2452_v5, %v2453_v28  ;;  %v6756_v7 = vsel %vm850_vm4, %v2661_v18, %v2662_v22  ;;  %4350 = vmatmul.msk.f32.gmra.mxu2 %vm2147_vm14, %v3582_v58  ;;  %v2493_v18 = vpop.permute.xlu0 %2492  ;;  %v2082_v28 = vpop.f32.mrf.mxu0  ;;  %v3584_v22 = vld [vmem:[#allocation5 + $0xe8] sm:$0xff] }
 0x3fc   : > { %8266 = vst [vmem:[#allocation19_spill] sm:$0xff] %v6745_v62  ;;  %2524 = vrot.lane.b32.xlu1 %v6745_v62, %s4597_s20  ;;  %2522 = vrot.lane.b32.xlu0 %v6753_v45, %s4597_s20  ;;  %v6770_v5 = vld [vmem:[#allocation3 + $0x108] sm:$0xff]  ;;  %v2083_v15 = vadd.f32 %v6211_v63, %v2082_v28  ;;  %v2495_v8 = vpop.permute.xlu1 %2494  ;;  %v2094_v58 = vpop.f32.mrf.mxu3 }
 0x3fd   : > { %8267 = vst [vmem:[#allocation30_spill] sm:$0xff] %v6748_v17  ;;  %v3586_v28 = vld [vmem:[#allocation5 + $0xf8] sm:$0xff] }
 0x3fe   : > { %8268 = vst [vmem:[#allocation36_spill] sm:$0xff] %v6753_v45  ;;  %v2503_v54 = vpop.permute.xlu2 %2502  ;;  %v2136_v40 = vmax.f32 %v2083_v15, 0.0 }
 0x3ff   : > { %8269 = vst [vmem:[#allocation28_spill] sm:$0xff] %v6756_v7 }
 0x400   : > { %3540 = vst.msk [vmem:[#allocation5 + $0x118] sm:$0xff] %vm2147_vm14, %v6748_v17 }
 0x401   : > { %3539 = vst.msk [vmem:[#allocation5 + $0x108] sm:$0xff] %vm2147_vm14, %v6756_v7 }
 0x402   : > { %8270 = vst [vmem:[#allocation23_spill] sm:$0xff] %v6770_v5 }
 0x403   : > { %2344 = vst.msk [vmem:[#allocation5 + $0x160] sm:$0xff] %vm2147_vm14, %v6770_v5  ;;  %4351 = vmatmul.msk.f32.gmra.mxu2 %vm2147_vm14, %v3584_v22  ;;  %v2085_v7 = vpop.f32.mrf.mxu0 }
 0x404   : > { %2584 = vst.msk [vmem:[#allocation5 + $0x50] sm:$0xff] %vm2578_vm0, %v2493_v18  ;;  %v2095_v18 = vadd.f32 %v6211_v63, %v2094_v58 }
 0x405   : > { %2589 = vst.msk [vmem:[#allocation5 + $0xa0] sm:$0xff] %vm2578_vm0, %v2503_v54  ;;  %v2086_v54 = vadd.f32 %v6211_v63, %v2085_v7  ;;  %v2097_v7 = vpop.f32.mrf.mxu3 }
 0x406   : > { %2169 = vst.msk [vmem:[%s6231_s11 + $0xa8] sm:$0xff] %vm2147_vm14, %v2136_v40  ;;  %v2140_v17 = vmax.f32 %v2095_v18, 0.0  ;;  %v2499_v61 = vpop.permute.xlu0 %2498 }
 0x407   : > { %2257 = vst.msk [vmem:[#allocation3 + $0x111] sm:$0xff] %vm2147_vm14, %v2136_v40  ;;  %v2137_v15 = vmax.f32 %v2086_v54, 0.0  ;;  %v2098_v54 = vadd.f32 %v6211_v63, %v2097_v7 }
 0x408   : > { %2585 = vst.msk [vmem:[#allocation5 + $0x60] sm:$0xff] %vm2578_vm0, %v2495_v8  ;;  %v2457_v8 = vrot.slane %v6770_v5, 1 }
 0x409   : > { %2173 = vst.msk [vmem:[%s6231_s11 + $0xc8] sm:$0xff] %vm2147_vm14, %v2140_v17 }
 0x40a   : > { %2261 = vst.msk [vmem:[#allocation3 + $0x141] sm:$0xff] %vm2147_vm14, %v2140_v17  ;;  %v2666_v17 = vrot.slane %v6770_v5, 2 }
 0x40b   : > { %4352 = vmatmul.msk.f32.gmra.mxu2 %vm2147_vm14, %v3586_v28  ;;  %2170 = vst.msk [vmem:[%s6231_s11 + $0xb0] sm:$0xff] %vm2147_vm14, %v2137_v15 }
 0x40c   : > { %2258 = vst.msk [vmem:[#allocation3 + $0x121] sm:$0xff] %vm2147_vm14, %v2137_v15  ;;  %v2141_v15 = vmax.f32 %v2098_v54, 0.0 }
 0x40d   : > { %2587 = vst.msk [vmem:[#allocation5 + $0x80] sm:$0xff] %vm2578_vm0, %v2499_v61 }
 0x40e   : > { %v6788_v22 = vld [vmem:[#allocation3 + $0x110] sm:$0xff]  ;;  %v2303_v40 = vld [vmem:[#allocation3 + $0x118] sm:$0x3]  ;;  %2174 = vst.msk [vmem:[%s6231_s11 + $0xd0] sm:$0xff] %vm2147_vm14, %v2141_v15 }
 0x40f   : > { %8271 = vst [vmem:[#allocation29_spill] sm:$0xff] %v6788_v22  ;;  %v2458_v58 = vrot.slane %v6788_v22, 1  ;;  %v2460_v18 = vrot.slane %v2303_v40, 1  ;;  %v2667_v62 = vrot.slane %v6788_v22, 2  ;;  %v2669_v3 = vrot.slane %v2303_v40, 2 }
 0x410   : > { %2345 = vst.msk [vmem:[#allocation5 + $0x170] sm:$0xff] %vm2147_vm14, %v6788_v22  ;;  %v2501_v22 = vpop.permute.xlu1 %2500 }
 0x411   : > { %v6801_v28 = vsel %vm640_vm1, %v2458_v58, %v2460_v18  ;;  %v6804_v45 = vsel %vm850_vm4, %v2667_v62, %v2669_v3  ;;  %v6807_v40 = vsel %vm640_vm1, %v2457_v8, %v2458_v58  ;;  %v6814_v7 = vsel %vm850_vm4, %v2666_v17, %v2667_v62  ;;  %v3588_v3 = vld [vmem:[#allocation5 + $0x108] sm:$0xff]  ;;  %v2088_v8 = vpop.f32.mrf.mxu0  ;;  %2588 = vst.msk [vmem:[#allocation5 + $0x90] sm:$0xff] %vm2578_vm0, %v2501_v22  ;;  %v2509_v18 = vpop.permute.xlu2 %2508  ;;  %v6833_v22 = vld [vmem:[%s8243_s2] ss:$0 sm:$0xff] }
 0x412   : > { %8272 = vst [vmem:[#allocation38_spill] sm:$0xff] %v6801_v28  ;;  %2528 = vrot.lane.b32.xlu0 %v6801_v28, %s4597_s20  ;;  %2526 = vrot.lane.b32.xlu2 %v6807_v40, %s4597_s20  ;;  %v2089_v58 = vadd.f32 %v6211_v63, %v2088_v8  ;;  %v2100_v17 = vpop.f32.mrf.mxu3  ;;  %v3590_v8 = vld [vmem:[#allocation5 + $0x118] sm:$0xff] }
 0x413   : > { %8273 = vst [vmem:[#allocation25_spill] sm:$0xff] %v6807_v40  ;;  %4353 = vmatmul.msk.f32.gmra.mxu2 %vm2147_vm14, %v3588_v3  ;;  %v6828_v54 = vld [vmem:[#allocation3 + $0x120] sm:$0xff]  ;;  %v2101_v63 = vadd.f32 %v6833_v22, %v2100_v17 }
 0x414   : > { %3542 = vst.msk [vmem:[#allocation5 + $0x138] sm:$0xff] %vm2147_vm14, %v6804_v45  ;;  %v2138_v62 = vmax.f32 %v2089_v58, 0.0  ;;  %v2671_v28 = vrot.slane %v6828_v54, 2 }
 0x415   : > { %3541 = vst.msk [vmem:[#allocation5 + $0x128] sm:$0xff] %vm2147_vm14, %v6814_v7  ;;  %v2142_v3 = vmax.f32 %v2101_v63, 0.0 }
 0x416   : > { %2262 = vst.msk [vmem:[#allocation3 + $0x151] sm:$0xff] %vm2147_vm14, %v2141_v15  ;;  %v2505_v15 = vpop.permute.xlu0 %2504 }
 0x417   : > { %2592 = vst.msk [vmem:[#allocation5 + $0xd0] sm:$0xff] %vm2578_vm0, %v2509_v18 }
 0x418   : > { %2171 = vst.msk [vmem:[%s6231_s11 + $0xb8] sm:$0xff] %vm2147_vm14, %v2138_v62 }
 0x419   : > { %2259 = vst.msk [vmem:[#allocation3 + $0x129] sm:$0xff] %vm2147_vm14, %v2138_v62  ;;  %v2091_v61 = vpop.f32.mrf.mxu0 }
 0x41a   : > { %2346 = vst.msk [vmem:[#allocation5 + $0x180] sm:$0xff] %vm2147_vm14, %v6828_v54  ;;  %v2092_v58 = vadd.f32 %v6833_v22, %v2091_v61  ;;  %v2103_v62 = vpop.f32.mrf.mxu3  ;;  %v2462_v61 = vrot.slane %v6828_v54, 1 }
 0x41b   : > { %2590 = vst.msk [vmem:[#allocation5 + $0xb0] sm:$0xff] %vm2578_vm0, %v2505_v15  ;;  %4354 = vmatmul.msk.f32.gmra.mxu2 %vm2147_vm14, %v3590_v8  ;;  %v2104_v63 = vadd.f32 %v6833_v22, %v2103_v62  ;;  %v3594_v52 = vld [vmem:[#allocation5 + $0x138] sm:$0xff] }
 0x41c   : > { %2175 = vst.msk [vmem:[%s6231_s11 + $0xd8] sm:$0xff] %vm2147_vm14, %v2142_v3  ;;  %v2139_v17 = vmax.f32 %v2092_v58, 0.0  ;;  %v3592_v62 = vld [vmem:[#allocation5 + $0x128] sm:$0xff] }
 0x41d   : > { %v6845_v18 = vld [vmem:[#allocation3 + $0x150] sm:$0xff]  ;;  %2263 = vst.msk [vmem:[#allocation3 + $0x159] sm:$0xff] %vm2147_vm14, %v2142_v3  ;;  %v2143_v21 = vmax.f32 %v2104_v63, 0.0 }
 0x41e   : > { %8274 = vst [vmem:[#allocation31_spill] sm:$0xff] %v6845_v18 }
 0x41f   : > { %2350 = vst.msk [vmem:[#allocation5 + $0x1c0] sm:$0xff] %vm2147_vm14, %v6845_v18 }
 0x420   : > { %2172 = vst.msk [vmem:[%s6231_s11 + $0xc0] sm:$0xff] %vm2147_vm14, %v2139_v17  ;;  %v6854_v15 = vld [vmem:[#allocation3 + $0x128] sm:$0xff]  ;;  %v2306_v40 = vld [vmem:[#allocation3 + $0x130] sm:$0x3] }
 0x421   : > { %2260 = vst.msk [vmem:[#allocation3 + $0x139] sm:$0xff] %vm2147_vm14, %v2139_v17  ;;  %v2463_v3 = vrot.slane %v6854_v15, 1  ;;  %v2465_v8 = vrot.slane %v2306_v40, 1  ;;  %v2672_v58 = vrot.slane %v6854_v15, 2  ;;  %v2674_v5 = vrot.slane %v2306_v40, 2 }
 0x422   : > { %2347 = vst.msk [vmem:[#allocation5 + $0x190] sm:$0xff] %vm2147_vm14, %v6854_v15  ;;  %v2309_v17 = vld [vmem:[#allocation3 + $0x148] sm:$0x3] }
 0x423   : > { %v6864_v42 = vsel %vm640_vm1, %v2462_v61, %v2463_v3  ;;  %v6867_v27 = vsel %vm640_vm1, %v2463_v3, %v2465_v8  ;;  %v6870_v26 = vsel %vm850_vm4, %v2671_v28, %v2672_v58  ;;  %2176 = vst.msk [vmem:[%s6231_s11 + $0xe0] sm:$0xff] %vm2147_vm14, %v2143_v21  ;;  %v6877_v40 = vsel %vm850_vm4, %v2672_v58, %v2674_v5  ;;  %v2106_v3 = vpop.f32.mrf.mxu3 }
 0x424   : > { %2530 = vrot.lane.b32.xlu1 %v6864_v42, %s4597_s20  ;;  %2532 = vrot.lane.b32.xlu2 %v6867_v27, %s4597_s20  ;;  %v6881_v63 = vld [vmem:[#allocation3 + $0x158] sm:$0xff]  ;;  %v2681_v61 = vrot.slane %v6845_v18, 2  ;;  %2264 = vst.msk [vmem:[#allocation3 + $0x169] sm:$0xff] %vm2147_vm14, %v2143_v21  ;;  %v2470_v5 = vrot.slane %v2309_v17, 1  ;;  %v2679_v8 = vrot.slane %v2309_v17, 2  ;;  %v2107_v4 = vadd.f32 %v6833_v22, %v2106_v3 }
 0x425   : > { %8275 = vst [vmem:[#allocation41_spill] sm:$0xff] %v6881_v63  ;;  %4355 = vmatmul.msk.f32.gmra.mxu2 %vm2147_vm14, %v3592_v62  ;;  %v2682_v28 = vrot.slane %v6881_v63, 2  ;;  %v2312_v58 = vld [vmem:[#allocation3 + $0x160] sm:$0x3]  ;;  %v2472_v21 = vrot.slane %v6845_v18, 1  ;;  %v2473_v62 = vrot.slane %v6881_v63, 1 }
 0x426   : > { %3543 = vst.msk [vmem:[#allocation5 + $0x148] sm:$0xff] %vm2147_vm14, %v6870_v26  ;;  %v2144_v14 = vmax.f32 %v2107_v4, 0.0  ;;  %v2684_v50 = vrot.slane %v2312_v58, 2 }
 0x427   : > { %3544 = vst.msk [vmem:[#allocation5 + $0x158] sm:$0xff] %vm2147_vm14, %v6877_v40  ;;  %v6901_v34 = vsel %vm850_vm4, %v2681_v61, %v2682_v28 }
 0x428   : > { %v6892_v46 = vld [vmem:[#allocation3 + $0x140] sm:$0xff]  ;;  %v6894_v20 = vld [vmem:[#allocation3 + $0x138] sm:$0xff]  ;;  %2351 = vst.msk [vmem:[#allocation5 + $0x1d0] sm:$0xff] %vm2147_vm14, %v6881_v63 }
 0x429   : > { %8276 = vst [vmem:[#allocation52_spill] sm:$0xff] %v6901_v34  ;;  %v2468_v17 = vrot.slane %v6892_v46, 1  ;;  %v2677_v29 = vrot.slane %v6892_v46, 2  ;;  %v2467_v3 = vrot.slane %v6894_v20, 1  ;;  %v2676_v23 = vrot.slane %v6894_v20, 2 }
 0x42a   : > { %2349 = vst.msk [vmem:[#allocation5 + $0x1b0] sm:$0xff] %vm2147_vm14, %v6892_v46 }
 0x42b   : > { %2348 = vst.msk [vmem:[#allocation5 + $0x1a0] sm:$0xff] %vm2147_vm14, %v6894_v20  ;;  %v6912_v63 = vsel %vm640_vm1, %v2468_v17, %v2470_v5  ;;  %v6915_v61 = vsel %vm850_vm4, %v2677_v29, %v2679_v8  ;;  %v6918_v18 = vsel %vm640_vm1, %v2467_v3, %v2468_v17  ;;  %v6927_v4 = vsel %vm850_vm4, %v2676_v23, %v2677_v29  ;;  %v2507_v8 = vpop.permute.xlu1 %2506  ;;  %v6938_v17 = vld [vmem:[#allocation3 + $0x168] sm:$0xff] }
 0x42c   : > { %8277 = vst [vmem:[#allocation35_spill] sm:$0xff] %v6915_v61  ;;  %2536 = vrot.lane.b32.xlu1 %v6912_v63, %s4597_s20  ;;  %2534 = vrot.lane.b32.xlu0 %v6918_v18, %s4597_s20  ;;  %v6932_v5 = vsel %vm640_vm1, %v2472_v21, %v2473_v62  ;;  %v6943_v23 = vsel %vm850_vm4, %v2682_v28, %v2684_v50  ;;  %v2475_v29 = vrot.slane %v2312_v58, 1  ;;  %v2477_v21 = vrot.slane %v6938_v17, 1 }
 0x42d   : > { %3547 = vst.msk [vmem:[#allocation5 + $0x188] sm:$0xff] %vm2147_vm14, %v6901_v34  ;;  %4356 = vmatmul.msk.f32.gmra.mxu2 %vm2147_vm14, %v3594_v52  ;;  %2538 = vrot.lane.b32.xlu2 %v6932_v5, %s4597_s20  ;;  %v3596_v52 = vld [vmem:[#allocation5 + $0x148] sm:$0xff]  ;;  %v2686_v50 = vrot.slane %v6938_v17, 2  ;;  %v2611_v34 = vrot.slane %v6236_v49, 2 }
 0x42e   : > { %2177 = vst.msk [vmem:[%s6231_s11 + $0xe8] sm:$0xff] %vm2147_vm14, %v2144_v14  ;;  %v6954_v3 = vsel %vm640_vm1, %v2473_v62, %v2475_v29 }
 0x42f   : > { %2265 = vst.msk [vmem:[#allocation3 + $0x171] sm:$0xff] %vm2147_vm14, %v2144_v14 }
 0x430   : > { %8278 = vst [vmem:[#allocation48_spill] sm:$0xff] %v6938_v17 }
 0x431   : > { %3546 = vst.msk [vmem:[#allocation5 + $0x178] sm:$0xff] %vm2147_vm14, %v6915_v61  ;;  %v2515_v14 = vpop.permute.xlu2 %2514 }
 0x432   : > { %8279 = vst [vmem:[#allocation46_spill] sm:$0xff] %v6943_v23 }
 0x433   : > { %3545 = vst.msk [vmem:[#allocation5 + $0x168] sm:$0xff] %vm2147_vm14, %v6927_v4 }
 0x434   : > { %2352 = vst.msk [vmem:[#allocation5 + $0x1e0] sm:$0xff] %vm2147_vm14, %v6938_v17  ;;  %2540 = vrot.lane.b32.xlu0 %v6954_v3, %s4597_s20 }
 0x435   : > { %3548 = vst.msk [vmem:[#allocation5 + $0x198] sm:$0xff] %vm2147_vm14, %v6943_v23  ;;  %v2612_v23 = vrot.slane %v6238_v60, 2  ;;  %4357 = vmatmul.msk.f32.gmra.mxu2 %vm2147_vm14, %v3596_v52 }
 0x436   : > { %2591 = vst.msk [vmem:[#allocation5 + $0xc0] sm:$0xff] %vm2578_vm0, %v2507_v8  ;;  %v6958_v28 = vld [vmem:[#allocation3 + $0x170] sm:$0xff]  ;;  %v2315_v58 = vld [vmem:[#allocation3 + $0x178] sm:$0x3] }
 0x437   : > { %8280 = vst [vmem:[#allocation18_spill] sm:$0xff] %v6954_v3  ;;  %v2513_v8 = vpop.permute.xlu1 %2512  ;;  %v2511_v61 = vpop.permute.xlu0 %2510  ;;  %v2478_v62 = vrot.slane %v6958_v28, 1  ;;  %v2480_v29 = vrot.slane %v2315_v58, 1  ;;  %v2689_v17 = vrot.slane %v2315_v58, 2  ;;  %v1890_v58 = vld [vmem:[#allocation4 + $0xf0] sm:$0xff] }
 0x438   : > { %2595 = vst.msk [vmem:[#allocation5 + $0x100] sm:$0xff] %vm2578_vm0, %v2515_v14  ;;  %v2687_v14 = vrot.slane %v6958_v28, 2  ;;  %4335 = vmatmul.msk.f32.gmra.mxu3 %vm1901_vm13, %v1890_v58  ;;  %v4465_v58 = vld [vmem:[#allocation3 + $0x28] sm:$0x3] }
 0x439   : > { %2353 = vst.msk [vmem:[#allocation5 + $0x1f0] sm:$0xff] %vm2147_vm14, %v6958_v28  ;;  %v6971_v3 = vsel %vm640_vm1, %v2477_v21, %v2478_v62  ;;  %v6974_v49 = vsel %vm640_vm1, %v2478_v62, %v2480_v29  ;;  %v4464_v21 = vld [vmem:[#allocation3 + $0x10] sm:$0x3] }
 0x43a   : > { %2594 = vst.msk [vmem:[#allocation5 + $0xf0] sm:$0xff] %vm2578_vm0, %v2513_v8  ;;  %v6978_v60 = vsel %vm850_vm4, %v2686_v50, %v2687_v14  ;;  %v6981_v52 = vsel %vm850_vm4, %v2687_v14, %v2689_v17  ;;  %2542 = vrot.lane.b32.xlu1 %v6971_v3, %s4597_s20  ;;  %2544 = vrot.lane.b32.xlu2 %v6974_v49, %s4597_s20  ;;  %v2614_v8 = vrot.slane %v4464_v21, 2  ;;  %v2617_v17 = vrot.slane %v6311_v19, 2  ;;  %v3598_v50 = vld [vmem:[#allocation5 + $0x158] sm:$0xff]  ;;  %s8109_s20 = smov 48  }
 0x43b   : > { %2593 = vst.msk [vmem:[#allocation5 + $0xe0] sm:$0xff] %vm2578_vm0, %v2511_v61  ;;  %v2613_v61 = vsel %vm850_vm4, %v2611_v34, %v2612_v23  ;;  %v2616_v14 = vrot.slane %v6303_v9, 2  ;;  %v2619_v21 = vrot.slane %v4465_v58, 2  ;;  %v3629_v58 = vld [vmem:[%s8244_s3 + $0x50] sm:$0xff] }
 0x43c   : > { %8281 = vst [vmem:[#allocation32_spill] sm:$0xff] %v6981_v52  ;;  %2691 = vrot.lane.b32.xlu0 %v2613_v61, %s8107_s29  ;;  %v2615_v29 = vsel %vm850_vm4, %v2612_v23, %v2614_v8  ;;  %v3602_v8 = vld [vmem:[#allocation5 + $0x178] sm:$0xff] }
 0x43d   : > { %3549 = vst.msk [vmem:[#allocation5 + $0x1a8] sm:$0xff] %vm2147_vm14, %v6978_v60  ;;  %4358 = vmatmul.msk.f32.gmra.mxu2 %vm2147_vm14, %v3598_v50  ;;  %v2618_v34 = vsel %vm850_vm4, %v2616_v14, %v2617_v17  ;;  %v2620_v61 = vsel %vm850_vm4, %v2617_v17, %v2619_v21  ;;  %v3600_v50 = vld [vmem:[#allocation5 + $0x168] sm:$0xff] }
 0x43e   : > { %3550 = vst.msk [vmem:[#allocation5 + $0x1b8] sm:$0xff] %vm2147_vm14, %v6981_v52  ;;  %v1891_v52 = vld [vmem:[#allocation4 + $0xf8] sm:$0xff]  ;;  %v3604_v17 = vld [vmem:[#allocation5 + $0x188] sm:$0xff] }
 0x440   : > { %4336 = vmatmul.msk.f32.gmra.mxu3 %vm1901_vm13, %v1891_v52  ;;  %v7017_v52 = vpop.f32.mrf.mxu2 }
 0x442   : > { %2693 = vrot.lane.b32.xlu1 %v2615_v29, %s8107_s29  ;;  %2695 = vrot.lane.b32.xlu2 %v2618_v34, %s8107_s29 }
 0x444   : > { %v2521_v62 = vpop.permute.xlu2 %2520  ;;  %2697 = vrot.lane.b32.xlu0 %v2620_v61, %s8107_s29 }
 0x445   : > { %2598 = vst.msk [vmem:[#allocation5 + $0x130] sm:$0xff] %vm2578_vm0, %v2521_v62  ;;  %4359 = vmatmul.msk.f32.gmra.mxu2 %vm2147_vm14, %v3600_v50  ;;  %v3626_v50 = vld [vmem:[%s8244_s3 + $0x38] sm:$0xff] }
 0x449   : > { %v2517_v23 = vpop.permute.xlu0 %2516 }
 0x44a   : > { %2596 = vst.msk [vmem:[#allocation5 + $0x110] sm:$0xff] %vm2578_vm0, %v2517_v23  ;;  %2699 = vrot.lane.b32.xlu1 %v6415_v33, %s8107_s29  ;;  %2701 = vrot.lane.b32.xlu2 %v6409_v43, %s8107_s29  ;;  %v3625_v23 = vld [vmem:[%s8244_s3 + $0x30] sm:$0xff] }
 0x44c   : > { %2822 = vrot.lane.b32.xlu0 %v6303_v9, %s8109_s20  ;;  %v3606_v9 = vld [vmem:[#allocation5 + $0x198] sm:$0xff] }
 0x44d   : > { %4360 = vmatmul.msk.f32.gmra.mxu2 %vm2147_vm14, %v3602_v8 }
 0x452   : > { %2957 = vrot.lane.b32.xlu1 %v6325_v51, %s8105_s25  ;;  %3091 = vrot.lane.b32.xlu2 %v2618_v34, %s8103_s30  ;;  %v7029_v51 = vpop.f32.mrf.mxu2 }
 0x454   : > { %3222 = vrot.lane.b32.xlu0 %v6387_v24, %s8113_s26 }
 0x455   : > { %4361 = vmatmul.msk.f32.gmra.mxu2 %vm2147_vm14, %v3604_v17 }
 0x45a   : > { %3357 = vrot.lane.b32.xlu1 %v6412_v31, %s8111_s27  ;;  %2824 = vrot.lane.b32.xlu2 %v6311_v19, %s8109_s20 }
 0x45c   : > { %v2519_v62 = vpop.permute.xlu1 %2518  ;;  %2959 = vrot.lane.b32.xlu0 %v6322_v37, %s8105_s25 }
 0x45d   : > { %2597 = vst.msk [vmem:[#allocation5 + $0x120] sm:$0xff] %vm2578_vm0, %v2519_v62  ;;  %4362 = vmatmul.msk.f32.gmra.mxu2 %vm2147_vm14, %v3606_v9  ;;  %v3624_v62 = vld [vmem:[%s8244_s3 + $0x28] sm:$0xff]  ;;  %v3623_v9 = vld [vmem:[%s8244_s3 + $0x20] sm:$0xff] }
 0x462   : > { %3093 = vrot.lane.b32.xlu1 %v2620_v61, %s8103_s30  ;;  %3224 = vrot.lane.b32.xlu2 %v6394_v55, %s8113_s26 }
 0x464   : > { %3359 = vrot.lane.b32.xlu0 %v6406_v56, %s8111_s27 }
 0x46a   : > { %2826 = vrot.lane.b32.xlu1 %v6387_v24, %s8109_s20  ;;  %2961 = vrot.lane.b32.xlu2 %v6412_v31, %s8105_s25  ;;  %v3634_v31 = vld [vmem:[%s8244_s3 + $0x78] sm:$0xff] }
 0x46b   : > { %3737 = vmatpush.msra.mxu1 %v3634_v31  ;;  %4379 = vmatpush.msrb.mxu3 %v3634_v31  ;;  %v4467_v31 = vld [vmem:[%s8244_s3 + $0x80] sm:$0xff] }
 0x46c   : > { %v2527_v19 = vpop.permute.xlu2 %2526  ;;  %3095 = vrot.lane.b32.xlu0 %v6415_v33, %s8103_s30  ;;  %v3633_v33 = vld [vmem:[%s8244_s3 + $0x70] sm:$0xff] }
 0x46d   : > { %2601 = vst.msk [vmem:[#allocation5 + $0x160] sm:$0xff] %vm2578_vm0, %v2527_v19  ;;  %3738 = vmatpush.msra.mxu1 %v3633_v33  ;;  %4380 = vmatpush.msrb.mxu3 %v3633_v33 }
 0x46e   : > { %v2525_v29 = vpop.permute.xlu1 %2524  ;;  %v2523_v14 = vpop.permute.xlu0 %2522 }
 0x46f   : > { %2600 = vst.msk [vmem:[#allocation5 + $0x150] sm:$0xff] %vm2578_vm0, %v2525_v29 }
 0x470   : > { %2599 = vst.msk [vmem:[#allocation5 + $0x140] sm:$0xff] %vm2578_vm0, %v2523_v14  ;;  %v3621_v14 = vld [vmem:[%s8244_s3 + $0x10] sm:$0xff] }
 0x472   : > { %3226 = vrot.lane.b32.xlu1 %v6423_v32, %s8113_s26  ;;  %3361 = vrot.lane.b32.xlu2 %v6445_v1, %s8111_s27 }
 0x474   : > { %2828 = vrot.lane.b32.xlu0 %v6394_v55, %s8109_s20 }
 0x47a   : > { %2963 = vrot.lane.b32.xlu1 %v6406_v56, %s8105_s25  ;;  %3097 = vrot.lane.b32.xlu2 %v6409_v43, %s8103_s30 }
 0x47c   : > { %3228 = vrot.lane.b32.xlu0 %v6433_v41, %s8113_s26 }
 0x47e   : > { %v2533_v37 = vpop.permute.xlu2 %2532 }
 0x47f   : > { %2604 = vst.msk [vmem:[#allocation5 + $0x190] sm:$0xff] %vm2578_vm0, %v2533_v37 }
 0x482   : > { %3363 = vrot.lane.b32.xlu1 %v6448_v47, %s8111_s27  ;;  %2830 = vrot.lane.b32.xlu2 %v6423_v32, %s8109_s20 }
 0x484   : > { %v2529_v24 = vpop.permute.xlu0 %2528  ;;  %2965 = vrot.lane.b32.xlu0 %v6445_v1, %s8105_s25  ;;  %v3631_v1 = vld [vmem:[%s8244_s3 + $0x60] sm:$0xff] }
 0x485   : > { %2602 = vst.msk [vmem:[#allocation5 + $0x170] sm:$0xff] %vm2578_vm0, %v2529_v24 }
 0x487   : > { %v2539_v55 = vpop.permute.xlu2 %2538 }
 0x488   : > { %2607 = vst.msk [vmem:[#allocation5 + $0x1c0] sm:$0xff] %vm2578_vm0, %v2539_v55  ;;  %v4466_v55 = vld [vmem:[%s8244_s3 + $0x88] sm:$0xff] }
 0x48a   : > { %3099 = vrot.lane.b32.xlu1 %v6451_v6, %s8103_s30  ;;  %3230 = vrot.lane.b32.xlu2 %v6472_v59, %s8113_s26 }
 0x48c   : > { %3365 = vrot.lane.b32.xlu0 %v6497_v2, %s8111_s27 }
 0x492   : > { %2832 = vrot.lane.b32.xlu1 %v6433_v41, %s8109_s20  ;;  %2967 = vrot.lane.b32.xlu2 %v6448_v47, %s8105_s25  ;;  %v3632_v41 = vld [vmem:[%s8244_s3 + $0x68] sm:$0xff]  ;;  %s8282_s25 = smov 64  }
 0x493   : > { %3739 = vmatpush.msra.mxu1 %v3632_v41  ;;  %4381 = vmatpush.msrb.mxu3 %v3632_v41 }
 0x494   : > { %v2545_v56 = vpop.permute.xlu2 %2544  ;;  %3101 = vrot.lane.b32.xlu0 %v6458_v53, %s8103_s30  ;;  %s8115_s30 = scalar_lea.vmem [#allocation10], %s7843_s21 }
 0x495   : > { %2610 = vst.msk [vmem:[#allocation5 + $0x1f0] sm:$0xff] %vm2578_vm0, %v2545_v56  ;;  %3740 = vmatpush.msra.mxu1 %v3631_v1  ;;  %4382 = vmatpush.msrb.mxu3 %v3631_v1 }
 0x496   : > { %v2531_v43 = vpop.permute.xlu1 %2530 }
 0x497   : > { %2603 = vst.msk [vmem:[#allocation5 + $0x180] sm:$0xff] %vm2578_vm0, %v2531_v43 }
 0x49a   : > { %3232 = vrot.lane.b32.xlu1 %v6479_v38, %s8113_s26  ;;  %3367 = vrot.lane.b32.xlu2 %v6491_v48, %s8111_s27 }
 0x49c   : > { %v2696_v32 = vpop.permute.xlu2 %2695  ;;  %2703 = vrot.lane.b32.xlu0 %v6451_v6, %s8107_s29  ;;  %v3630_v6 = vld [vmem:[%s8244_s3 + $0x58] sm:$0xff] }
 0x49d   : > { %2790 = vst.msk [vmem:[#allocation5 + $0x20] sm:$0xff] %vm2787_vm2, %v2696_v32  ;;  %3741 = vmatpush.msra.mxu1 %v3630_v6  ;;  %4383 = vmatpush.msrb.mxu3 %v3630_v6 }
 0x49e   : > { %v2537_v47 = vpop.permute.xlu1 %2536  ;;  %v2535_v34 = vpop.permute.xlu0 %2534 }
 0x49f   : > { %2606 = vst.msk [vmem:[#allocation5 + $0x1b0] sm:$0xff] %vm2578_vm0, %v2537_v47  ;;  %3742 = vmatpush.msra.mxu1 %v3629_v58  ;;  %4384 = vmatpush.msrb.mxu3 %v3629_v58 }
 0x4a0   : > { %2605 = vst.msk [vmem:[#allocation5 + $0x1a0] sm:$0xff] %vm2578_vm0, %v2535_v34 }
 0x4a2   : > { %2834 = vrot.lane.b32.xlu1 %v6472_v59, %s8109_s20  ;;  %2969 = vrot.lane.b32.xlu2 %v6497_v2, %s8282_s25  ;;  %v3628_v59 = vld [vmem:[%s8244_s3 + $0x48] sm:$0xff]  ;;  %s8283_s20 = smov 80   ;;  %v3627_v2 = vld [vmem:[%s8244_s3 + $0x40] sm:$0xff] }
 0x4a3   : > { %3743 = vmatpush.msra.mxu1 %v3628_v59  ;;  %4385 = vmatpush.msrb.mxu3 %v3628_v59 }
 0x4a4   : > { %v2702_v21 = vpop.permute.xlu2 %2701  ;;  %3103 = vrot.lane.b32.xlu0 %v6500_v39, %s8283_s20 }
 0x4a5   : > { %2793 = vst.msk [vmem:[#allocation5 + $0x50] sm:$0xff] %vm2787_vm2, %v2702_v21  ;;  %3744 = vmatpush.msra.mxu1 %v3627_v2  ;;  %4386 = vmatpush.msrb.mxu3 %v3627_v2 }
 0x4a6   : > { %v2541_v61 = vpop.permute.xlu0 %2540 }
 0x4a7   : > { %2608 = vst.msk [vmem:[#allocation5 + $0x1d0] sm:$0xff] %vm2578_vm0, %v2541_v61  ;;  %3745 = vmatpush.msra.mxu1 %v3626_v50  ;;  %4387 = vmatpush.msrb.mxu3 %v3626_v50 }
 0x4a9   : > { %3746 = vmatpush.msra.mxu1 %v3625_v23  ;;  %4388 = vmatpush.msrb.mxu3 %v3625_v23 }
 0x4aa   : > { %3234 = vrot.lane.b32.xlu1 %v6514_v11, %s8113_s26  ;;  %3369 = vrot.lane.b32.xlu2 %v6535_v44, %s8111_s27  ;;  %s8284_s27 = smov 32   ;;  %s8286_s26 = smov 96  }
 0x4ab   : > { %3747 = vmatpush.msra.mxu1 %v3624_v62  ;;  %4389 = vmatpush.msrb.mxu3 %v3624_v62 }
 0x4ac   : > { %v2543_v8 = vpop.permute.xlu1 %2542  ;;  %v3092_v17 = vpop.permute.xlu2 %3091  ;;  %2705 = vrot.lane.b32.xlu0 %v6458_v53, %s8284_s27  ;;  %v3622_v53 = vld [vmem:[%s8244_s3 + $0x18] sm:$0xff] }
 0x4ad   : > { %2609 = vst.msk [vmem:[#allocation5 + $0x1e0] sm:$0xff] %vm2578_vm0, %v2543_v8  ;;  %3748 = vmatpush.msra.mxu1 %v3623_v9  ;;  %4390 = vmatpush.msrb.mxu3 %v3623_v9 }
 0x4ae   : > { %v2692_v29 = vpop.permute.xlu0 %2691 }
 0x4af   : > { %2788 = vst.msk [vmem:[#allocation5] sm:$0xff] %vm2787_vm2, %v2692_v29  ;;  %3749 = vmatpush.msra.mxu1 %v3622_v53  ;;  %4391 = vmatpush.msrb.mxu3 %v3622_v53 }
 0x4b1   : > { %3750 = vmatpush.msra.mxu1 %v3621_v14  ;;  %4392 = vmatpush.msrb.mxu3 %v3621_v14 }
 0x4b2   : > { %2836 = vrot.lane.b32.xlu1 %v6479_v38, %s8285_s12  ;;  %2971 = vrot.lane.b32.xlu2 %v6491_v48, %s8282_s25  ;;  %v3620_v38 = vld [vmem:[%s8244_s3 + $0x8] sm:$0xff]  ;;  %v3619_v48 = vld [vmem:[%s8244_s3] sm:$0xff] }
 0x4b3   : > { %3751 = vmatpush.msra.mxu1 %v3620_v38  ;;  %4393 = vmatpush.msrb.mxu3 %v3620_v38 }
 0x4b4   : > { %v2694_v19 = vpop.permute.xlu1 %2693  ;;  %v2825_v37 = vpop.permute.xlu2 %2824  ;;  %3105 = vrot.lane.b32.xlu0 %v6494_v25, %s8283_s20 }
 0x4b5   : > { %2789 = vst.msk [vmem:[#allocation5 + $0x10] sm:$0xff] %vm2787_vm2, %v2694_v19  ;;  %3752 = vmatpush.msra.mxu1 %v3619_v48  ;;  %4394 = vmatpush.msrb.mxu3 %v3619_v48 }
 0x4b6   : > { %2920 = vst.msk [vmem:[#allocation5 + $0x10] sm:$0xff] %vm2918_vm3, %v2825_v37  ;;  %v2698_v24 = vpop.permute.xlu0 %2697 }
 0x4b7   : > { %2791 = vst.msk [vmem:[#allocation5 + $0x30] sm:$0xff] %vm2787_vm2, %v2698_v24  ;;  %4395 = vmatpush.msra.mxu3 %v4466_v55 }
 0x4b9   : > { %4396 = vmatpush.msra.mxu3 %v4467_v31 }
 0x4ba   : > { %3236 = vrot.lane.b32.xlu1 %v6519_v16, %s8286_s26  ;;  %3371 = vrot.lane.b32.xlu2 %v6532_v30, %s8287_s18 }
 0x4bb   : > { %v2109_v33 = vpop.f32.mrf.mxu3 }
 0x4bc   : > { %v2700_v56 = vpop.permute.xlu1 %2699  ;;  %v3225_v43 = vpop.permute.xlu2 %3224  ;;  %2707 = vrot.lane.b32.xlu0 %v6500_v39, %s8284_s27  ;;  %v2110_v32 = vadd.f32 %v6833_v22, %v2109_v33 }
 0x4bd   : > { %2792 = vst.msk [vmem:[#allocation5 + $0x40] sm:$0xff] %vm2787_vm2, %v2700_v56 }
 0x4be   : > { %v2823_v41 = vpop.permute.xlu0 %2822  ;;  %v2145_v1 = vmax.f32 %v2110_v32, 0.0 }
 0x4bf   : > { %2919 = vst.msk [vmem:[#allocation5] sm:$0xff] %vm2918_vm3, %v2823_v41 }
 0x4c0   : > { %2178 = vst.msk [vmem:[%s6231_s11 + $0xf0] sm:$0xff] %vm2147_vm14, %v2145_v1 }
 0x4c1   : > { %2266 = vst.msk [vmem:[#allocation3 + $0x181] sm:$0xff] %vm2147_vm14, %v2145_v1 }
 0x4c2   : > { %2735 = vrot.lane.b32.xlu1 %v6814_v7, %s8284_s27  ;;  %2838 = vrot.lane.b32.xlu2 %v6514_v11, %s8285_s12 }
 0x4c3   : > { %v2112_v34 = vpop.f32.mrf.mxu3 }
 0x4c4   : > { %v2958_v47 = vpop.permute.xlu1 %2957  ;;  %v2962_v39 = vpop.permute.xlu2 %2961  ;;  %2866 = vrot.lane.b32.xlu0 %v6828_v54, %s8285_s12  ;;  %v2113_v11 = vadd.f32 %v6833_v22, %v2112_v34 }
 0x4c5   : > { %3054 = vst.msk [vmem:[#allocation5] sm:$0xff] %vm3053_vm5, %v2958_v47 }
 0x4c6   : > { %3188 = vst.msk [vmem:[#allocation5] sm:$0xff] %vm3187_vm6, %v3092_v17  ;;  %v3223_v6 = vpop.permute.xlu0 %3222  ;;  %v2146_v58 = vmax.f32 %v2113_v11, 0.0 }
 0x4c7   : > { %3319 = vst.msk [vmem:[#allocation5] sm:$0xff] %vm3318_vm7, %v3223_v6 }
 0x4c8   : > { %2179 = vst.msk [vmem:[%s6231_s11 + $0xf8] sm:$0xff] %vm2147_vm14, %v2146_v58  ;;  %v7220_v9 = vld [vmem:[#allocation3 + $0x180] sm:$0xff] }
 0x4c9   : > { %2267 = vst.msk [vmem:[#allocation3 + $0x189] sm:$0xff] %vm2147_vm14, %v2146_v58  ;;  %v3086_v53 = vrot.slane %v7220_v9, 2 }
 0x4ca   : > { %2973 = vrot.lane.b32.xlu1 %v6535_v44, %s8282_s25  ;;  %3001 = vrot.lane.b32.xlu2 %v6864_v42, %s8282_s25 }
 0x4cc   : > { %v3358_v21 = vpop.permute.xlu1 %3357  ;;  %v3362_v59 = vpop.permute.xlu2 %3361  ;;  %3107 = vrot.lane.b32.xlu0 %v6538_v0, %s8283_s20 }
 0x4cd   : > { %3454 = vst.msk [vmem:[#allocation5] sm:$0xff] %vm3453_vm8, %v3358_v21 }
 0x4ce   : > { %v2960_v22 = vpop.permute.xlu0 %2959 }
 0x4cf   : > { %3055 = vst.msk [vmem:[#allocation5 + $0x10] sm:$0xff] %vm3053_vm5, %v2960_v22 }
 0x4d0   : > { %v7222_v29 = vld [vmem:[#allocation3 + $0x188] sm:$0xff]  ;;  %v7226_v14 = vld [vmem:[#allocation3 + $0x190] sm:$0x3] }
 0x4d1   : > { %v3089_v19 = vrot.slane %v7226_v14, 2 }
 0x4d2   : > { %3135 = vrot.lane.b32.xlu1 %v6870_v26, %s8283_s20  ;;  %3238 = vrot.lane.b32.xlu2 %v6555_v57, %s8286_s26 }
 0x4d4   : > { %v3094_v44 = vpop.permute.xlu1 %3093  ;;  %v3098_v2 = vpop.permute.xlu2 %3097  ;;  %v3555_v61 = vld [vmem:[#allocation5] sm:$0xff]  ;;  %3266 = vrot.lane.b32.xlu0 %v6894_v20, %s8286_s26 }
 0x4d5   : > { %3189 = vst.msk [vmem:[#allocation5 + $0x10] sm:$0xff] %vm3187_vm6, %v3094_v44  ;;  %3753 = vmatmul.f32.vlgmr.msra.gmra.mxu1 %v3555_v61  ;;  %v8290_v44 = vld [vmem:[#allocation40_spill] sm:$0xff] }
 0x4d6   : > { %3320 = vst.msk [vmem:[#allocation5 + $0x10] sm:$0xff] %vm3318_vm7, %v3225_v43  ;;  %v3360_v50 = vpop.permute.xlu0 %3359 }
 0x4d7   : > { %3455 = vst.msk [vmem:[#allocation5 + $0x10] sm:$0xff] %vm3453_vm8, %v3360_v50 }
 0x4da   : > { %3373 = vrot.lane.b32.xlu1 %v6573_v10, %s8287_s18  ;;  %3401 = vrot.lane.b32.xlu2 %v6918_v18, %s8287_s18 }
 0x4dc   : > { %v2827_v23 = vpop.permute.xlu1 %2826  ;;  %v2831_v8 = vpop.permute.xlu2 %2830  ;;  %2709 = vrot.lane.b32.xlu0 %v6494_v25, %s8284_s27  ;;  %v3087_v25 = vrot.slane %v7222_v29, 2 }
 0x4dd   : > { %2921 = vst.msk [vmem:[#allocation5 + $0x20] sm:$0xff] %vm2918_vm3, %v2827_v23 }
 0x4de   : > { %3056 = vst.msk [vmem:[#allocation5 + $0x20] sm:$0xff] %vm3053_vm5, %v2962_v39  ;;  %v3096_v17 = vpop.permute.xlu0 %3095  ;;  %v3557_v62 = vld [vmem:[#allocation5 + $0x10] sm:$0xff]  ;;  %v7235_v48 = vsel %vm850_vm4, %v3086_v53, %v3087_v25  ;;  %v7239_v24 = vsel %vm850_vm4, %v3087_v25, %v3089_v19 }
 0x4df   : > { %2923 = vst.msk [vmem:[#allocation5 + $0x40] sm:$0xff] %vm2918_vm3, %v2831_v8  ;;  %3756 = vmatmul.f32.gmra.mxu1 %v3557_v62  ;;  %v8291_v62 = vld [vmem:[#allocation15_spill] sm:$0xff] }
 0x4e0   : > { %3190 = vst.msk [vmem:[#allocation5 + $0x20] sm:$0xff] %vm3187_vm6, %v3096_v17 }
 0x4e1   : > { %3551 = vst.msk [vmem:[#allocation5 + $0x1c8] sm:$0xff] %vm2147_vm14, %v7235_v48 }
 0x4e2   : > { %2737 = vrot.lane.b32.xlu1 %v6804_v45, %s8284_s27  ;;  %2840 = vrot.lane.b32.xlu2 %v6519_v16, %s8285_s12  ;;  %3552 = vst.msk [vmem:[#allocation5 + $0x1d8] sm:$0xff] %vm2147_vm14, %v7239_v24 }
 0x4e4   : > { %v3227_v37 = vpop.permute.xlu1 %3226  ;;  %v3231_v38 = vpop.permute.xlu2 %3230  ;;  %2868 = vrot.lane.b32.xlu0 %v6854_v15, %s8285_s12 }
 0x4e5   : > { %3321 = vst.msk [vmem:[#allocation5 + $0x20] sm:$0xff] %vm3318_vm7, %v3227_v37  ;;  %v8294_v37 = vld [vmem:[#allocation41_spill] sm:$0xff] }
 0x4e6   : > { %3456 = vst.msk [vmem:[#allocation5 + $0x20] sm:$0xff] %vm3453_vm8, %v3362_v59  ;;  %v2829_v16 = vpop.permute.xlu0 %2828  ;;  %v8289_v59 = vld [vmem:[#allocation31_spill] sm:$0xff] }
 0x4e7   : > { %2922 = vst.msk [vmem:[#allocation5 + $0x30] sm:$0xff] %vm2918_vm3, %v2829_v16  ;;  %v8295_v16 = vld [vmem:[#allocation42_spill] sm:$0xff] }
 0x4ea   : > { %2975 = vrot.lane.b32.xlu1 %v6532_v30, %s8282_s25  ;;  %3003 = vrot.lane.b32.xlu2 %v6867_v27, %s8282_s25 }
 0x4ec   : > { %v2964_v55 = vpop.permute.xlu1 %2963  ;;  %v2968_v56 = vpop.permute.xlu2 %2967  ;;  %3109 = vrot.lane.b32.xlu0 %v6542_v36, %s8283_s20 }
 0x4ed   : > { %3057 = vst.msk [vmem:[#allocation5 + $0x30] sm:$0xff] %vm3053_vm5, %v2964_v55  ;;  %v3559_v43 = vld [vmem:[#allocation5 + $0x20] sm:$0xff]  ;;  %v8296_v55 = vld [vmem:[#allocation18_spill] sm:$0xff] }
 0x4ee   : > { %3191 = vst.msk [vmem:[#allocation5 + $0x30] sm:$0xff] %vm3187_vm6, %v3098_v2  ;;  %3759 = vmatmul.f32.gmra.mxu1 %v3559_v43  ;;  %v3229_v31 = vpop.permute.xlu0 %3228 }
 0x4ef   : > { %3322 = vst.msk [vmem:[#allocation5 + $0x30] sm:$0xff] %vm3318_vm7, %v3229_v31 }
 0x4f2   : > { %3137 = vrot.lane.b32.xlu1 %v6877_v40, %s8283_s20  ;;  %3240 = vrot.lane.b32.xlu2 %v6563_v35, %s8286_s26 }
 0x4f4   : > { %v3364_v30 = vpop.permute.xlu1 %3363  ;;  %v3368_v33 = vpop.permute.xlu2 %3367  ;;  %3268 = vrot.lane.b32.xlu0 %v6892_v46, %s8286_s26 }
 0x4f5   : > { %3457 = vst.msk [vmem:[#allocation5 + $0x30] sm:$0xff] %vm3453_vm8, %v3364_v30 }
 0x4f6   : > { %v2966_v32 = vpop.permute.xlu0 %2965 }
 0x4f7   : > { %3058 = vst.msk [vmem:[#allocation5 + $0x40] sm:$0xff] %vm3053_vm5, %v2966_v32 }
 0x4fa   : > { %3375 = vrot.lane.b32.xlu1 %v6576_v12, %s8287_s18  ;;  %3403 = vrot.lane.b32.xlu2 %v6912_v63, %s8287_s18 }
 0x4fc   : > { %v3100_v41 = vpop.permute.xlu1 %3099  ;;  %v2970_v1 = vpop.permute.xlu2 %2969  ;;  %v3561_v47 = vld [vmem:[#allocation5 + $0x30] sm:$0xff]  ;;  %2711 = vrot.lane.b32.xlu0 %v6538_v0, %s8284_s27 }
 0x4fd   : > { %3192 = vst.msk [vmem:[#allocation5 + $0x40] sm:$0xff] %vm3187_vm6, %v3100_v41  ;;  %3762 = vmatmul.f32.gmra.mxu1 %v3561_v47  ;;  %v8297_v41 = vld [vmem:[#allocation43_spill] sm:$0xff] }
 0x4fe   : > { %3323 = vst.msk [vmem:[#allocation5 + $0x40] sm:$0xff] %vm3318_vm7, %v3231_v38  ;;  %v3366_v39 = vpop.permute.xlu0 %3365 }
 0x4ff   : > { %3458 = vst.msk [vmem:[#allocation5 + $0x40] sm:$0xff] %vm3453_vm8, %v3366_v39  ;;  %v8298_v39 = vld [vmem:[#allocation52_spill] sm:$0xff] }
 0x502   : > { %2739 = vrot.lane.b32.xlu1 %v6870_v26, %s8284_s27  ;;  %2842 = vrot.lane.b32.xlu2 %v6555_v57, %s8285_s12 }
 0x504   : > { %v2833_v34 = vpop.permute.xlu1 %2832  ;;  %v3370_v11 = vpop.permute.xlu2 %3369  ;;  %2870 = vrot.lane.b32.xlu0 %v6894_v20, %s8285_s12 }
 0x505   : > { %2924 = vst.msk [vmem:[#allocation5 + $0x50] sm:$0xff] %vm2918_vm3, %v2833_v34  ;;  %v8299_v34 = vld [vmem:[#allocation44_spill] sm:$0xff] }
 0x506   : > { %3059 = vst.msk [vmem:[#allocation5 + $0x50] sm:$0xff] %vm3053_vm5, %v2968_v56  ;;  %v3102_v6 = vpop.permute.xlu0 %3101  ;;  %v3563_v0 = vld [vmem:[#allocation5 + $0x40] sm:$0xff] }
 0x507   : > { %3193 = vst.msk [vmem:[#allocation5 + $0x50] sm:$0xff] %vm3187_vm6, %v3102_v6  ;;  %3765 = vmatmul.f32.gmra.mxu1 %v3563_v0  ;;  %v7373_v0 = vld [vmem:[%s8300_s4] ss:$0 sm:$0xff] }
 0x50a   : > { %2977 = vrot.lane.b32.xlu1 %v6573_v10, %s8282_s25  ;;  %3005 = vrot.lane.b32.xlu2 %v6918_v18, %s8282_s25  ;;  %v8288_v10 = vld [vmem:[#allocation26_spill] sm:$0xff] }
 0x50c   : > { %v3233_v57 = vpop.permute.xlu1 %3232  ;;  %v2972_v26 = vpop.permute.xlu2 %2971  ;;  %3111 = vrot.lane.b32.xlu0 %v6579_v13, %s8283_s20 }
 0x50d   : > { %3324 = vst.msk [vmem:[#allocation5 + $0x50] sm:$0xff] %vm3318_vm7, %v3233_v57 }
 0x50e   : > { %3459 = vst.msk [vmem:[#allocation5 + $0x50] sm:$0xff] %vm3453_vm8, %v3368_v33  ;;  %v2704_v20 = vpop.permute.xlu0 %2703 }
 0x50f   : > { %2794 = vst.msk [vmem:[#allocation5 + $0x60] sm:$0xff] %vm2787_vm2, %v2704_v20 }
 0x512   : > { %3139 = vrot.lane.b32.xlu1 %v6927_v4, %s8283_s20  ;;  %3242 = vrot.lane.b32.xlu2 %v8288_v10, %s8286_s26 }
 0x514   : > { %v2835_v58 = vpop.permute.xlu1 %2834  ;;  %v3372_v18 = vpop.permute.xlu2 %3371  ;;  %3270 = vrot.lane.b32.xlu0 %v8289_v59, %s8286_s26 }
 0x515   : > { %2925 = vst.msk [vmem:[#allocation5 + $0x60] sm:$0xff] %vm2918_vm3, %v2835_v58  ;;  %v3565_v21 = vld [vmem:[#allocation5 + $0x50] sm:$0xff] }
 0x516   : > { %3060 = vst.msk [vmem:[#allocation5 + $0x60] sm:$0xff] %vm3053_vm5, %v2970_v1  ;;  %3768 = vmatmul.f32.gmra.mxu1 %v3565_v21  ;;  %v3104_v22 = vpop.permute.xlu0 %3103  ;;  %v8302_v58 = vld [vmem:[#allocation51_spill] sm:$0xff] }
 0x517   : > { %3194 = vst.msk [vmem:[#allocation5 + $0x60] sm:$0xff] %vm3187_vm6, %v3104_v22 }
 0x51a   : > { %3377 = vrot.lane.b32.xlu1 %v8290_v44, %s8287_s18  ;;  %3405 = vrot.lane.b32.xlu2 %v6932_v5, %s8287_s18 }
 0x51c   : > { %v3235_v2 = vpop.permute.xlu1 %3234  ;;  %v2839_v61 = vpop.permute.xlu2 %2838  ;;  %2713 = vrot.lane.b32.xlu0 %v6542_v36, %s8284_s27 }
 0x51d   : > { %3325 = vst.msk [vmem:[#allocation5 + $0x60] sm:$0xff] %vm3318_vm7, %v3235_v2 }
 0x51e   : > { %3460 = vst.msk [vmem:[#allocation5 + $0x60] sm:$0xff] %vm3453_vm8, %v3370_v11  ;;  %v2706_v50 = vpop.permute.xlu0 %2705 }
 0x51f   : > { %2795 = vst.msk [vmem:[#allocation5 + $0x70] sm:$0xff] %vm2787_vm2, %v2706_v50 }
 0x522   : > { %2741 = vrot.lane.b32.xlu1 %v6877_v40, %s8284_s27  ;;  %2844 = vrot.lane.b32.xlu2 %v6563_v35, %s8285_s12 }
 0x524   : > { %v2837_v23 = vpop.permute.xlu1 %2836  ;;  %v3002_v8 = vpop.permute.xlu2 %3001  ;;  %2872 = vrot.lane.b32.xlu0 %v6892_v46, %s8285_s12  ;;  %v8292_v46 = vld [vmem:[#allocation35_spill] sm:$0xff] }
 0x525   : > { %2926 = vst.msk [vmem:[#allocation5 + $0x70] sm:$0xff] %vm2918_vm3, %v2837_v23  ;;  %v3567_v17 = vld [vmem:[#allocation5 + $0x60] sm:$0xff] }
 0x526   : > { %3061 = vst.msk [vmem:[#allocation5 + $0x70] sm:$0xff] %vm3053_vm5, %v2972_v26  ;;  %3771 = vmatmul.f32.gmra.mxu1 %v3567_v17  ;;  %v3106_v36 = vpop.permute.xlu0 %3105  ;;  %v8301_v26 = vld [vmem:[#allocation48_spill] sm:$0xff] }
 0x527   : > { %3195 = vst.msk [vmem:[#allocation5 + $0x70] sm:$0xff] %vm3187_vm6, %v3106_v36 }
 0x52a   : > { %2979 = vrot.lane.b32.xlu1 %v6576_v12, %s8282_s25  ;;  %3007 = vrot.lane.b32.xlu2 %v6912_v63, %s8282_s25  ;;  %v8293_v12 = vld [vmem:[#allocation39_spill] sm:$0xff] }
 0x52c   : > { %v3237_v35 = vpop.permute.xlu1 %3236  ;;  %v3239_v40 = vpop.permute.xlu2 %3238  ;;  %3113 = vrot.lane.b32.xlu0 %v8291_v62, %s8283_s20 }
 0x52d   : > { %3326 = vst.msk [vmem:[#allocation5 + $0x70] sm:$0xff] %vm3318_vm7, %v3237_v35 }
 0x52e   : > { %3461 = vst.msk [vmem:[#allocation5 + $0x70] sm:$0xff] %vm3453_vm8, %v3372_v18  ;;  %v2708_v53 = vpop.permute.xlu0 %2707 }
 0x52f   : > { %2796 = vst.msk [vmem:[#allocation5 + $0x80] sm:$0xff] %vm2787_vm2, %v2708_v53 }
 0x530   : > { %2927 = vst.msk [vmem:[#allocation5 + $0x80] sm:$0xff] %vm2918_vm3, %v2839_v61 }
 0x532   : > { %3141 = vrot.lane.b32.xlu1 %v8292_v46, %s8283_s20  ;;  %3244 = vrot.lane.b32.xlu2 %v8293_v12, %s8286_s26 }
 0x534   : > { %v2736_v63 = vpop.permute.xlu1 %2735  ;;  %v3402_v25 = vpop.permute.xlu2 %3401  ;;  %3272 = vrot.lane.b32.xlu0 %v8294_v37, %s8286_s26 }
 0x535   : > { %2810 = vst.msk [vmem:[#allocation5 + $0x160] sm:$0xff] %vm2787_vm2, %v2736_v63  ;;  %v3569_v19 = vld [vmem:[#allocation5 + $0x70] sm:$0xff] }
 0x536   : > { %3774 = vmatmul.f32.gmra.mxu1 %v3569_v19  ;;  %v2867_v38 = vpop.permute.xlu0 %2866 }
 0x537   : > { %2941 = vst.msk [vmem:[#allocation5 + $0x160] sm:$0xff] %vm2918_vm3, %v2867_v38 }
 0x538   : > { %3076 = vst.msk [vmem:[#allocation5 + $0x160] sm:$0xff] %vm3053_vm5, %v3002_v8 }
 0x53a   : > { %3379 = vrot.lane.b32.xlu1 %v8295_v16, %s8287_s18  ;;  %3407 = vrot.lane.b32.xlu2 %v8296_v55, %s8287_s18 }
 0x53c   : > { %v2974_v56 = vpop.permute.xlu1 %2973  ;;  %v2841_v43 = vpop.permute.xlu2 %2840  ;;  %2715 = vrot.lane.b32.xlu0 %v6579_v13, %s8284_s27 }
 0x53d   : > { %3062 = vst.msk [vmem:[#allocation5 + $0x80] sm:$0xff] %vm3053_vm5, %v2974_v56  ;;  %v8305_v56 = vld [vmem:[#allocation45_spill] sm:$0xff] }
 0x53e   : > { %v3108_v31 = vpop.permute.xlu0 %3107 }
 0x53f   : > { %3196 = vst.msk [vmem:[#allocation5 + $0x80] sm:$0xff] %vm3187_vm6, %v3108_v31 }
 0x540   : > { %3327 = vst.msk [vmem:[#allocation5 + $0x80] sm:$0xff] %vm3318_vm7, %v3239_v40 }
 0x542   : > { %2743 = vrot.lane.b32.xlu1 %v6927_v4, %s8284_s27  ;;  %2846 = vrot.lane.b32.xlu2 %v8288_v10, %s8285_s12 }
 0x544   : > { %v3136_v30 = vpop.permute.xlu1 %3135  ;;  %v3004_v33 = vpop.permute.xlu2 %3003  ;;  %2874 = vrot.lane.b32.xlu0 %v8289_v59, %s8285_s12 }
 0x545   : > { %3210 = vst.msk [vmem:[#allocation5 + $0x160] sm:$0xff] %vm3187_vm6, %v3136_v30 }
 0x546   : > { %v3267_v32 = vpop.permute.xlu0 %3266 }
 0x547   : > { %3341 = vst.msk [vmem:[#allocation5 + $0x160] sm:$0xff] %vm3318_vm7, %v3267_v32 }
 0x548   : > { %3476 = vst.msk [vmem:[#allocation5 + $0x160] sm:$0xff] %vm3453_vm8, %v3402_v25  ;;  %v8303_v25 = vld [vmem:[#allocation37_spill] sm:$0xff] }
 0x54a   : > { %2981 = vrot.lane.b32.xlu1 %v8290_v44, %s8282_s25  ;;  %3009 = vrot.lane.b32.xlu2 %v6932_v5, %s8282_s25 }
 0x54c   : > { %v3374_v13 = vpop.permute.xlu1 %3373  ;;  %v3241_v4 = vpop.permute.xlu2 %3240  ;;  %3115 = vrot.lane.b32.xlu0 %v8297_v41, %s8283_s20 }
 0x54d   : > { %3462 = vst.msk [vmem:[#allocation5 + $0x80] sm:$0xff] %vm3453_vm8, %v3374_v13  ;;  %v8306_v13 = vld [vmem:[#allocation47_spill] sm:$0xff] }
 0x54e   : > { %v2710_v1 = vpop.permute.xlu0 %2709 }
 0x54f   : > { %2797 = vst.msk [vmem:[#allocation5 + $0x90] sm:$0xff] %vm2787_vm2, %v2710_v1  ;;  %v3599_v47 = vld [vmem:[#allocation5 + $0x160] sm:$0xff] }
 0x550   : > { %2928 = vst.msk [vmem:[#allocation5 + $0x90] sm:$0xff] %vm2918_vm3, %v2841_v43  ;;  %3819 = vmatmul.f32.vlgmr.msrb.gmra.mxu3 %v3599_v47 }
 0x552   : > { %3143 = vrot.lane.b32.xlu1 %v8298_v39, %s8283_s20  ;;  %3246 = vrot.lane.b32.xlu2 %v8299_v34, %s8286_s26  ;;  %v3754_v57 = vpop.f32.mrf.mxu1 }
 0x553   : > { %v3755_v10 = vadd.f32 %v7373_v0, %v3754_v57 }
 0x554   : > { %v2738_v5 = vpop.permute.xlu1 %2737  ;;  %v3404_v11 = vpop.permute.xlu2 %3403  ;;  %v3571_v6 = vld [vmem:[#allocation5 + $0x80] sm:$0xff]  ;;  %3274 = vrot.lane.b32.xlu0 %v8301_v26, %s8286_s26 }
 0x555   : > { %2811 = vst.msk [vmem:[#allocation5 + $0x170] sm:$0xff] %vm2787_vm2, %v2738_v5  ;;  %3777 = vmatmul.f32.gmra.mxu1 %v3571_v6  ;;  %v3868_v59 = vadd.f32 %v7017_v52, %v3755_v10 }
 0x556   : > { %v2869_v20 = vpop.permute.xlu0 %2868 }
 0x557   : > { %2942 = vst.msk [vmem:[#allocation5 + $0x170] sm:$0xff] %vm2918_vm3, %v2869_v20  ;;  %v3963_v61 = vmax.f32 %v3868_v59, 0.0 }
 0x558   : > { %3077 = vst.msk [vmem:[#allocation5 + $0x170] sm:$0xff] %vm3053_vm5, %v3004_v33 }
 0x559   : > { %v3996_v17 = vsel %vm3995_vm9, %v3963_v61, 0.0 }
 0x55a   : > { %3381 = vrot.lane.b32.xlu1 %v8302_v58, %s8287_s18  ;;  %3409 = vrot.lane.b32.xlu2 %v6971_v3, %s8287_s18 }
 0x55c   : > { %v2976_v18 = vpop.permute.xlu1 %2975  ;;  %v2843_v21 = vpop.permute.xlu2 %2842  ;;  %2717 = vrot.lane.b32.xlu0 %v8291_v62, %s8284_s27 }
 0x55d   : > { %3063 = vst.msk [vmem:[#allocation5 + $0x90] sm:$0xff] %vm3053_vm5, %v2976_v18  ;;  %v3757_v22 = vpop.f32.mrf.mxu1 }
 0x55e   : > { %v3758_v44 = vadd.f32 %v7373_v0, %v3757_v22  ;;  %v3110_v2 = vpop.permute.xlu0 %3109 }
 0x55f   : > { %3197 = vst.msk [vmem:[#allocation5 + $0x90] sm:$0xff] %vm3187_vm6, %v3110_v2 }
 0x560   : > { %v3871_v50 = vadd.f32 %v7029_v51, %v3758_v44  ;;  %3328 = vst.msk [vmem:[#allocation5 + $0x90] sm:$0xff] %vm3318_vm7, %v3241_v4 }
 0x562   : > { %2745 = vrot.lane.b32.xlu1 %v8292_v46, %s8284_s27  ;;  %2848 = vrot.lane.b32.xlu2 %v8293_v12, %s8285_s12  ;;  %v3964_v52 = vmax.f32 %v3871_v50, 0.0  ;;  %v3873_v12 = vpop.f32.mrf.mxu2 }
 0x564   : > { %v3138_v23 = vpop.permute.xlu1 %3137  ;;  %v3006_v8 = vpop.permute.xlu2 %3005  ;;  %v3997_v36 = vsel %vm3995_vm9, %v3964_v52, 0.0  ;;  %2876 = vrot.lane.b32.xlu0 %v8294_v37, %s8285_s12 }
 0x565   : > { %3211 = vst.msk [vmem:[#allocation5 + $0x170] sm:$0xff] %vm3187_vm6, %v3138_v23  ;;  %v3998_v51 = vadd.f32 %v3997_v36, %v3996_v17  ;;  %v8307_v23 = vld [vmem:[#allocation24_spill] sm:$0xff] }
 0x566   : > { %v3269_v35 = vpop.permute.xlu0 %3268 }
 0x567   : > { %3342 = vst.msk [vmem:[#allocation5 + $0x170] sm:$0xff] %vm3318_vm7, %v3269_v35 }
 0x568   : > { %3477 = vst.msk [vmem:[#allocation5 + $0x170] sm:$0xff] %vm3453_vm8, %v3404_v11 }
 0x56a   : > { %2983 = vrot.lane.b32.xlu1 %v8295_v16, %s8282_s25  ;;  %3011 = vrot.lane.b32.xlu2 %v8296_v55, %s8282_s25  ;;  %v8304_v55 = vld [vmem:[#allocation46_spill] sm:$0xff]  ;;  %v3876_v1 = vpop.f32.mrf.mxu2 }
 0x56b   : > { %v3760_v40 = vpop.f32.mrf.mxu1 }
 0x56c   : > { %v3376_v62 = vpop.permute.xlu1 %3375  ;;  %v3761_v53 = vadd.f32 %v7373_v0, %v3760_v40  ;;  %v3243_v46 = vpop.permute.xlu2 %3242  ;;  %3117 = vrot.lane.b32.xlu0 %v8303_v25, %s8283_s20 }
 0x56d   : > { %3463 = vst.msk [vmem:[#allocation5 + $0x90] sm:$0xff] %vm3453_vm8, %v3376_v62 }
 0x56e   : > { %v3874_v63 = vadd.f32 %v3873_v12, %v3761_v53  ;;  %v2712_v37 = vpop.permute.xlu0 %2711  ;;  %v2952_v53 = vrot.slane %v7220_v9, 1 }
 0x56f   : > { %2798 = vst.msk [vmem:[#allocation5 + $0xa0] sm:$0xff] %vm2787_vm2, %v2712_v37  ;;  %v3601_v38 = vld [vmem:[#allocation5 + $0x170] sm:$0xff] }
 0x570   : > { %v3965_v19 = vmax.f32 %v3874_v63, 0.0  ;;  %2929 = vst.msk [vmem:[#allocation5 + $0xa0] sm:$0xff] %vm2918_vm3, %v2843_v21  ;;  %3822 = vmatmul.f32.gmra.mxu3 %v3601_v38 }
 0x572   : > { %v3999_v16 = vsel %vm3995_vm9, %v3965_v19, 0.0  ;;  %3145 = vrot.lane.b32.xlu1 %v8304_v55, %s8283_s20  ;;  %3248 = vrot.lane.b32.xlu2 %v8305_v56, %s8286_s26  ;;  %v3879_v44 = vpop.f32.mrf.mxu2 }
 0x573   : > { %v4000_v43 = vadd.f32 %v3999_v16, %v3998_v51  ;;  %v8309_v16 = vld [vmem:[#allocation21_spill] sm:$0xff] }
 0x574   : > { %v2740_v31 = vpop.permute.xlu1 %2739  ;;  %v3406_v30 = vpop.permute.xlu2 %3405  ;;  %v3573_v33 = vld [vmem:[#allocation5 + $0x90] sm:$0xff]  ;;  %3276 = vrot.lane.b32.xlu0 %v6958_v28, %s8286_s26 }
 0x575   : > { %2812 = vst.msk [vmem:[#allocation5 + $0x180] sm:$0xff] %vm2787_vm2, %v2740_v31  ;;  %3780 = vmatmul.f32.gmra.mxu1 %v3573_v33 }
 0x576   : > { %v2871_v32 = vpop.permute.xlu0 %2870 }
 0x577   : > { %2943 = vst.msk [vmem:[#allocation5 + $0x180] sm:$0xff] %vm2918_vm3, %v2871_v32 }
 0x578   : > { %3078 = vst.msk [vmem:[#allocation5 + $0x180] sm:$0xff] %vm3053_vm5, %v3006_v8 }
 0x57a   : > { %3383 = vrot.lane.b32.xlu1 %v8306_v13, %s8287_s18  ;;  %3411 = vrot.lane.b32.xlu2 %v6974_v49, %s8287_s18  ;;  %v3763_v4 = vpop.f32.mrf.mxu1  ;;  %v3882_v62 = vpop.f32.mrf.mxu2 }
 0x57b   : > { %v3764_v47 = vadd.f32 %v7373_v0, %v3763_v4 }
 0x57c   : > { %v2978_v5 = vpop.permute.xlu1 %2977  ;;  %v2845_v11 = vpop.permute.xlu2 %2844  ;;  %2719 = vrot.lane.b32.xlu0 %v8297_v41, %s8284_s27 }
 0x57d   : > { %v3877_v6 = vadd.f32 %v3876_v1, %v3764_v47  ;;  %3064 = vst.msk [vmem:[#allocation5 + $0xa0] sm:$0xff] %vm3053_vm5, %v2978_v5 }
 0x57e   : > { %v3112_v20 = vpop.permute.xlu0 %3111 }
 0x57f   : > { %v3966_v57 = vmax.f32 %v3877_v6, 0.0  ;;  %3198 = vst.msk [vmem:[#allocation5 + $0xa0] sm:$0xff] %vm3187_vm6, %v3112_v20 }
 0x580   : > { %3329 = vst.msk [vmem:[#allocation5 + $0xa0] sm:$0xff] %vm3318_vm7, %v3243_v46  ;;  %v2953_v46 = vrot.slane %v7222_v29, 1 }
 0x581   : > { %v4001_v10 = vsel %vm3995_vm9, %v3966_v57, 0.0 }
 0x582   : > { %v4002_v18 = vadd.f32 %v4001_v10, %v4000_v43  ;;  %2747 = vrot.lane.b32.xlu1 %v8298_v39, %s8284_s27  ;;  %2850 = vrot.lane.b32.xlu2 %v8299_v34, %s8285_s12  ;;  %v7466_v37 = vsel %vm640_vm1, %v2952_v53, %v2953_v46  ;;  %v3885_v5 = vpop.f32.mrf.mxu2 }
 0x584   : > { %v3140_v21 = vpop.permute.xlu1 %3139  ;;  %v3008_v59 = vpop.permute.xlu2 %3007  ;;  %2878 = vrot.lane.b32.xlu0 %v8301_v26, %s8285_s12 }
 0x585   : > { %3212 = vst.msk [vmem:[#allocation5 + $0x180] sm:$0xff] %vm3187_vm6, %v3140_v21  ;;  %v3766_v41 = vpop.f32.mrf.mxu1  ;;  %v8311_v21 = vld [vmem:[#allocation32_spill] sm:$0xff] }
 0x586   : > { %v3767_v22 = vadd.f32 %v7373_v0, %v3766_v41  ;;  %v3271_v2 = vpop.permute.xlu0 %3270 }
 0x587   : > { %3343 = vst.msk [vmem:[#allocation5 + $0x180] sm:$0xff] %vm3318_vm7, %v3271_v2 }
 0x588   : > { %v3880_v61 = vadd.f32 %v3879_v44, %v3767_v22  ;;  %3478 = vst.msk [vmem:[#allocation5 + $0x180] sm:$0xff] %vm3453_vm8, %v3406_v30 }
 0x58a   : > { %2985 = vrot.lane.b32.xlu1 %v8302_v58, %s8282_s25  ;;  %3013 = vrot.lane.b32.xlu2 %v6971_v3, %s8282_s25  ;;  %v3967_v39 = vmax.f32 %v3880_v61, 0.0  ;;  %v8308_v3 = vld [vmem:[#allocation13_spill] sm:$0xff]  ;;  %v3888_v2 = vpop.f32.mrf.mxu2  ;;  %v2955_v61 = vrot.slane %v7226_v14, 1 }
 0x58c   : > { %v3378_v34 = vpop.permute.xlu1 %3377  ;;  %v3245_v50 = vpop.permute.xlu2 %3244  ;;  %v4003_v26 = vsel %vm3995_vm9, %v3967_v39, 0.0  ;;  %3119 = vrot.lane.b32.xlu0 %v8307_v23, %s8283_s20 }
 0x58d   : > { %3464 = vst.msk [vmem:[#allocation5 + $0xa0] sm:$0xff] %vm3453_vm8, %v3378_v34  ;;  %v4004_v52 = vadd.f32 %v4003_v26, %v4002_v18  ;;  %v7510_v26 = vsel %vm640_vm1, %v2953_v46, %v2955_v61 }
 0x58e   : > { %v2714_v8 = vpop.permute.xlu0 %2713 }
 0x58f   : > { %2799 = vst.msk [vmem:[#allocation5 + $0xb0] sm:$0xff] %vm2787_vm2, %v2714_v8  ;;  %v3603_v58 = vld [vmem:[#allocation5 + $0x180] sm:$0xff]  ;;  %v8313_v8 = vld [vmem:[#allocation27_spill] sm:$0xff] }
 0x590   : > { %2930 = vst.msk [vmem:[#allocation5 + $0xb0] sm:$0xff] %vm2918_vm3, %v2845_v11  ;;  %3825 = vmatmul.f32.gmra.mxu3 %v3603_v58 }
 0x592   : > { %3147 = vrot.lane.b32.xlu1 %v6978_v60, %s8283_s20  ;;  %3250 = vrot.lane.b32.xlu2 %v8308_v3, %s8286_s26 }
 0x593   : > { %v3769_v17 = vpop.f32.mrf.mxu1 }
 0x594   : > { %v2742_v36 = vpop.permute.xlu1 %2741  ;;  %v3408_v51 = vpop.permute.xlu2 %3407  ;;  %v3770_v35 = vadd.f32 %v7373_v0, %v3769_v17  ;;  %v3575_v40 = vld [vmem:[#allocation5 + $0xa0] sm:$0xff]  ;;  %3278 = vrot.lane.b32.xlu0 %v7220_v9, %s8286_s26 }
 0x595   : > { %2813 = vst.msk [vmem:[#allocation5 + $0x190] sm:$0xff] %vm2787_vm2, %v2742_v36  ;;  %3783 = vmatmul.f32.gmra.mxu1 %v3575_v40  ;;  %v2319_v36 = vld [vmem:[#allocation3 + $0x198] sm:$0xff] }
 0x596   : > { %v3883_v12 = vadd.f32 %v3882_v62, %v3770_v35  ;;  %v2873_v19 = vpop.permute.xlu0 %2872  ;;  %v3486_v35 = vrot.slane %v2319_v36, 2 }
 0x597   : > { %2944 = vst.msk [vmem:[#allocation5 + $0x190] sm:$0xff] %vm2918_vm3, %v2873_v19 }
 0x598   : > { %v3968_v63 = vmax.f32 %v3883_v12, 0.0  ;;  %3079 = vst.msk [vmem:[#allocation5 + $0x190] sm:$0xff] %vm3053_vm5, %v3008_v59 }
 0x59a   : > { %v4005_v38 = vsel %vm3995_vm9, %v3968_v63, 0.0  ;;  %3385 = vrot.lane.b32.xlu1 %v8309_v16, %s8287_s18  ;;  %3413 = vrot.lane.b32.xlu2 %v7466_v37, %s8287_s18  ;;  %v8314_v63 = vld [vmem:[#allocation20_spill] sm:$0xff] }
 0x59b   : > { %v4006_v43 = vadd.f32 %v4005_v38, %v4004_v52  ;;  %v8315_v38 = vld [vmem:[#allocation17_spill] sm:$0xff] }
 0x59c   : > { %v2980_v31 = vpop.permute.xlu1 %2979  ;;  %v2847_v30 = vpop.permute.xlu2 %2846  ;;  %2721 = vrot.lane.b32.xlu0 %v8303_v25, %s8284_s27 }
 0x59d   : > { %3065 = vst.msk [vmem:[#allocation5 + $0xb0] sm:$0xff] %vm3053_vm5, %v2980_v31  ;;  %v3352_v31 = vrot.slane %v2319_v36, 1 }
 0x59e   : > { %v3114_v33 = vpop.permute.xlu0 %3113 }
 0x59f   : > { %3199 = vst.msk [vmem:[#allocation5 + $0xb0] sm:$0xff] %vm3187_vm6, %v3114_v33 }
 0x5a0   : > { %3330 = vst.msk [vmem:[#allocation5 + $0xb0] sm:$0xff] %vm3318_vm7, %v3245_v50 }
 0x5a2   : > { %2749 = vrot.lane.b32.xlu1 %v8304_v55, %s8284_s27  ;;  %2852 = vrot.lane.b32.xlu2 %v8305_v56, %s8285_s12 }
 0x5a3   : > { %v3772_v32 = vpop.f32.mrf.mxu1 }
 0x5a4   : > { %v3142_v4 = vpop.permute.xlu1 %3141  ;;  %v3010_v1 = vpop.permute.xlu2 %3009  ;;  %v3773_v47 = vadd.f32 %v7373_v0, %v3772_v32  ;;  %2880 = vrot.lane.b32.xlu0 %v6958_v28, %s8285_s12  ;;  %v8310_v28 = vld [vmem:[#allocation49_spill] sm:$0xff] }
 0x5a5   : > { %3213 = vst.msk [vmem:[#allocation5 + $0x190] sm:$0xff] %vm3187_vm6, %v3142_v4 }
 0x5a6   : > { %v3886_v25 = vadd.f32 %v3885_v5, %v3773_v47  ;;  %v3273_v6 = vpop.permute.xlu0 %3272 }
 0x5a7   : > { %3344 = vst.msk [vmem:[#allocation5 + $0x190] sm:$0xff] %vm3318_vm7, %v3273_v6  ;;  %v8316_v6 = vld [vmem:[#allocation36_spill] sm:$0xff] }
 0x5a8   : > { %v3969_v11 = vmax.f32 %v3886_v25, 0.0  ;;  %3479 = vst.msk [vmem:[#allocation5 + $0x190] sm:$0xff] %vm3453_vm8, %v3408_v51  ;;  %v7520_v51 = vld [vmem:[#allocation3 + $0x1a0] sm:$0xff] }
 0x5a9   : > { %v3487_v40 = vrot.slane %v7520_v51, 2 }
 0x5aa   : > { %v4007_v55 = vsel %vm3995_vm9, %v3969_v11, 0.0  ;;  %2987 = vrot.lane.b32.xlu1 %v8306_v13, %s8282_s25  ;;  %3015 = vrot.lane.b32.xlu2 %v6974_v49, %s8282_s25  ;;  %v8312_v13 = vld [vmem:[#allocation16_spill] sm:$0xff] }
 0x5ab   : > { %v4008_v56 = vadd.f32 %v4007_v55, %v4006_v43  ;;  %v3488_v53 = vsel %vm850_vm4, %v3486_v35, %v3487_v40  ;;  %v8319_v35 = vld [vmem:[#allocation19_spill] sm:$0xff] }
 0x5ac   : > { %v3380_v57 = vpop.permute.xlu1 %3379  ;;  %v3247_v20 = vpop.permute.xlu2 %3246  ;;  %3121 = vrot.lane.b32.xlu0 %v8310_v28, %s8283_s20  ;;  %3553 = vst.msk [vmem:[#allocation5 + $0x1e8] sm:$0xff] %vm2147_vm14, %v3488_v53 }
 0x5ad   : > { %3465 = vst.msk [vmem:[#allocation5 + $0xb0] sm:$0xff] %vm3453_vm8, %v3380_v57  ;;  %v2321_v57 = vld [vmem:[#allocation3 + $0x1a8] sm:$0x3] }
 0x5ae   : > { %v2716_v10 = vpop.permute.xlu0 %2715 }
 0x5af   : > { %2800 = vst.msk [vmem:[#allocation5 + $0xc0] sm:$0xff] %vm2787_vm2, %v2716_v10  ;;  %v3605_v18 = vld [vmem:[#allocation5 + $0x190] sm:$0xff] }
 0x5b0   : > { %2931 = vst.msk [vmem:[#allocation5 + $0xc0] sm:$0xff] %vm2918_vm3, %v2847_v30  ;;  %3828 = vmatmul.f32.gmra.mxu3 %v3605_v18  ;;  %v3353_v30 = vrot.slane %v7520_v51, 1 }
 0x5b2   : > { %3149 = vrot.lane.b32.xlu1 %v8311_v21, %s8283_s20  ;;  %3252 = vrot.lane.b32.xlu2 %v8312_v13, %s8286_s26  ;;  %v3354_v47 = vsel %vm640_vm1, %v3352_v31, %v3353_v30 }
 0x5b3   : > { %v3775_v49 = vpop.f32.mrf.mxu1 }
 0x5b4   : > { %v2744_v59 = vpop.permute.xlu1 %2743  ;;  %v3410_v41 = vpop.permute.xlu2 %3409  ;;  %v3776_v22 = vadd.f32 %v7373_v0, %v3775_v49  ;;  %v3577_v44 = vld [vmem:[#allocation5 + $0xb0] sm:$0xff]  ;;  %3280 = vrot.lane.b32.xlu0 %v7222_v29, %s8286_s26 }
 0x5b5   : > { %2814 = vst.msk [vmem:[#allocation5 + $0x1a0] sm:$0xff] %vm2787_vm2, %v2744_v59  ;;  %3786 = vmatmul.f32.gmra.mxu1 %v3577_v44  ;;  %v8318_v44 = vld [vmem:[#allocation33_spill] sm:$0xff] }
 0x5b6   : > { %v3889_v39 = vadd.f32 %v3888_v2, %v3776_v22  ;;  %v2875_v50 = vpop.permute.xlu0 %2874 }
 0x5b7   : > { %2945 = vst.msk [vmem:[#allocation5 + $0x1a0] sm:$0xff] %vm2918_vm3, %v2875_v50 }
 0x5b8   : > { %v3970_v34 = vmax.f32 %v3889_v39, 0.0  ;;  %3080 = vst.msk [vmem:[#allocation5 + $0x1a0] sm:$0xff] %vm3053_vm5, %v3010_v1 }
 0x5ba   : > { %v4009_v52 = vsel %vm3995_vm9, %v3970_v34, 0.0  ;;  %3387 = vrot.lane.b32.xlu1 %v8313_v8, %s8287_s18  ;;  %3415 = vrot.lane.b32.xlu2 %v7510_v26, %s8287_s18  ;;  %v3355_v34 = vrot.slane %v2321_v57, 1 }
 0x5bb   : > { %v4010_v14 = vadd.f32 %v4009_v52, %v4008_v56 }
 0x5bc   : > { %v2982_v58 = vpop.permute.xlu1 %2981  ;;  %v2849_v17 = vpop.permute.xlu2 %2848  ;;  %2723 = vrot.lane.b32.xlu0 %v8307_v23, %s8284_s27 }
 0x5bd   : > { %3066 = vst.msk [vmem:[#allocation5 + $0xc0] sm:$0xff] %vm3053_vm5, %v2982_v58 }
 0x5be   : > { %v3116_v62 = vpop.permute.xlu0 %3115 }
 0x5bf   : > { %3200 = vst.msk [vmem:[#allocation5 + $0xc0] sm:$0xff] %vm3187_vm6, %v3116_v62 }
 0x5c0   : > { %3331 = vst.msk [vmem:[#allocation5 + $0xc0] sm:$0xff] %vm3318_vm7, %v3247_v20  ;;  %v3489_v20 = vrot.slane %v2321_v57, 2 }
 0x5c2   : > { %2751 = vrot.lane.b32.xlu1 %v6978_v60, %s8284_s27  ;;  %2854 = vrot.lane.b32.xlu2 %v8308_v3, %s8285_s12  ;;  %v3490_v18 = vsel %vm850_vm4, %v3487_v40, %v3489_v20  ;;  %vm4100_vm4 = vcmask 73728  }
 0x5c3   : > { %3554 = vst.msk [vmem:[#allocation5 + $0x1f8] sm:$0xff] %vm2147_vm14, %v3490_v18 }
 0x5c4   : > { %v3144_v46 = vpop.permute.xlu1 %3143  ;;  %v3012_v23 = vpop.permute.xlu2 %3011  ;;  %2882 = vrot.lane.b32.xlu0 %v7220_v9, %s8285_s12 }
 0x5c5   : > { %3214 = vst.msk [vmem:[#allocation5 + $0x1a0] sm:$0xff] %vm3187_vm6, %v3144_v46 }
 0x5c6   : > { %v3275_v12 = vpop.permute.xlu0 %3274 }
 0x5c7   : > { %3345 = vst.msk [vmem:[#allocation5 + $0x1a0] sm:$0xff] %vm3318_vm7, %v3275_v12 }
 0x5c8   : > { %3480 = vst.msk [vmem:[#allocation5 + $0x1a0] sm:$0xff] %vm3453_vm8, %v3410_v41  ;;  %v8317_v41 = vld [vmem:[#allocation22_spill] sm:$0xff] }
 0x5ca   : > { %2989 = vrot.lane.b32.xlu1 %v8309_v16, %s8282_s25  ;;  %3017 = vrot.lane.b32.xlu2 %v7466_v37, %s8282_s25  ;;  %v3891_v16 = vpop.f32.mrf.mxu2 }
 0x5cc   : > { %v3382_v60 = vpop.permute.xlu1 %3381  ;;  %v3249_v3 = vpop.permute.xlu2 %3248  ;;  %3123 = vrot.lane.b32.xlu0 %v8314_v63, %s8283_s20 }
 0x5cd   : > { %3466 = vst.msk [vmem:[#allocation5 + $0xc0] sm:$0xff] %vm3453_vm8, %v3382_v60  ;;  %v8321_v60 = vld [vmem:[#allocation23_spill] sm:$0xff] }
 0x5ce   : > { %v2718_v19 = vpop.permute.xlu0 %2717 }
 0x5cf   : > { %2801 = vst.msk [vmem:[#allocation5 + $0xd0] sm:$0xff] %vm2787_vm2, %v2718_v19  ;;  %v3607_v9 = vld [vmem:[#allocation5 + $0x1a0] sm:$0xff] }
 0x5d0   : > { %2932 = vst.msk [vmem:[#allocation5 + $0xd0] sm:$0xff] %vm2918_vm3, %v2849_v17  ;;  %3831 = vmatmul.f32.gmra.mxu3 %v3607_v9 }
 0x5d2   : > { %3151 = vrot.lane.b32.xlu1 %v7235_v48, %s8283_s20  ;;  %3254 = vrot.lane.b32.xlu2 %v8315_v38, %s8286_s26  ;;  %v3778_v37 = vpop.f32.mrf.mxu1  ;;  %v3894_v61 = vpop.f32.mrf.mxu2 }
 0x5d3   : > { %v3779_v43 = vadd.f32 %v7373_v0, %v3778_v37 }
 0x5d4   : > { %v2746_v33 = vpop.permute.xlu1 %2745  ;;  %v3412_v32 = vpop.permute.xlu2 %3411  ;;  %v3579_v4 = vld [vmem:[#allocation5 + $0xc0] sm:$0xff]  ;;  %3282 = vrot.lane.b32.xlu0 %v2319_v36, %s8286_s26 }
 0x5d5   : > { %v3892_v1 = vadd.f32 %v3891_v16, %v3779_v43  ;;  %2815 = vst.msk [vmem:[#allocation5 + $0x1b0] sm:$0xff] %vm2787_vm2, %v2746_v33  ;;  %3789 = vmatmul.f32.gmra.mxu1 %v3579_v4  ;;  %v8323_v4 = vld [vmem:[#allocation30_spill] sm:$0xff] }
 0x5d6   : > { %v2877_v5 = vpop.permute.xlu0 %2876 }
 0x5d7   : > { %v3971_v48 = vmax.f32 %v3892_v1, 0.0  ;;  %2946 = vst.msk [vmem:[#allocation5 + $0x1b0] sm:$0xff] %vm2918_vm3, %v2877_v5 }
 0x5d8   : > { %3081 = vst.msk [vmem:[#allocation5 + $0x1b0] sm:$0xff] %vm3053_vm5, %v3012_v23  ;;  %v8320_v23 = vld [vmem:[#allocation28_spill] sm:$0xff] }
 0x5d9   : > { %v4011_v25 = vsel %vm3995_vm9, %v3971_v48, 0.0 }
 0x5da   : > { %v4012_v11 = vadd.f32 %v4011_v25, %v4010_v14  ;;  %3389 = vrot.lane.b32.xlu1 %v8316_v6, %s8287_s18  ;;  %3417 = vrot.lane.b32.xlu2 %v3354_v47, %s8287_s18  ;;  %v3356_v14 = vsel %vm640_vm1, %v3353_v30, %v3355_v34  ;;  %v3897_v16 = vpop.f32.mrf.mxu2  ;;  %v8324_v25 = vld [vmem:[#allocation29_spill] sm:$0xff]  ;;  %vm4066_vm1 = vcmask 516096  }
 0x5dc   : > { %v2984_v55 = vpop.permute.xlu1 %2983  ;;  %v2851_v56 = vpop.permute.xlu2 %2850  ;;  %2725 = vrot.lane.b32.xlu0 %v8310_v28, %s8284_s27 }
 0x5dd   : > { %3067 = vst.msk [vmem:[#allocation5 + $0xd0] sm:$0xff] %vm3053_vm5, %v2984_v55 }
 0x5de   : > { %v3118_v10 = vpop.permute.xlu0 %3117 }
 0x5df   : > { %3201 = vst.msk [vmem:[#allocation5 + $0xd0] sm:$0xff] %vm3187_vm6, %v3118_v10 }
 0x5e0   : > { %3332 = vst.msk [vmem:[#allocation5 + $0xd0] sm:$0xff] %vm3318_vm7, %v3249_v3  ;;  %v8322_v3 = vld [vmem:[#allocation25_spill] sm:$0xff] }
 0x5e2   : > { %2753 = vrot.lane.b32.xlu1 %v8311_v21, %s8284_s27  ;;  %2856 = vrot.lane.b32.xlu2 %v8312_v13, %s8285_s12 }
 0x5e4   : > { %v3146_v49 = vpop.permute.xlu1 %3145  ;;  %v3014_v59 = vpop.permute.xlu2 %3013  ;;  %2884 = vrot.lane.b32.xlu0 %v7222_v29, %s8285_s12 }
 0x5e5   : > { %3215 = vst.msk [vmem:[#allocation5 + $0x1b0] sm:$0xff] %vm3187_vm6, %v3146_v49 }
 0x5e6   : > { %v3277_v28 = vpop.permute.xlu0 %3276 }
 0x5e7   : > { %3346 = vst.msk [vmem:[#allocation5 + $0x1b0] sm:$0xff] %vm3318_vm7, %v3277_v28 }
 0x5e8   : > { %3481 = vst.msk [vmem:[#allocation5 + $0x1b0] sm:$0xff] %vm3453_vm8, %v3412_v32 }
 0x5ea   : > { %2991 = vrot.lane.b32.xlu1 %v8313_v8, %s8282_s25  ;;  %3019 = vrot.lane.b32.xlu2 %v7510_v26, %s8282_s25 }
 0x5ec   : > { %v3384_v21 = vpop.permute.xlu1 %3383  ;;  %v3251_v13 = vpop.permute.xlu2 %3250  ;;  %3125 = vrot.lane.b32.xlu0 %v8317_v41, %s8283_s20 }
 0x5ed   : > { %3467 = vst.msk [vmem:[#allocation5 + $0xd0] sm:$0xff] %vm3453_vm8, %v3384_v21 }
 0x5ee   : > { %v2720_v22 = vpop.permute.xlu0 %2719 }
 0x5ef   : > { %2802 = vst.msk [vmem:[#allocation5 + $0xe0] sm:$0xff] %vm2787_vm2, %v2720_v22  ;;  %v3609_v29 = vld [vmem:[#allocation5 + $0x1b0] sm:$0xff] }
 0x5f0   : > { %2933 = vst.msk [vmem:[#allocation5 + $0xe0] sm:$0xff] %vm2918_vm3, %v2851_v56  ;;  %3834 = vmatmul.f32.gmra.mxu3 %v3609_v29 }
 0x5f2   : > { %3153 = vrot.lane.b32.xlu1 %v7239_v24, %s8283_s20  ;;  %3256 = vrot.lane.b32.xlu2 %v8318_v44, %s8286_s26  ;;  %v3781_v2 = vpop.f32.mrf.mxu1 }
 0x5f3   : > { %v3782_v39 = vadd.f32 %v7373_v0, %v3781_v2 }
 0x5f4   : > { %v2748_v50 = vpop.permute.xlu1 %2747  ;;  %v3414_v26 = vpop.permute.xlu2 %3413  ;;  %v3581_v52 = vld [vmem:[#allocation5 + $0xd0] sm:$0xff]  ;;  %3284 = vrot.lane.b32.xlu0 %v7520_v51, %s8286_s26 }
 0x5f5   : > { %v3895_v8 = vadd.f32 %v3894_v61, %v3782_v39  ;;  %2816 = vst.msk [vmem:[#allocation5 + $0x1c0] sm:$0xff] %vm2787_vm2, %v2748_v50  ;;  %3792 = vmatmul.f32.gmra.mxu1 %v3581_v52 }
 0x5f6   : > { %v2879_v58 = vpop.permute.xlu0 %2878 }
 0x5f7   : > { %v3972_v24 = vmax.f32 %v3895_v8, 0.0  ;;  %2947 = vst.msk [vmem:[#allocation5 + $0x1c0] sm:$0xff] %vm2918_vm3, %v2879_v58 }
 0x5f8   : > { %3082 = vst.msk [vmem:[#allocation5 + $0x1c0] sm:$0xff] %vm3053_vm5, %v3014_v59 }
 0x5f9   : > { %v4013_v17 = vsel %vm3995_vm9, %v3972_v24, 0.0 }
 0x5fa   : > { %v4014_v36 = vadd.f32 %v4013_v17, %v4012_v11  ;;  %3391 = vrot.lane.b32.xlu1 %v8319_v35, %s8287_s18  ;;  %3419 = vrot.lane.b32.xlu2 %v3356_v14, %s8287_s18  ;;  %v8325_v11 = vld [vmem:[#allocation38_spill] sm:$0xff] }
 0x5fc   : > { %v2986_v40 = vpop.permute.xlu1 %2985  ;;  %v2853_v62 = vpop.permute.xlu2 %2852  ;;  %2727 = vrot.lane.b32.xlu0 %v8314_v63, %s8284_s27 }
 0x5fd   : > { %3068 = vst.msk [vmem:[#allocation5 + $0xe0] sm:$0xff] %vm3053_vm5, %v2986_v40 }
 0x5fe   : > { %v3120_v51 = vpop.permute.xlu0 %3119 }
 0x5ff   : > { %3202 = vst.msk [vmem:[#allocation5 + $0xe0] sm:$0xff] %vm3187_vm6, %v3120_v51 }
 0x600   : > { %3333 = vst.msk [vmem:[#allocation5 + $0xe0] sm:$0xff] %vm3318_vm7, %v3251_v13 }
 0x602   : > { %2858 = vrot.lane.b32.xlu1 %v8315_v38, %s8285_s12  ;;  %2993 = vrot.lane.b32.xlu2 %v8316_v6, %s8282_s25 }
 0x604   : > { %v3148_v53 = vpop.permute.xlu1 %3147  ;;  %v3016_v46 = vpop.permute.xlu2 %3015  ;;  %3127 = vrot.lane.b32.xlu0 %v8320_v23, %s8283_s20 }
 0x605   : > { %3216 = vst.msk [vmem:[#allocation5 + $0x1c0] sm:$0xff] %vm3187_vm6, %v3148_v53  ;;  %v3900_v53 = vpop.f32.mrf.mxu2 }
 0x606   : > { %v3279_v12 = vpop.permute.xlu0 %3278 }
 0x607   : > { %3347 = vst.msk [vmem:[#allocation5 + $0x1c0] sm:$0xff] %vm3318_vm7, %v3279_v12  ;;  %v3608_v12 = vld [vmem:[#allocation5 + $0x1a8] sm:$0xff] }
 0x608   : > { %3482 = vst.msk [vmem:[#allocation5 + $0x1c0] sm:$0xff] %vm3453_vm8, %v3414_v26 }
 0x60a   : > { %3258 = vrot.lane.b32.xlu1 %v8321_v60, %s8286_s26  ;;  %3393 = vrot.lane.b32.xlu2 %v8322_v3, %s8287_s18 }
 0x60c   : > { %v3386_v63 = vpop.permute.xlu1 %3385  ;;  %v3253_v19 = vpop.permute.xlu2 %3252  ;;  %2729 = vrot.lane.b32.xlu0 %v8317_v41, %s8284_s27 }
 0x60d   : > { %3468 = vst.msk [vmem:[#allocation5 + $0xe0] sm:$0xff] %vm3453_vm8, %v3386_v63 }
 0x60e   : > { %v2722_v9 = vpop.permute.xlu0 %2721 }
 0x60f   : > { %2803 = vst.msk [vmem:[#allocation5 + $0xf0] sm:$0xff] %vm2787_vm2, %v2722_v9  ;;  %v3611_v38 = vld [vmem:[#allocation5 + $0x1c0] sm:$0xff] }
 0x610   : > { %2934 = vst.msk [vmem:[#allocation5 + $0xf0] sm:$0xff] %vm2918_vm3, %v2853_v62  ;;  %3837 = vmatmul.f32.gmra.mxu3 %v3611_v38  ;;  %v3610_v38 = vld [vmem:[#allocation5 + $0x1b8] sm:$0xff] }
 0x612   : > { %2860 = vrot.lane.b32.xlu1 %v8318_v44, %s8285_s12  ;;  %2995 = vrot.lane.b32.xlu2 %v8319_v35, %s8282_s25  ;;  %v3784_v37 = vpop.f32.mrf.mxu1 }
 0x613   : > { %v3785_v43 = vadd.f32 %v7373_v0, %v3784_v37 }
 0x614   : > { %v2750_v31 = vpop.permute.xlu1 %2749  ;;  %v3416_v30 = vpop.permute.xlu2 %3415  ;;  %v3583_v33 = vld [vmem:[#allocation5 + $0xe0] sm:$0xff]  ;;  %3129 = vrot.lane.b32.xlu0 %v8323_v4, %s8283_s20 }
 0x615   : > { %v3898_v32 = vadd.f32 %v3897_v16, %v3785_v43  ;;  %2817 = vst.msk [vmem:[#allocation5 + $0x1d0] sm:$0xff] %vm2787_vm2, %v2750_v31  ;;  %3795 = vmatmul.f32.gmra.mxu1 %v3583_v33 }
 0x616   : > { %v2881_v48 = vpop.permute.xlu0 %2880 }
 0x617   : > { %v3973_v1 = vmax.f32 %v3898_v32, 0.0  ;;  %2948 = vst.msk [vmem:[#allocation5 + $0x1d0] sm:$0xff] %vm2918_vm3, %v2881_v48  ;;  %v3612_v48 = vld [vmem:[#allocation5 + $0x1c8] sm:$0xff] }
 0x618   : > { %3083 = vst.msk [vmem:[#allocation5 + $0x1d0] sm:$0xff] %vm3053_vm5, %v3016_v46 }
 0x619   : > { %v4015_v47 = vsel %vm3995_vm9, %v3973_v1, 0.0 }
 0x61a   : > { %v7639_v5 = vadd.f32 %v4015_v47, %v4014_v36  ;;  %3260 = vrot.lane.b32.xlu1 %v8324_v25, %s8286_s26  ;;  %3395 = vrot.lane.b32.xlu2 %v8325_v11, %s8287_s18 }
 0x61c   : > { %v2988_v6 = vpop.permute.xlu1 %2987  ;;  %v2855_v55 = vpop.permute.xlu2 %2854  ;;  %2731 = vrot.lane.b32.xlu0 %v8320_v23, %s8284_s27 }
 0x61d   : > { %3069 = vst.msk [vmem:[#allocation5 + $0xf0] sm:$0xff] %vm3053_vm5, %v2988_v6 }
 0x61e   : > { %v3122_v56 = vpop.permute.xlu0 %3121 }
 0x61f   : > { %3203 = vst.msk [vmem:[#allocation5 + $0xf0] sm:$0xff] %vm3187_vm6, %v3122_v56 }
 0x620   : > { %3334 = vst.msk [vmem:[#allocation5 + $0xf0] sm:$0xff] %vm3318_vm7, %v3253_v19  ;;  %v3903_v19 = vpop.f32.mrf.mxu2 }
 0x622   : > { %2862 = vrot.lane.b32.xlu1 %v8321_v60, %s8285_s12  ;;  %2997 = vrot.lane.b32.xlu2 %v8322_v3, %s8282_s25 }
 0x624   : > { %v3150_v57 = vpop.permute.xlu1 %3149  ;;  %v3018_v20 = vpop.permute.xlu2 %3017  ;;  %3131 = vrot.lane.b32.xlu0 %v6814_v7, %s8283_s20 }
 0x625   : > { %3217 = vst.msk [vmem:[#allocation5 + $0x1d0] sm:$0xff] %vm3187_vm6, %v3150_v57 }
 0x626   : > { %v3281_v10 = vpop.permute.xlu0 %3280 }
 0x627   : > { %3348 = vst.msk [vmem:[#allocation5 + $0x1d0] sm:$0xff] %vm3318_vm7, %v3281_v10 }
 0x628   : > { %3483 = vst.msk [vmem:[#allocation5 + $0x1d0] sm:$0xff] %vm3453_vm8, %v3416_v30  ;;  %v3906_v47 = vpop.f32.mrf.mxu2 }
 0x62a   : > { %3262 = vrot.lane.b32.xlu1 %v6828_v54, %s8286_s26  ;;  %3397 = vrot.lane.b32.xlu2 %v6864_v42, %s8287_s18 }
 0x62c   : > { %v3388_v18 = vpop.permute.xlu1 %3387  ;;  %v3255_v49 = vpop.permute.xlu2 %3254  ;;  %2733 = vrot.lane.b32.xlu0 %v8323_v4, %s8284_s27 }
 0x62d   : > { %3469 = vst.msk [vmem:[#allocation5 + $0xf0] sm:$0xff] %vm3453_vm8, %v3388_v18 }
 0x62e   : > { %v2724_v59 = vpop.permute.xlu0 %2723 }
 0x62f   : > { %2804 = vst.msk [vmem:[#allocation5 + $0x100] sm:$0xff] %vm2787_vm2, %v2724_v59  ;;  %v3613_v7 = vld [vmem:[#allocation5 + $0x1d0] sm:$0xff] }
 0x630   : > { %2935 = vst.msk [vmem:[#allocation5 + $0x100] sm:$0xff] %vm2918_vm3, %v2855_v55  ;;  %3840 = vmatmul.f32.gmra.mxu3 %v3613_v7 }
 0x632   : > { %2864 = vrot.lane.b32.xlu1 %v8324_v25, %s8285_s12  ;;  %2999 = vrot.lane.b32.xlu2 %v8325_v11, %s8282_s25  ;;  %v3787_v46 = vpop.f32.mrf.mxu1  ;;  %s355_s12 = scalar_lea.vmem [#allocation6], %s7843_s21 }
 0x633   : > { %v3788_v16 = vadd.f32 %v7373_v0, %v3787_v46 }
 0x634   : > { %v2752_v42 = vpop.permute.xlu1 %2751  ;;  %v3585_v54 = vld [vmem:[#allocation5 + $0xf0] sm:$0xff]  ;;  %v3418_v28 = vpop.permute.xlu2 %3417  ;;  %3133 = vrot.lane.b32.xlu0 %v6804_v45, %s8283_s20  ;;  %s4130_s20 = scalar_lea.hbm %s7938_s7, %s4684_s17 }
 0x635   : > { %2818 = vst.msk [vmem:[#allocation5 + $0x1e0] sm:$0xff] %vm2787_vm2, %v2752_v42  ;;  %3798 = vmatmul.f32.gmra.mxu1 %v3585_v54  ;;  %v3901_v4 = vadd.f32 %v3900_v53, %v3788_v16  ;;  %v3909_v54 = vpop.f32.mrf.mxu2 }
 0x636   : > { %v2883_v21 = vpop.permute.xlu0 %2882 }
 0x637   : > { %2949 = vst.msk [vmem:[#allocation5 + $0x1e0] sm:$0xff] %vm2918_vm3, %v2883_v21  ;;  %v3974_v6 = vmax.f32 %v3901_v4, 0.0 }
 0x638   : > { %3084 = vst.msk [vmem:[#allocation5 + $0x1e0] sm:$0xff] %vm3053_vm5, %v3018_v20 }
 0x639   : > { %v4017_v10 = vsel %vm3995_vm9, %v3974_v6, 0.0 }
 0x63a   : > { %3264 = vrot.lane.b32.xlu1 %v6854_v15, %s8286_s26  ;;  %3399 = vrot.lane.b32.xlu2 %v6867_v27, %s8287_s18  ;;  %s4132_s26 = sshll.u32 %s355_s12, 4  ;;  %s4134_s18 = sshll.u32 %s4130_s20, 4  ;;  %s4133_s26 = int_to_ptr.vmem [resolvable:$true] %s4132_s26  ;;  %s4135_s18 = int_to_ptr.hbm [resolvable:$true] %s4134_s18 }
 0x63b   : > { %s4483_s0 = sshra.s32 %s4135_s18, 4  ;;  %s4489_s20 = scalar_lea.hbm %s7938_s7, 2  ;;  %s4484_s0 = int_to_ptr.hbm [resolvable:$true] %s4483_s0 }
 0x63c   : > { %v2990_v13 = vpop.permute.xlu1 %2989  ;;  %v2857_v41 = vpop.permute.xlu2 %2856  ;;  %s4485_s11 = scalar_lea.hbm %s4484_s0, 1  ;;  %p4490_p0 = scmp.lt.s32.totalorder %s4484_s0, %s7938_s7 }
 0x63d   : > { %3070 = vst.msk [vmem:[#allocation5 + $0x100] sm:$0xff] %vm3053_vm5, %v2990_v13  ;;  %p4486_p11 = scmp.ne.s32.totalorder %s4484_s0, %s4485_s11  ;;  %p4491_p1 = scmp.lt.s32.totalorder %s4489_s20, %s4485_s11 }
 0x63e   : > { %v3124_v22 = vpop.permute.xlu0 %3123 }
 0x63f   : > { %3204 = vst.msk [vmem:[#allocation5 + $0x100] sm:$0xff] %vm3187_vm6, %v3124_v22  ;;  %p4487_p12 = pnand %p4486_p11, %p4703_p5  ;;  %p4492_p2 = por %p4491_p1, %p4490_p0 }
 0x640   : > { %3335 = vst.msk [vmem:[#allocation5 + $0x100] sm:$0xff] %vm3318_vm7, %v3255_v49  ;;  %v3614_v49 = vld [vmem:[#allocation5 + $0x1d8] sm:$0xff] }
 0x641   : > { %p4488_p13 = pneg %p4487_p12 }
 0x643   : > { %p4493_p3 = pnand %p4492_p2, %p4488_p13 }
 0x644   : > { %v3152_v45 = vpop.permute.xlu1 %3151  ;;  %v3020_v44 = vpop.permute.xlu2 %3019 }
 0x645   : > { %3218 = vst.msk [vmem:[#allocation5 + $0x1e0] sm:$0xff] %vm3187_vm6, %v3152_v45 }
 0x646   : > { %v3283_v29 = vpop.permute.xlu0 %3282 }
 0x647   : > { %3349 = vst.msk [vmem:[#allocation5 + $0x1e0] sm:$0xff] %vm3318_vm7, %v3283_v29 }
 0x648   : > { %3484 = vst.msk [vmem:[#allocation5 + $0x1e0] sm:$0xff] %vm3453_vm8, %v3418_v28  ;;  %v4018_v28 = vadd.f32 %v4017_v10, %v7639_v5 }
 0x64c   : > { %v3390_v27 = vpop.permute.xlu1 %3389  ;;  %v3257_v61 = vpop.permute.xlu2 %3256 }
 0x64d   : > { %3470 = vst.msk [vmem:[#allocation5 + $0x100] sm:$0xff] %vm3453_vm8, %v3390_v27 }
 0x64e   : > { %v2726_v15 = vpop.permute.xlu0 %2725 }
 0x64f   : > { %2805 = vst.msk [vmem:[#allocation5 + $0x110] sm:$0xff] %vm2787_vm2, %v2726_v15  ;;  %v3615_v2 = vld [vmem:[#allocation5 + $0x1e0] sm:$0xff] }
 0x650   : > { %2936 = vst.msk [vmem:[#allocation5 + $0x110] sm:$0xff] %vm2918_vm3, %v2857_v41  ;;  %3843 = vmatmul.f32.gmra.mxu3 %v3615_v2 }
 0x652   : > { %v3790_v63 = vpop.f32.mrf.mxu1 }
 0x653   : > { %v3791_v33 = vadd.f32 %v7373_v0, %v3790_v63 }
 0x654   : > { %v2754_v39 = vpop.permute.xlu1 %2753  ;;  %v3587_v34 = vld [vmem:[#allocation5 + $0x100] sm:$0xff]  ;;  %v3420_v52 = vpop.permute.xlu2 %3419 }
 0x655   : > { %2819 = vst.msk [vmem:[#allocation5 + $0x1f0] sm:$0xff] %vm2787_vm2, %v2754_v39  ;;  %3801 = vmatmul.f32.gmra.mxu1 %v3587_v34  ;;  %v3904_v25 = vadd.f32 %v3903_v19, %v3791_v33  ;;  %v3618_v39 = vld [vmem:[#allocation5 + $0x1f8] sm:$0xff] }
 0x656   : > { %v2885_v50 = vpop.permute.xlu0 %2884 }
 0x657   : > { %2950 = vst.msk [vmem:[#allocation5 + $0x1f0] sm:$0xff] %vm2918_vm3, %v2885_v50  ;;  %v3975_v56 = vmax.f32 %v3904_v25, 0.0 }
 0x658   : > { %3085 = vst.msk [vmem:[#allocation5 + $0x1f0] sm:$0xff] %vm3053_vm5, %v3020_v44  ;;  %v3616_v44 = vld [vmem:[#allocation5 + $0x1e8] sm:$0xff] }
 0x659   : > { %v4019_v7 = vsel %vm3995_vm9, %v3975_v56, 0.0 }
 0x65a   : > { %v4020_v45 = vadd.f32 %v4019_v7, %v4018_v28 }
 0x65c   : > { %v2992_v26 = vpop.permute.xlu1 %2991  ;;  %v2994_v14 = vpop.permute.xlu2 %2993 }
 0x65d   : > { %3071 = vst.msk [vmem:[#allocation5 + $0x110] sm:$0xff] %vm3053_vm5, %v2992_v26 }
 0x65e   : > { %v3126_v8 = vpop.permute.xlu0 %3125 }
 0x65f   : > { %3205 = vst.msk [vmem:[#allocation5 + $0x110] sm:$0xff] %vm3187_vm6, %v3126_v8 }
 0x660   : > { %3336 = vst.msk [vmem:[#allocation5 + $0x110] sm:$0xff] %vm3318_vm7, %v3257_v61 }
 0x664   : > { %v3154_v24 = vpop.permute.xlu1 %3153  ;;  %v3394_v35 = vpop.permute.xlu2 %3393 }
 0x665   : > { %3219 = vst.msk [vmem:[#allocation5 + $0x1f0] sm:$0xff] %vm3187_vm6, %v3154_v24 }
 0x666   : > { %v3285_v58 = vpop.permute.xlu0 %3284 }
 0x667   : > { %3350 = vst.msk [vmem:[#allocation5 + $0x1f0] sm:$0xff] %vm3318_vm7, %v3285_v58 }
 0x668   : > { %3485 = vst.msk [vmem:[#allocation5 + $0x1f0] sm:$0xff] %vm3453_vm8, %v3420_v52 }
 0x66c   : > { %v3392_v17 = vpop.permute.xlu1 %3391  ;;  %v2996_v60 = vpop.permute.xlu2 %2995 }
 0x66d   : > { %3471 = vst.msk [vmem:[#allocation5 + $0x110] sm:$0xff] %vm3453_vm8, %v3392_v17  ;;  %v3820_v17 = vpop.f32.mrf.mxu3 }
 0x66e   : > { %v2728_v36 = vpop.permute.xlu0 %2727 }
 0x66f   : > { %2806 = vst.msk [vmem:[#allocation5 + $0x120] sm:$0xff] %vm2787_vm2, %v2728_v36  ;;  %v3617_v40 = vld [vmem:[#allocation5 + $0x1f0] sm:$0xff] }
 0x670   : > { %3846 = vmatmul.f32.gmra.mxu3 %v3617_v40  ;;  %v3912_v40 = vpop.f32.mrf.mxu2 }
 0x672   : > { %v3793_v30 = vpop.f32.mrf.mxu1 }
 0x673   : > { %v3794_v1 = vadd.f32 %v7373_v0, %v3793_v30 }
 0x674   : > { %v2859_v62 = vpop.permute.xlu1 %2858  ;;  %v3589_v51 = vld [vmem:[#allocation5 + $0x110] sm:$0xff]  ;;  %v3396_v43 = vpop.permute.xlu2 %3395 }
 0x675   : > { %2937 = vst.msk [vmem:[#allocation5 + $0x120] sm:$0xff] %vm2918_vm3, %v2859_v62  ;;  %3804 = vmatmul.f32.gmra.mxu1 %v3589_v51  ;;  %v3907_v55 = vadd.f32 %v3906_v47, %v3794_v1  ;;  %v7742_v36 = vpop.f32.mrf.mxu3  ;;  %v7770_v47 = vld [vmem:[%s8300_s4] ss:$0 sm:$0xff] }
 0x676   : > { %3072 = vst.msk [vmem:[#allocation5 + $0x120] sm:$0xff] %vm3053_vm5, %v2994_v14  ;;  %v3128_v23 = vpop.permute.xlu0 %3127 }
 0x677   : > { %3206 = vst.msk [vmem:[#allocation5 + $0x120] sm:$0xff] %vm3187_vm6, %v3128_v23  ;;  %v3976_v18 = vmax.f32 %v3907_v55, 0.0 }
 0x678   : > { %4363 = vmatmul.msk.f32.vlgmr.msra.gmra.mxu3 %vm2147_vm14, %v3608_v12  ;;  %v3915_v51 = vpop.f32.mrf.mxu2 }
 0x679   : > { %v4021_v13 = vsel %vm3995_vm9, %v3976_v18, 0.0 }
 0x67a   : > { %v4022_v27 = vadd.f32 %v4021_v13, %v4020_v45  ;;  %v4073_v13 = vld [vmem:[%s8326_s5 + $0x28] sm:$0xff] }
 0x67c   : > { %v3259_v3 = vpop.permute.xlu1 %3258  ;;  %v2998_v57 = vpop.permute.xlu2 %2997 }
 0x67d   : > { %3337 = vst.msk [vmem:[#allocation5 + $0x120] sm:$0xff] %vm3318_vm7, %v3259_v3 }
 0x67e   : > { %3472 = vst.msk [vmem:[#allocation5 + $0x120] sm:$0xff] %vm3453_vm8, %v3394_v35  ;;  %v2730_v9 = vpop.permute.xlu0 %2729  ;;  %v7744_v35 = vpop.f32.mrf.mxu3 }
 0x67f   : > { %2807 = vst.msk [vmem:[#allocation5 + $0x130] sm:$0xff] %vm2787_vm2, %v2730_v9 }
 0x680   : > { %4364 = vmatmul.msk.f32.gmra.mxu3 %vm2147_vm14, %v3610_v38  ;;  %v3918_v23 = vpop.f32.mrf.mxu2 }
 0x684   : > { %v2861_v37 = vpop.permute.xlu1 %2860  ;;  %v3398_v2 = vpop.permute.xlu2 %3397 }
 0x685   : > { %2938 = vst.msk [vmem:[#allocation5 + $0x130] sm:$0xff] %vm2918_vm3, %v2861_v37  ;;  %v3591_v31 = vld [vmem:[#allocation5 + $0x120] sm:$0xff] }
 0x686   : > { %3073 = vst.msk [vmem:[#allocation5 + $0x130] sm:$0xff] %vm3053_vm5, %v2996_v60  ;;  %3807 = vmatmul.f32.gmra.mxu1 %v3591_v31  ;;  %v3130_v32 = vpop.permute.xlu0 %3129  ;;  %v7746_v62 = vpop.f32.mrf.mxu3 }
 0x687   : > { %3207 = vst.msk [vmem:[#allocation5 + $0x130] sm:$0xff] %vm3187_vm6, %v3130_v32 }
 0x688   : > { %4365 = vmatmul.msk.f32.gmra.mxu3 %vm2147_vm14, %v3612_v48  ;;  %v3921_v60 = vpop.f32.mrf.mxu2 }
 0x68c   : > { %v3261_v11 = vpop.permute.xlu1 %3260  ;;  %v3000_v50 = vpop.permute.xlu2 %2999 }
 0x68d   : > { %3338 = vst.msk [vmem:[#allocation5 + $0x130] sm:$0xff] %vm3318_vm7, %v3261_v11 }
 0x68e   : > { %3473 = vst.msk [vmem:[#allocation5 + $0x130] sm:$0xff] %vm3453_vm8, %v3396_v43  ;;  %v2732_v20 = vpop.permute.xlu0 %2731  ;;  %v7748_v53 = vpop.f32.mrf.mxu3  ;;  %v4075_v43 = vld [vmem:[%s8326_s5 + $0x38] sm:$0xff] }
 0x68f   : > { %2808 = vst.msk [vmem:[#allocation5 + $0x140] sm:$0xff] %vm2787_vm2, %v2732_v20  ;;  %4088 = vmatpush.msrb.mxu3 %v4075_v43 }
 0x690   : > { %4366 = vmatmul.msk.f32.gmra.mxu3 %vm2147_vm14, %v3614_v49  ;;  %v3924_v63 = vpop.f32.mrf.mxu2 }
 0x692   : > { %v3796_v59 = vpop.f32.mrf.mxu1 }
 0x693   : > { %v3797_v42 = vadd.f32 %v7373_v0, %v3796_v59 }
 0x694   : > { %v2863_v21 = vpop.permute.xlu1 %2862  ;;  %v3400_v14 = vpop.permute.xlu2 %3399 }
 0x695   : > { %v3910_v41 = vadd.f32 %v3909_v54, %v3797_v42  ;;  %2939 = vst.msk [vmem:[#allocation5 + $0x140] sm:$0xff] %vm2918_vm3, %v2863_v21  ;;  %v3593_v22 = vld [vmem:[#allocation5 + $0x130] sm:$0xff] }
 0x696   : > { %3074 = vst.msk [vmem:[#allocation5 + $0x140] sm:$0xff] %vm3053_vm5, %v2998_v57  ;;  %3810 = vmatmul.f32.gmra.mxu1 %v3593_v22  ;;  %v3132_v15 = vpop.permute.xlu0 %3131  ;;  %v7750_v46 = vpop.f32.mrf.mxu3  ;;  %v4074_v21 = vld [vmem:[%s8326_s5 + $0x30] sm:$0xff] }
 0x697   : > { %v3977_v29 = vmax.f32 %v3910_v41, 0.0  ;;  %3208 = vst.msk [vmem:[#allocation5 + $0x140] sm:$0xff] %vm3187_vm6, %v3132_v15  ;;  %4089 = vmatpush.msrb.mxu3 %v4074_v21 }
 0x698   : > { %4367 = vmatmul.msk.f32.gmra.mxu3 %vm2147_vm14, %v3616_v44  ;;  %v3927_v38 = vpop.f32.mrf.mxu2 }
 0x699   : > { %v4023_v0 = vsel %vm3995_vm9, %v3977_v29, 0.0  ;;  %v4072_v29 = vld [vmem:[%s8326_s5 + $0x20] sm:$0xff]  ;;  %4090 = vmatpush.msrb.mxu3 %v4073_v13 }
 0x69a   : > { %v7730_v5 = vadd.f32 %v4023_v0, %v4022_v27 }
 0x69b   : > { %4091 = vmatpush.msrb.mxu3 %v4072_v29 }
 0x69c   : > { %v3263_v61 = vpop.permute.xlu1 %3262 }
 0x69d   : > { %3339 = vst.msk [vmem:[#allocation5 + $0x140] sm:$0xff] %vm3318_vm7, %v3263_v61 }
 0x69e   : > { %3474 = vst.msk [vmem:[#allocation5 + $0x140] sm:$0xff] %vm3453_vm8, %v3398_v2  ;;  %v2734_v34 = vpop.permute.xlu0 %2733  ;;  %v7752_v12 = vpop.f32.mrf.mxu3 }
 0x69f   : > { %2809 = vst.msk [vmem:[#allocation5 + $0x150] sm:$0xff] %vm2787_vm2, %v2734_v34  ;;  %v3821_v34 = vadd.f32 %v7770_v47, %v3820_v17  ;;  %v4069_v17 = vld [vmem:[%s8326_s5 + $0x8] sm:$0xff] }
 0x6a0   : > { %4368 = vmatmul.msk.f32.gmra.mxu3 %vm2147_vm14, %v3618_v39  ;;  %v3930_v30 = vpop.f32.mrf.mxu2  ;;  %v4071_v39 = vld [vmem:[%s8326_s5 + $0x18] sm:$0xff] }
 0x6a1   : > { %4092 = vmatpush.msrb.mxu3 %v4071_v39 }
 0x6a4   : > { %v2865_v26 = vpop.permute.xlu1 %2864 }
 0x6a5   : > { %2940 = vst.msk [vmem:[#allocation5 + $0x150] sm:$0xff] %vm2918_vm3, %v2865_v26  ;;  %v3595_v52 = vld [vmem:[#allocation5 + $0x140] sm:$0xff] }
 0x6a6   : > { %3075 = vst.msk [vmem:[#allocation5 + $0x150] sm:$0xff] %vm3053_vm5, %v3000_v50  ;;  %3813 = vmatmul.f32.gmra.mxu1 %v3595_v52  ;;  %v3134_v8 = vpop.permute.xlu0 %3133 }
 0x6a7   : > { %3209 = vst.msk [vmem:[#allocation5 + $0x150] sm:$0xff] %vm3187_vm6, %v3134_v8  ;;  %v4070_v8 = vld [vmem:[%s8326_s5 + $0x10] sm:$0xff] }
 0x6a8   : > { %v3933_v4 = vpop.f32.mrf.mxu2  ;;  %4093 = vmatpush.msrb.mxu3 %v4070_v8 }
 0x6aa   : > { %4094 = vmatpush.msrb.mxu3 %v4069_v17 }
 0x6ac   : > { %v3265_v24 = vpop.permute.xlu1 %3264 }
 0x6ad   : > { %3340 = vst.msk [vmem:[#allocation5 + $0x150] sm:$0xff] %vm3318_vm7, %v3265_v24  ;;  %v3824_v24 = vadd.f32 %v7770_v47, %v7742_v36 }
 0x6ae   : > { %3475 = vst.msk [vmem:[#allocation5 + $0x150] sm:$0xff] %vm3453_vm8, %v3400_v14 }
 0x6b0   : > { %v3936_v56 = vpop.f32.mrf.mxu2 }
 0x6b2   : > { %v3799_v19 = vpop.f32.mrf.mxu1 }
 0x6b3   : > { %v7754_v3 = vpop.f32.mrf.mxu3  ;;  %v3800_v25 = vadd.f32 %v7770_v47, %v3799_v19  ;;  %v4068_v19 = vld [vmem:[%s8326_s5] sm:$0xff] }
 0x6b4   : > { %4095 = vmatpush.msrb.mxu3 %v4068_v19  ;;  %v4076_v19 = vld [vmem:[%s7937_s6] sm:$0x1] }
 0x6b5   : > { %v3597_v58 = vld [vmem:[#allocation5 + $0x150] sm:$0xff]  ;;  %v3913_v6 = vadd.f32 %v3912_v40, %v3800_v25 }
 0x6b6   : > { %3816 = vmatmul.f32.gmra.mxu1 %v3597_v58 }
 0x6b7   : > { %v3978_v49 = vmax.f32 %v3913_v6, 0.0 }
 0x6b8   : > { %v3939_v2 = vpop.f32.mrf.mxu2 }
 0x6b9   : > { %v4025_v41 = vsel %vm3995_vm9, %v3978_v49, 0.0  ;;  %v3836_v49 = vadd.f32 %v7770_v47, %v7750_v46 }
 0x6ba   : > { %v4026_v0 = vadd.f32 %v4025_v41, %v7730_v5  ;;  %v3842_v41 = vadd.f32 %v7770_v47, %v7754_v3 }
 0x6c0   : > { %v3942_v25 = vpop.f32.mrf.mxu2 }
 0x6d2   : > { %v3802_v37 = vpop.f32.mrf.mxu1 }
 0x6d3   : > { %v7756_v9 = vpop.f32.mrf.mxu3  ;;  %v3803_v11 = vadd.f32 %v7770_v47, %v3802_v37  ;;  %v3830_v37 = vadd.f32 %v7770_v47, %v7746_v62 }
 0x6d4   : > { %v3845_v29 = vadd.f32 %v7770_v47, %v7756_v9 }
 0x6d5   : > { %v3916_v20 = vadd.f32 %v3915_v51, %v3803_v11  ;;  %v3934_v51 = vadd.f32 %v3933_v4, %v3821_v34 }
 0x6d7   : > { %v3979_v42 = vmax.f32 %v3916_v20, 0.0  ;;  %v3943_v20 = vadd.f32 %v3942_v25, %v3830_v37 }
 0x6d9   : > { %v4027_v44 = vsel %vm3995_vm9, %v3979_v42, 0.0 }
 0x6da   : > { %v4028_v52 = vadd.f32 %v4027_v44, %v4026_v0 }
 0x6f2   : > { %v3805_v31 = vpop.f32.mrf.mxu1 }
 0x6f3   : > { %v7758_v16 = vpop.f32.mrf.mxu3  ;;  %v3806_v55 = vadd.f32 %v7770_v47, %v3805_v31 }
 0x6f5   : > { %v3919_v59 = vadd.f32 %v3918_v23, %v3806_v55  ;;  %v3827_v23 = vadd.f32 %v7770_v47, %v7744_v35  ;;  %v3985_v35 = vmax.f32 %v3934_v51, 0.0 }
 0x6f7   : > { %v3980_v22 = vmax.f32 %v3919_v59, 0.0  ;;  %v3940_v4 = vadd.f32 %v3939_v2, %v3827_v23 }
 0x6f9   : > { %v4029_v50 = vsel %vm3995_vm9, %v3980_v22, 0.0 }
 0x6fa   : > { %v4030_v58 = vadd.f32 %v4029_v50, %v4028_v52 }
 0x6fb   : > { %v7763_v33 = vpop.f32.mrf.mxu3 }
 0x703   : > { %v3808_v32 = vpop.f32.mrf.mxu1  ;;  %v7765_v1 = vpop.f32.mrf.mxu3 }
 0x704   : > { %v3809_v10 = vadd.f32 %v7770_v47, %v3808_v32 }
 0x706   : > { %v3922_v54 = vadd.f32 %v3921_v60, %v3809_v10 }
 0x708   : > { %v3981_v27 = vmax.f32 %v3922_v54, 0.0  ;;  %v3988_v54 = vmax.f32 %v3943_v20, 0.0 }
 0x70a   : > { %v4031_v5 = vsel %vm3995_vm9, %v3981_v27, 0.0 }
 0x70b   : > { %v7775_v57 = vpop.f32.mrf.mxu3  ;;  %v4032_v36 = vadd.f32 %v4031_v5, %v4030_v58 }
 0x713   : > { %v3811_v48 = vpop.f32.mrf.mxu1  ;;  %v3954_v61 = vpop.f32.mrf.mxu3 }
 0x714   : > { %v3812_v7 = vadd.f32 %v7770_v47, %v3811_v48  ;;  %v3955_v27 = vadd.f32 %v3954_v61, %v3842_v41 }
 0x716   : > { %v3925_v45 = vadd.f32 %v3924_v63, %v3812_v7  ;;  %v3992_v34 = vmax.f32 %v3955_v27, 0.0 }
 0x718   : > { %v3982_v26 = vmax.f32 %v3925_v45, 0.0  ;;  %v4053_v8 = vsel %vm3995_vm9, %v3992_v34, 0.0 }
 0x71a   : > { %v4033_v60 = vsel %vm3995_vm9, %v3982_v26, 0.0 }
 0x71b   : > { %v4034_v32 = vadd.f32 %v4033_v60, %v4032_v36  ;;  %v3957_v11 = vpop.f32.mrf.mxu3 }
 0x71c   : > { %v3958_v3 = vadd.f32 %v3957_v11, %v3845_v29 }
 0x71e   : > { %v3993_v52 = vmax.f32 %v3958_v3, 0.0 }
 0x723   : > { %v3814_v18 = vpop.f32.mrf.mxu1 }
 0x724   : > { %v3815_v28 = vadd.f32 %v7770_v47, %v3814_v18  ;;  %v4039_v18 = vsel %vm3995_vm9, %v3985_v35, 0.0 }
 0x726   : > { %v3928_v15 = vadd.f32 %v3927_v38, %v3815_v28  ;;  %v3937_v38 = vadd.f32 %v3936_v56, %v3824_v24  ;;  %v3833_v56 = vadd.f32 %v7770_v47, %v7748_v53  ;;  %v3839_v28 = vadd.f32 %v7770_v47, %v7752_v12  ;;  %v3960_v12 = vpop.f32.mrf.mxu3 }
 0x727   : > { %v3949_v53 = vadd.f32 %v7765_v1, %v3836_v49  ;;  %v3848_v1 = vadd.f32 %v7770_v47, %v7758_v16  ;;  %v4055_v16 = vsel %vm3995_vm9, %v3993_v52, 0.0 }
 0x728   : > { %v3983_v14 = vmax.f32 %v3928_v15, 0.0  ;;  %v3986_v55 = vmax.f32 %v3937_v38, 0.0  ;;  %v3946_v59 = vadd.f32 %v7763_v33, %v3833_v56  ;;  %v3952_v46 = vadd.f32 %v7775_v57, %v3839_v28 }
 0x729   : > { %v4045_v33 = vsel %vm3995_vm9, %v3988_v54, 0.0  ;;  %v3990_v44 = vmax.f32 %v3949_v53, 0.0  ;;  %v3961_v50 = vadd.f32 %v3960_v12, %v3848_v1 }
 0x72a   : > { %v4035_v43 = vsel %vm3995_vm9, %v3983_v14, 0.0  ;;  %v4041_v42 = vsel %vm3995_vm9, %v3986_v55, 0.0  ;;  %v3989_v22 = vmax.f32 %v3946_v59, 0.0  ;;  %v3991_v0 = vmax.f32 %v3952_v46, 0.0 }
 0x72b   : > { %v4036_v6 = vadd.f32 %v4035_v43, %v4034_v32  ;;  %v4049_v57 = vsel %vm3995_vm9, %v3990_v44, 0.0  ;;  %v3994_v24 = vmax.f32 %v3961_v50, 0.0 }
 0x72c   : > { %v4047_v2 = vsel %vm3995_vm9, %v3989_v22, 0.0  ;;  %v4051_v9 = vsel %vm3995_vm9, %v3991_v0, 0.0 }
 0x72d   : > { %v4057_v14 = vsel %vm3995_vm9, %v3994_v24, 0.0 }
 0x733   : > { %v3817_v40 = vpop.f32.mrf.mxu1 }
 0x734   : > { %v3818_v63 = vadd.f32 %v7770_v47, %v3817_v40 }
 0x736   : > { %v3931_v31 = vadd.f32 %v3930_v30, %v3818_v63  ;;  %v3987_v30 = vmax.f32 %v3940_v4, 0.0 }
 0x738   : > { %v3984_v48 = vmax.f32 %v3931_v31, 0.0  ;;  %v4043_v13 = vsel %vm3995_vm9, %v3987_v30, 0.0 }
 0x73a   : > { %v4037_v10 = vsel %vm3995_vm9, %v3984_v48, 0.0 }
 0x73b   : > { %v4038_v62 = vadd.f32 %v4037_v10, %v4036_v6 }
 0x73d   : > { %v4040_v7 = vadd.f32 %v4039_v18, %v4038_v62 }
 0x73f   : > { %v4042_v21 = vadd.f32 %v4041_v42, %v4040_v7 }
 0x741   : > { %v4044_v45 = vadd.f32 %v4043_v13, %v4042_v21 }
 0x743   : > { %v4046_v15 = vadd.f32 %v4045_v33, %v4044_v45 }
 0x745   : > { %v4048_v39 = vadd.f32 %v4047_v2, %v4046_v15 }
 0x747   : > { %v4050_v26 = vadd.f32 %v4049_v57, %v4048_v39 }
 0x749   : > { %v4052_v61 = vadd.f32 %v4051_v9, %v4050_v26 }
 0x74b   : > { %v4054_v5 = vadd.f32 %v4053_v8, %v4052_v61 }
 0x74d   : > { %v4056_v47 = vadd.f32 %v4055_v16, %v4054_v5 }
 0x74f   : > { %v4058_v58 = vadd.f32 %v4057_v14, %v4056_v47 }
 0x751   : > { %v4059_v40 = vrot.slane %v4058_v58, 4 }
 0x753   : > { %v4060_v17 = vadd.f32 %v4059_v40, %v4058_v58 }
 0x755   : > { %v4061_v51 = vrot.slane %v4060_v17, 2 }
 0x757   : > { %v4062_v23 = vadd.f32 %v4061_v51, %v4060_v17 }
 0x759   : > { %v4063_v60 = vrot.slane %v4062_v23, 1 }
 0x75b   : > { %v4064_v63 = vadd.f32 %v4063_v60, %v4062_v23 }
 0x75d   : > { %v4065_v36 = vmul.f32 0.00390625, %v4064_v63 }
 0x75f   : > { %4369 = vmatmul.msk.f32.vlgmr.msrb.gmra.mxu3 %vm3995_vm9, %v4065_v36  ;;  %4067 = vst.msk [vmem:[%s8115_s30] sm:$0x1] %vm4066_vm1, %v4065_v36  ;;  %s4109_s30 = scalar_lea.sflag [#allocation7], %s7843_s21 }
 0x7e2   : > { %v4097_v38 = vpop.f32.mrf.mxu3 }
 0x7e3   : > { %v4098_v37 = vadd.f32 %v4097_v38, %v4076_v19 }
 0x7e5   : > { %4103 = vrot.lane.b32.xlu0 %v4098_v37, %s4607_s28  ;;  %4101 = vst.msk [vmem:[%s355_s12] sm:$0x1] %vm4100_vm4, %v4098_v37 }
 0x7e6   : > { %4496 = shalt.err (!%p4493_p3)
}
 0x7e7   : > { %4397 = dma.vmem_to_hbm [thread:$0]  (%p4703_p5), %s4133_s26, 16, %s4135_s18, %s4109_s30   ;;  %vm4106_vm10 = vcmask 40960  }
 0x7e8   : > { %s4143_s29 = scalar_lea.hbm %s7939_s8, %s4684_s17  ;;  %s4156_s0 = scalar_lea.hbm %s7940_s9, %s4684_s17 }
 0x7e9   : > { %s4112_s1 = sand.u32 1, %s4684_s17   ;;  %s361_s11 = scalar_lea.vmem [#allocation8], %s7843_s21 }
 0x7ea   : > { %s4145_s20 = sshll.u32 %s361_s11, 4  ;;  %s4147_s25 = sshll.u32 %s4143_s29, 4  ;;  %s4146_s20 = int_to_ptr.vmem [resolvable:$true] %s4145_s20  ;;  %s4148_s25 = int_to_ptr.hbm [resolvable:$true] %s4147_s25 }
 0x7eb   : > { %s8327_s3 = scalar_lea.vmem [#allocation10], %s7843_s21  ;;  %s7882_s5 = sshll.u32 %s4156_s0, 4  ;;  %s4161_s5 = int_to_ptr.hbm [resolvable:$true] %s7882_s5 }
 0x7ec   : > { %s7880_s4 = sshll.u32 %s8327_s3, 4  ;;  %s4113_s2 = scalar_lea.sflag [#allocation9], %s4112_s1  ;;  %s4159_s4 = int_to_ptr.vmem [resolvable:$true] %s7880_s4 }
 0x7ed   : > { %s4511_s17 = sshra.s32 %s4148_s25, 4  ;;  %s4517_s26 = scalar_lea.hbm %s7939_s8, 2  ;;  %s4512_s17 = int_to_ptr.hbm [resolvable:$true] %s4511_s17 }
 0x7ee   : > { %s4513_s30 = scalar_lea.hbm %s4512_s17, 1  ;;  %p4518_p9 = scmp.lt.s32.totalorder %s4512_s17, %s7939_s8 }
 0x7ef   : > { %p4514_p4 = scmp.ne.s32.totalorder %s4512_s17, %s4513_s30  ;;  %p4519_p10 = scmp.lt.s32.totalorder %s4517_s26, %s4513_s30 }
 0x7f1   : > { %p4515_p7 = pnand %p4514_p4, %p4703_p5  ;;  %p4520_p11 = por %p4519_p10, %p4518_p9 }
 0x7f3   : > { %p4516_p8 = pneg %p4515_p7 }
 0x7f5   : > { %p4521_p12 = pnand %p4520_p11, %p4516_p8 }
 0x857   : > { %v4104_v43 = vpop.permute.xlu0 %4103 }
 0x858   : > { %4107 = vst.msk [vmem:[%s361_s11] sm:$0x1] %vm4106_vm10, %v4104_v43 }
 0x859   : > { %4524 = shalt.err (!%p4521_p12)
}
 0x85a   : > { %4398 = dma.vmem_to_hbm [thread:$0]  (%p4703_p5), %s4146_s20, 16, %s4148_s25, %s4113_s2  }
 0x85b   : > { %s4539_s28 = sshra.s32 %s4161_s5, 4  ;;  %s4545_s1 = scalar_lea.hbm %s7940_s9, 2  ;;  %s4540_s28 = int_to_ptr.hbm [resolvable:$true] %s4539_s28 }
 0x85c   : > { %s4541_s29 = scalar_lea.hbm %s4540_s28, 1  ;;  %p4546_p2 = scmp.lt.s32.totalorder %s4540_s28, %s7940_s9 }
 0x85d   : > { %p4542_p13 = scmp.ne.s32.totalorder %s4540_s28, %s4541_s29  ;;  %p4547_p3 = scmp.lt.s32.totalorder %s4545_s1, %s4541_s29 }
 0x85f   : > { %p4543_p0 = pnand %p4542_p13, %p4703_p5  ;;  %p4548_p4 = por %p4547_p3, %p4546_p2 }
 0x861   : > { %p4544_p1 = pneg %p4543_p0 }
 0x863   : > { %p4549_p7 = pnand %p4548_p4, %p4544_p1 }
 0x865   : > { %4552 = shalt.err (!%p4549_p7)
}
 0x866   : > { %4399 = dma.vmem_to_hbm [thread:$0]  (%p4703_p5), %s4159_s4, 16, %s4161_s5, %s4113_s2  }
 0x867 PF: > { %p4413_p8 = scmp.ge.s32.totalorder %s4591_s16, 2  ;;  %s4175_s20 = sand.u32 1, %s4579_s13  }
 0x868   : > { %s4176_s25 = scalar_lea.sflag [#allocation7], %s4175_s20 }
 0x869   : > { %p4404_p9 = pnand %p4413_p8, %p4707_p6 }
 0x86b   : > { %p4405_p10 = pneg %p4404_p9 }
 0x86d   : > { %4570 = dma.done.wait (%p4405_p10), %s4176_s25, 16  }
 0x86e   : > { %4572 = vsyncadd (%p4405_p10), %s4176_s25, 4294967280  ;;  %s8328_s30 = sadd.s32 4294967294, %s4591_s16  }
 0x86f   : > { %s4184_s23 = sand.u32 1, %s8328_s30  }
 0x870   : > { %s4185_s3 = scalar_lea.sflag [#allocation9], %s4184_s23 }
 0x871   : > { %4574 = dma.done.wait (%p4405_p10), %s4185_s3, 32  }
 0x872   : > { %4576 = vsyncadd (%p4405_p10), %s4185_s3, 4294967264  ;;  %p24_p5 = scmp.ge.s32.totalorder %s4688_s19, 4   ;;  %s8329_s13 = smov %s4583_s14 }
 0x873   : > { %s8330_s14 = smov %s4587_s15  ;;  %s8331_s15 = smov %s4701_s22 }
 0x874   : > { %s8332_s16 = smov %s4688_s19  ;;  %26 = sbr.rel (!%p24_p5) target bundleno = 12 (0xc), region = 129 }
 0x879   :  { %4207 = vsyncpa [#allocation7], 1 }
 0x87a   :  { %4209 = vsyncpa [#allocation7 + $0x1], 1 }
 0x87b   :  { %4210 = vsyncpa [#allocation9], 1 }
 0x87c   :  { %4212 = vsyncpa [#allocation9 + $0x1], 1 }

</bundles_post_ra>
